<compile_context>
chip_gen: v5e
topology: v5e:2x2
jax: 0.10.0
libtpu: 0.0.40
codegen_flags: <defaults>
</compile_context>

<pallas_src>
import functools

import jax
import jax.numpy as jnp
from jax.experimental import pallas as pl
from jax.experimental.pallas import tpu as pltpu


# --------------------------- fused kernel ---------------------------
def _fused_lstm_kernel(ids_ref, emb_ref,
                       wih0_ref, whh0_ref, b0_ref,
                       wih1_ref, whh1_ref, b1_ref,
                       wfc_ref, bfc_ref,
                       out_ref,
                       gx0_ref,
                       *, T, B, H):
    TB = T * B
    V = emb_ref.shape[0]          # lane-padded vocab (multiple of 128)

    # ---- Embedding gather fused in-kernel as an exact one-hot f32 matmul ----
    ids = ids_ref[...]                                              # (TB, 1) int32
    lane = jax.lax.broadcasted_iota(jnp.int32, (TB, V), 1)
    onehot = (lane == ids).astype(jnp.float32)                      # (TB, V)
    x = jnp.dot(onehot, emb_ref[...],
                preferred_element_type=jnp.float32)                 # (TB, E), exact

    # ---- Hoisted layer-0 input projection, staged in VMEM scratch ----
    # (bias = b_ih + b_hh, so adding once here is exact.)
    gx0_ref[...] = (jnp.dot(x.astype(jnp.bfloat16), wih0_ref[...],
                            preferred_element_type=jnp.float32) + b0_ref[...])

    whh0 = whh0_ref[...]
    wih1 = wih1_ref[...]
    whh1 = whh1_ref[...]
    b1 = b1_ref[...]

    def cell(gx, h, c, whh):
        # Gate columns pre-permuted to [i, f, o, g]:
        # one sigmoid over (B, 3H), one tanh over (B, H).
        gates = gx + jnp.dot(h.astype(jnp.bfloat16), whh,
                             preferred_element_type=jnp.float32)
        s = jax.nn.sigmoid(gates[:, :3 * H])
        i = s[:, 0 * H:1 * H]
        f = s[:, 1 * H:2 * H]
        o = s[:, 2 * H:3 * H]
        g = jnp.tanh(gates[:, 3 * H:4 * H])
        c_new = f * c + i * g
        h_new = o * jnp.tanh(c_new)
        return h_new, c_new

    zeros = jnp.zeros((B, H), jnp.float32)

    # Step 0: layer 0 only (layer 1 has nothing to consume yet).
    h0, c0 = cell(gx0_ref[0:B, :], zeros, zeros, whh0)
    h1, c1 = zeros, zeros
    h0_prev = h0

    # Skewed interleave: layer-0 step t and layer-1 step t-1 are independent
    # inside one unrolled iteration -> two matmul/EUP chains in flight.
    for t in range(1, T):
        gx1 = jnp.dot(h0_prev.astype(jnp.bfloat16), wih1,
                      preferred_element_type=jnp.float32) + b1
        h0, c0 = cell(gx0_ref[t * B:(t + 1) * B, :], h0, c0, whh0)
        h1, c1 = cell(gx1, h1, c1, whh1)
        h0_prev = h0

    # Tail: layer-1 consumes layer-0's last hidden state.
    gx1 = jnp.dot(h0_prev.astype(jnp.bfloat16), wih1,
                  preferred_element_type=jnp.float32) + b1
    h1, c1 = cell(gx1, h1, c1, whh1)

    # ---- FC head, lane-dense (B, 128) store; real classes in [:, :C] ----
    out_ref[...] = (jnp.dot(h1, wfc_ref[...],
                            preferred_element_type=jnp.float32) + bfc_ref[...])


# ----------------------- parameter preparation -----------------------
def _regroup_gates(w, H):
    """PyTorch gate order [i, f, g, o] -> [i, f, o, g] along the last axis."""
    i_f = w[..., 0:2 * H]
    g = w[..., 2 * H:3 * H]
    o = w[..., 3 * H:4 * H]
    return jnp.concatenate([i_f, o, g], axis=-1)


def prepare_params(params):
    """One-time weight-side prep: gate permute, bf16 cast, vocab/class padding."""
    H = params["w_hh_l0"].shape[0]
    C = params["w_fc_t"].shape[1]
    V, E = params["embedding"].shape
    V_pad = ((V + 127) // 128) * 128
    C_pad = 128

    emb_pad = jnp.zeros((V_pad, E), jnp.float32).at[:V, :].set(
        params["embedding"].astype(jnp.float32))
    wfc_pad = jnp.zeros((H, C_pad), jnp.float32).at[:, :C].set(
        params["w_fc_t"].astype(jnp.float32))
    bfc_pad = jnp.zeros((1, C_pad), jnp.float32).at[0, :C].set(
        params["b_fc"].astype(jnp.float32))

    return {
        "emb": emb_pad,
        "wih0": _regroup_gates(params["w_ih_l0"], H).astype(jnp.bfloat16),
        "whh0": _regroup_gates(params["w_hh_l0"], H).astype(jnp.bfloat16),
        "b0": _regroup_gates(params["b_l0"], H).reshape(1, 4 * H).astype(jnp.float32),
        "wih1": _regroup_gates(params["w_ih_l1"], H).astype(jnp.bfloat16),
        "whh1": _regroup_gates(params["w_hh_l1"], H).astype(jnp.bfloat16),
        "b1": _regroup_gates(params["b_l1"], H).reshape(1, 4 * H).astype(jnp.float32),
        "wfc": wfc_pad,
        "bfc": bfc_pad,
    }


# --------------------------- full forward ---------------------------
@functools.partial(jax.jit, static_argnames=("num_classes",))
def lstm_model_forward(token_ids, prep, *, num_classes):
    """token_ids: (B, T) int32 -> logits (B, num_classes) f32."""
    B, T = token_ids.shape
    H = prep["whh0"].shape[0]
    B_pad = ((B + 7) // 8) * 8

    # Tiny int32 prep (fused by jit into the same executable as the kernel):
    # time-major ids, batch padded to 8 sublanes, flattened to (T*B_pad, 1).
    ids_tm = jnp.transpose(token_ids.astype(jnp.int32))             # (T, B)
    ids_tm = jnp.pad(ids_tm, ((0, 0), (0, B_pad - B)))               # (T, B_pad)
    ids_flat = ids_tm.reshape(T * B_pad, 1)

    vmem = pltpu.MemorySpace.VMEM
    out = pl.pallas_call(
        functools.partial(_fused_lstm_kernel, T=T, B=B_pad, H=H),
        out_shape=jax.ShapeDtypeStruct((B_pad, prep["wfc"].shape[1]), jnp.float32),
        in_specs=[pl.BlockSpec(memory_space=vmem)] * 10,
        out_specs=pl.BlockSpec(memory_space=vmem),
        scratch_shapes=[pltpu.VMEM((T * B_pad, 4 * H), jnp.float32)],
    )(
        ids_flat, prep["emb"],
        prep["wih0"], prep["whh0"], prep["b0"],
        prep["wih1"], prep["whh1"], prep["b1"],
        prep["wfc"], prep["bfc"],
    )
    # Dropout in the PyTorch module is never applied in forward() -> no-op.
    return out[:B, :num_classes]


# ----------------------- pure-JAX reference check -----------------------
def _reference_forward(token_ids, params):
    emb = jnp.take(params["embedding"], token_ids, axis=0).astype(jnp.float32)
    B = emb.shape[0]

    def run_layer(x_bt_e, w_ih_t, w_hh_t, b):
        H = w_hh_t.shape[0]

        def step(carry, x_t):
            h, c = carry
            gates = x_t @ w_ih_t + h @ w_hh_t + b
            i = jax.nn.sigmoid(gates[:, 0 * H:1 * H])
            f = jax.nn.sigmoid(gates[:, 1 * H:2 * H])
            g = jnp.tanh(gates[:, 2 * H:3 * H])
            o = jax.nn.sigmoid(gates[:, 3 * H:4 * H])
            c = f * c + i * g
            h = o * jnp.tanh(c)
            return (h, c), h

        h0 = jnp.zeros((B, H), jnp.float32)
        c0 = jnp.zeros((B, H), jnp.float32)
        _, hs = jax.lax.scan(step, (h0, c0), jnp.transpose(x_bt_e, (1, 0, 2)))
        return jnp.transpose(hs, (1, 0, 2))

    y0 = run_layer(emb, params["w_ih_l0"], params["w_hh_l0"], params["b_l0"])
    y1 = run_layer(y0, params["w_ih_l1"], params["w_hh_l1"], params["b_l1"])
    return y1[:, -1, :] @ params["w_fc_t"] + params["b_fc"]


# --------------------------------- main ---------------------------------
if __name__ == "__main__":
    VOCAB = 50
    EMBED = 64
    HIDDEN = 128
    NUM_CLASSES = 2
    B, T = 4, 8

    key = jax.random.PRNGKey(0)
    ks = jax.random.split(key, 12)
    scale = 0.08

    params = {
        "embedding": scale * jax.random.normal(ks[0], (VOCAB, EMBED), jnp.float32),
        # PyTorch weight_ih/_hh are (4H, in); stored transposed for x @ W^T.
        "w_ih_l0": scale * jax.random.normal(ks[1], (EMBED, 4 * HIDDEN), jnp.float32),
        "w_hh_l0": scale * jax.random.normal(ks[2], (HIDDEN, 4 * HIDDEN), jnp.float32),
        "b_l0": (scale * jax.random.normal(ks[3], (4 * HIDDEN,), jnp.float32)
                 + scale * jax.random.normal(ks[4], (4 * HIDDEN,), jnp.float32)),
        "w_ih_l1": scale * jax.random.normal(ks[5], (HIDDEN, 4 * HIDDEN), jnp.float32),
        "w_hh_l1": scale * jax.random.normal(ks[6], (HIDDEN, 4 * HIDDEN), jnp.float32),
        "b_l1": (scale * jax.random.normal(ks[7], (4 * HIDDEN,), jnp.float32)
                 + scale * jax.random.normal(ks[8], (4 * HIDDEN,), jnp.float32)),
        "w_fc_t": scale * jax.random.normal(ks[9], (HIDDEN, NUM_CLASSES), jnp.float32),
        "b_fc": scale * jax.random.normal(ks[10], (NUM_CLASSES,), jnp.float32),
    }

    token_ids = jax.random.randint(ks[11], (B, T), 0, VOCAB, dtype=jnp.int32)

    prep = prepare_params(params)
    logits = jax.block_until_ready(
        lstm_model_forward(token_ids, prep, num_classes=NUM_CLASSES))
    assert logits.shape == (B, NUM_CLASSES) and logits.dtype == jnp.float32

    ref = jax.block_until_ready(_reference_forward(token_ids, params))
    # bf16 MXU operands (f32 accumulation / gate math) -> relaxed tolerance vs
    # the pure-f32 reference.
    assert jnp.allclose(logits, ref, atol=2e-2, rtol=2e-2), (
        logits, ref, jnp.max(jnp.abs(logits - ref)))

    print("KERNEL_OK")
</pallas_src>

<mosaic_0001>
module attributes {stable_mosaic.version = 11 : i64} {
  func.func @_fused_lstm_kernel(%arg0: memref<64x1xi32, #tpu.memory_space<vmem>>, %arg1: memref<128x64xf32, #tpu.memory_space<vmem>>, %arg2: memref<64x512xbf16, #tpu.memory_space<vmem>>, %arg3: memref<128x512xbf16, #tpu.memory_space<vmem>>, %arg4: memref<1x512xf32, #tpu.memory_space<vmem>>, %arg5: memref<128x512xbf16, #tpu.memory_space<vmem>>, %arg6: memref<128x512xbf16, #tpu.memory_space<vmem>>, %arg7: memref<1x512xf32, #tpu.memory_space<vmem>>, %arg8: memref<128x128xf32, #tpu.memory_space<vmem>>, %arg9: memref<1x128xf32, #tpu.memory_space<vmem>>, %arg10: memref<8x128xf32, #tpu.memory_space<vmem>>, %arg11: memref<64x512xf32, #tpu.memory_space<vmem>>) attributes {dimension_semantics = [], scalar_prefetch = 0 : i64, scratch_operands = 1 : i64, tpu.core_type = #tpu.core_type<tc>} {
    %c0 = arith.constant 0 : index
    %c0_0 = arith.constant 0 : index
    %0 = vector.load %arg0[%c0, %c0_0] : memref<64x1xi32, #tpu.memory_space<vmem>>, vector<64x1xi32>
    %1 = tpu.iota {dimensions = array<i32: 1>} : vector<64x128xi32>
    %2 = vector.broadcast %0 : vector<64x1xi32> to vector<64x128xi32>
    %3 = arith.cmpi eq, %1, %2 : vector<64x128xi32>
    %4 = arith.extui %3 : vector<64x128xi1> to vector<64x128xi32>
    %5 = arith.sitofp %4 : vector<64x128xi32> to vector<64x128xf32>
    %c0_1 = arith.constant 0 : index
    %c0_2 = arith.constant 0 : index
    %6 = vector.load %arg1[%c0_1, %c0_2] : memref<128x64xf32, #tpu.memory_space<vmem>>, vector<128x64xf32>
    %cst = arith.constant dense<0.000000e+00> : vector<64x64xf32>
    %7 = tpu.matmul %5, %6, %cst {dimension_numbers = #tpu.dot_dimension_numbers<[1], [0], [0], [1], [0, 0, 1, 1], [], []>} : vector<64x128xf32>, vector<128x64xf32>, vector<64x64xf32> -> vector<64x64xf32>
    %8 = arith.truncf %7 : vector<64x64xf32> to vector<64x64xbf16>
    %c0_3 = arith.constant 0 : index
    %c0_4 = arith.constant 0 : index
    %9 = vector.load %arg2[%c0_3, %c0_4] : memref<64x512xbf16, #tpu.memory_space<vmem>>, vector<64x512xbf16>
    %cst_5 = arith.constant dense<0.000000e+00> : vector<64x512xf32>
    %10 = tpu.matmul %8, %9, %cst_5 {dimension_numbers = #tpu.dot_dimension_numbers<[1], [0], [0], [1], [0, 0, 1, 1], [], []>} : vector<64x64xbf16>, vector<64x512xbf16>, vector<64x512xf32> -> vector<64x512xf32>
    %c0_6 = arith.constant 0 : index
    %c0_7 = arith.constant 0 : index
    %11 = vector.load %arg4[%c0_6, %c0_7] : memref<1x512xf32, #tpu.memory_space<vmem>>, vector<1x512xf32>
    %12 = vector.broadcast %11 : vector<1x512xf32> to vector<64x512xf32>
    %13 = arith.addf %10, %12 : vector<64x512xf32>
    %c0_8 = arith.constant 0 : index
    %c0_9 = arith.constant 0 : index
    %14 = vector.load %arg11[%c0_8, %c0_9] : memref<64x512xf32, #tpu.memory_space<vmem>>, vector<64x512xf32>
    tpu.vector_store %arg11[%c0_8, %c0_9], %13 {strides = array<i32>} : memref<64x512xf32, #tpu.memory_space<vmem>>, vector<64x512xf32>,
    %c0_10 = arith.constant 0 : index
    %c0_11 = arith.constant 0 : index
    %15 = vector.load %arg3[%c0_10, %c0_11] : memref<128x512xbf16, #tpu.memory_space<vmem>>, vector<128x512xbf16>
    %c0_12 = arith.constant 0 : index
    %c0_13 = arith.constant 0 : index
    %16 = vector.load %arg5[%c0_12, %c0_13] : memref<128x512xbf16, #tpu.memory_space<vmem>>, vector<128x512xbf16>
    %c0_14 = arith.constant 0 : index
    %c0_15 = arith.constant 0 : index
    %17 = vector.load %arg6[%c0_14, %c0_15] : memref<128x512xbf16, #tpu.memory_space<vmem>>, vector<128x512xbf16>
    %c0_16 = arith.constant 0 : index
    %c0_17 = arith.constant 0 : index
    %18 = vector.load %arg7[%c0_16, %c0_17] : memref<1x512xf32, #tpu.memory_space<vmem>>, vector<1x512xf32>
    %cst_18 = arith.constant 0.000000e+00 : f32
    %19 = vector.broadcast %cst_18 : f32 to vector<8x128xf32>
    %c0_19 = arith.constant 0 : index
    %c0_20 = arith.constant 0 : index
    %20 = vector.load %arg11[%c0_19, %c0_20] : memref<64x512xf32, #tpu.memory_space<vmem>>, vector<8x512xf32>
    %21 = arith.truncf %19 : vector<8x128xf32> to vector<8x128xbf16>
    %cst_21 = arith.constant dense<0.000000e+00> : vector<8x512xf32>
    %22 = tpu.matmul %21, %15, %cst_21 {dimension_numbers = #tpu.dot_dimension_numbers<[1], [0], [0], [1], [0, 0, 1, 1], [], []>} : vector<8x128xbf16>, vector<128x512xbf16>, vector<8x512xf32> -> vector<8x512xf32>
    %23 = arith.addf %20, %22 : vector<8x512xf32>
    %24 = vector.extract_strided_slice %23 {offsets = [0, 0], sizes = [8, 384], strides = [1, 1]} : vector<8x512xf32> to vector<8x384xf32>
    %25 = arith.negf %24 : vector<8x384xf32>
    %26 = math.exp %25 : vector<8x384xf32>
    %cst_22 = arith.constant 1.000000e+00 : f32
    %27 = vector.broadcast %cst_22 : f32 to vector<8x384xf32>
    %28 = arith.addf %27, %26 : vector<8x384xf32>
    %29 = arith.divf %27, %28 : vector<8x384xf32>
    %30 = vector.extract_strided_slice %29 {offsets = [0, 0], sizes = [8, 128], strides = [1, 1]} : vector<8x384xf32> to vector<8x128xf32>
    %31 = vector.extract_strided_slice %29 {offsets = [0, 128], sizes = [8, 128], strides = [1, 1]} : vector<8x384xf32> to vector<8x128xf32>
    %32 = vector.extract_strided_slice %29 {offsets = [0, 256], sizes = [8, 128], strides = [1, 1]} : vector<8x384xf32> to vector<8x128xf32>
    %33 = vector.extract_strided_slice %23 {offsets = [0, 384], sizes = [8, 128], strides = [1, 1]} : vector<8x512xf32> to vector<8x128xf32>
    %34 = math.tanh %33 : vector<8x128xf32>
    %35 = arith.mulf %31, %19 : vector<8x128xf32>
    %36 = arith.mulf %30, %34 : vector<8x128xf32>
    %37 = arith.addf %35, %36 : vector<8x128xf32>
    %38 = math.tanh %37 : vector<8x128xf32>
    %39 = arith.mulf %32, %38 : vector<8x128xf32>
    %40 = arith.truncf %39 : vector<8x128xf32> to vector<8x128xbf16>
    %cst_23 = arith.constant dense<0.000000e+00> : vector<8x512xf32>
    %41 = tpu.matmul %40, %16, %cst_23 {dimension_numbers = #tpu.dot_dimension_numbers<[1], [0], [0], [1], [0, 0, 1, 1], [], []>} : vector<8x128xbf16>, vector<128x512xbf16>, vector<8x512xf32> -> vector<8x512xf32>
    %42 = vector.broadcast %18 : vector<1x512xf32> to vector<8x512xf32>
    %43 = arith.addf %41, %42 : vector<8x512xf32>
    %c8 = arith.constant 8 : index
    %c0_24 = arith.constant 0 : index
    %44 = vector.load %arg11[%c8, %c0_24] : memref<64x512xf32, #tpu.memory_space<vmem>>, vector<8x512xf32>
    %45 = arith.truncf %39 : vector<8x128xf32> to vector<8x128xbf16>
    %cst_25 = arith.constant dense<0.000000e+00> : vector<8x512xf32>
    %46 = tpu.matmul %45, %15, %cst_25 {dimension_numbers = #tpu.dot_dimension_numbers<[1], [0], [0], [1], [0, 0, 1, 1], [], []>} : vector<8x128xbf16>, vector<128x512xbf16>, vector<8x512xf32> -> vector<8x512xf32>
    %47 = arith.addf %44, %46 : vector<8x512xf32>
    %48 = vector.extract_strided_slice %47 {offsets = [0, 0], sizes = [8, 384], strides = [1, 1]} : vector<8x512xf32> to vector<8x384xf32>
    %49 = arith.negf %48 : vector<8x384xf32>
    %50 = math.exp %49 : vector<8x384xf32>
    %cst_26 = arith.constant 1.000000e+00 : f32
    %51 = vector.broadcast %cst_26 : f32 to vector<8x384xf32>
    %52 = arith.addf %51, %50 : vector<8x384xf32>
    %53 = arith.divf %51, %52 : vector<8x384xf32>
    %54 = vector.extract_strided_slice %53 {offsets = [0, 0], sizes = [8, 128], strides = [1, 1]} : vector<8x384xf32> to vector<8x128xf32>
    %55 = vector.extract_strided_slice %53 {offsets = [0, 128], sizes = [8, 128], strides = [1, 1]} : vector<8x384xf32> to vector<8x128xf32>
    %56 = vector.extract_strided_slice %53 {offsets = [0, 256], sizes = [8, 128], strides = [1, 1]} : vector<8x384xf32> to vector<8x128xf32>
    %57 = vector.extract_strided_slice %47 {offsets = [0, 384], sizes = [8, 128], strides = [1, 1]} : vector<8x512xf32> to vector<8x128xf32>
    %58 = math.tanh %57 : vector<8x128xf32>
    %59 = arith.mulf %55, %37 : vector<8x128xf32>
    %60 = arith.mulf %54, %58 : vector<8x128xf32>
    %61 = arith.addf %59, %60 : vector<8x128xf32>
    %62 = math.tanh %61 : vector<8x128xf32>
    %63 = arith.mulf %56, %62 : vector<8x128xf32>
    %64 = arith.truncf %19 : vector<8x128xf32> to vector<8x128xbf16>
    %cst_27 = arith.constant dense<0.000000e+00> : vector<8x512xf32>
    %65 = tpu.matmul %64, %17, %cst_27 {dimension_numbers = #tpu.dot_dimension_numbers<[1], [0], [0], [1], [0, 0, 1, 1], [], []>} : vector<8x128xbf16>, vector<128x512xbf16>, vector<8x512xf32> -> vector<8x512xf32>
    %66 = arith.addf %43, %65 : vector<8x512xf32>
    %67 = vector.extract_strided_slice %66 {offsets = [0, 0], sizes = [8, 384], strides = [1, 1]} : vector<8x512xf32> to vector<8x384xf32>
    %68 = arith.negf %67 : vector<8x384xf32>
    %69 = math.exp %68 : vector<8x384xf32>
    %cst_28 = arith.constant 1.000000e+00 : f32
    %70 = vector.broadcast %cst_28 : f32 to vector<8x384xf32>
    %71 = arith.addf %70, %69 : vector<8x384xf32>
    %72 = arith.divf %70, %71 : vector<8x384xf32>
    %73 = vector.extract_strided_slice %72 {offsets = [0, 0], sizes = [8, 128], strides = [1, 1]} : vector<8x384xf32> to vector<8x128xf32>
    %74 = vector.extract_strided_slice %72 {offsets = [0, 128], sizes = [8, 128], strides = [1, 1]} : vector<8x384xf32> to vector<8x128xf32>
    %75 = vector.extract_strided_slice %72 {offsets = [0, 256], sizes = [8, 128], strides = [1, 1]} : vector<8x384xf32> to vector<8x128xf32>
    %76 = vector.extract_strided_slice %66 {offsets = [0, 384], sizes = [8, 128], strides = [1, 1]} : vector<8x512xf32> to vector<8x128xf32>
    %77 = math.tanh %76 : vector<8x128xf32>
    %78 = arith.mulf %74, %19 : vector<8x128xf32>
    %79 = arith.mulf %73, %77 : vector<8x128xf32>
    %80 = arith.addf %78, %79 : vector<8x128xf32>
    %81 = math.tanh %80 : vector<8x128xf32>
    %82 = arith.mulf %75, %81 : vector<8x128xf32>
    %83 = arith.truncf %63 : vector<8x128xf32> to vector<8x128xbf16>
    %cst_29 = arith.constant dense<0.000000e+00> : vector<8x512xf32>
    %84 = tpu.matmul %83, %16, %cst_29 {dimension_numbers = #tpu.dot_dimension_numbers<[1], [0], [0], [1], [0, 0, 1, 1], [], []>} : vector<8x128xbf16>, vector<128x512xbf16>, vector<8x512xf32> -> vector<8x512xf32>
    %85 = vector.broadcast %18 : vector<1x512xf32> to vector<8x512xf32>
    %86 = arith.addf %84, %85 : vector<8x512xf32>
    %c16 = arith.constant 16 : index
    %c0_30 = arith.constant 0 : index
    %87 = vector.load %arg11[%c16, %c0_30] : memref<64x512xf32, #tpu.memory_space<vmem>>, vector<8x512xf32>
    %88 = arith.truncf %63 : vector<8x128xf32> to vector<8x128xbf16>
    %cst_31 = arith.constant dense<0.000000e+00> : vector<8x512xf32>
    %89 = tpu.matmul %88, %15, %cst_31 {dimension_numbers = #tpu.dot_dimension_numbers<[1], [0], [0], [1], [0, 0, 1, 1], [], []>} : vector<8x128xbf16>, vector<128x512xbf16>, vector<8x512xf32> -> vector<8x512xf32>
    %90 = arith.addf %87, %89 : vector<8x512xf32>
    %91 = vector.extract_strided_slice %90 {offsets = [0, 0], sizes = [8, 384], strides = [1, 1]} : vector<8x512xf32> to vector<8x384xf32>
    %92 = arith.negf %91 : vector<8x384xf32>
    %93 = math.exp %92 : vector<8x384xf32>
    %cst_32 = arith.constant 1.000000e+00 : f32
    %94 = vector.broadcast %cst_32 : f32 to vector<8x384xf32>
    %95 = arith.addf %94, %93 : vector<8x384xf32>
    %96 = arith.divf %94, %95 : vector<8x384xf32>
    %97 = vector.extract_strided_slice %96 {offsets = [0, 0], sizes = [8, 128], strides = [1, 1]} : vector<8x384xf32> to vector<8x128xf32>
    %98 = vector.extract_strided_slice %96 {offsets = [0, 128], sizes = [8, 128], strides = [1, 1]} : vector<8x384xf32> to vector<8x128xf32>
    %99 = vector.extract_strided_slice %96 {offsets = [0, 256], sizes = [8, 128], strides = [1, 1]} : vector<8x384xf32> to vector<8x128xf32>
    %100 = vector.extract_strided_slice %90 {offsets = [0, 384], sizes = [8, 128], strides = [1, 1]} : vector<8x512xf32> to vector<8x128xf32>
    %101 = math.tanh %100 : vector<8x128xf32>
    %102 = arith.mulf %98, %61 : vector<8x128xf32>
    %103 = arith.mulf %97, %101 : vector<8x128xf32>
    %104 = arith.addf %102, %103 : vector<8x128xf32>
    %105 = math.tanh %104 : vector<8x128xf32>
    %106 = arith.mulf %99, %105 : vector<8x128xf32>
    %107 = arith.truncf %82 : vector<8x128xf32> to vector<8x128xbf16>
    %cst_33 = arith.constant dense<0.000000e+00> : vector<8x512xf32>
    %108 = tpu.matmul %107, %17, %cst_33 {dimension_numbers = #tpu.dot_dimension_numbers<[1], [0], [0], [1], [0, 0, 1, 1], [], []>} : vector<8x128xbf16>, vector<128x512xbf16>, vector<8x512xf32> -> vector<8x512xf32>
    %109 = arith.addf %86, %108 : vector<8x512xf32>
    %110 = vector.extract_strided_slice %109 {offsets = [0, 0], sizes = [8, 384], strides = [1, 1]} : vector<8x512xf32> to vector<8x384xf32>
    %111 = arith.negf %110 : vector<8x384xf32>
    %112 = math.exp %111 : vector<8x384xf32>
    %cst_34 = arith.constant 1.000000e+00 : f32
    %113 = vector.broadcast %cst_34 : f32 to vector<8x384xf32>
    %114 = arith.addf %113, %112 : vector<8x384xf32>
    %115 = arith.divf %113, %114 : vector<8x384xf32>
    %116 = vector.extract_strided_slice %115 {offsets = [0, 0], sizes = [8, 128], strides = [1, 1]} : vector<8x384xf32> to vector<8x128xf32>
    %117 = vector.extract_strided_slice %115 {offsets = [0, 128], sizes = [8, 128], strides = [1, 1]} : vector<8x384xf32> to vector<8x128xf32>
    %118 = vector.extract_strided_slice %115 {offsets = [0, 256], sizes = [8, 128], strides = [1, 1]} : vector<8x384xf32> to vector<8x128xf32>
    %119 = vector.extract_strided_slice %109 {offsets = [0, 384], sizes = [8, 128], strides = [1, 1]} : vector<8x512xf32> to vector<8x128xf32>
    %120 = math.tanh %119 : vector<8x128xf32>
    %121 = arith.mulf %117, %80 : vector<8x128xf32>
    %122 = arith.mulf %116, %120 : vector<8x128xf32>
    %123 = arith.addf %121, %122 : vector<8x128xf32>
    %124 = math.tanh %123 : vector<8x128xf32>
    %125 = arith.mulf %118, %124 : vector<8x128xf32>
    %126 = arith.truncf %106 : vector<8x128xf32> to vector<8x128xbf16>
    %cst_35 = arith.constant dense<0.000000e+00> : vector<8x512xf32>
    %127 = tpu.matmul %126, %16, %cst_35 {dimension_numbers = #tpu.dot_dimension_numbers<[1], [0], [0], [1], [0, 0, 1, 1], [], []>} : vector<8x128xbf16>, vector<128x512xbf16>, vector<8x512xf32> -> vector<8x512xf32>
    %128 = vector.broadcast %18 : vector<1x512xf32> to vector<8x512xf32>
    %129 = arith.addf %127, %128 : vector<8x512xf32>
    %c24 = arith.constant 24 : index
    %c0_36 = arith.constant 0 : index
    %130 = vector.load %arg11[%c24, %c0_36] : memref<64x512xf32, #tpu.memory_space<vmem>>, vector<8x512xf32>
    %131 = arith.truncf %106 : vector<8x128xf32> to vector<8x128xbf16>
    %cst_37 = arith.constant dense<0.000000e+00> : vector<8x512xf32>
    %132 = tpu.matmul %131, %15, %cst_37 {dimension_numbers = #tpu.dot_dimension_numbers<[1], [0], [0], [1], [0, 0, 1, 1], [], []>} : vector<8x128xbf16>, vector<128x512xbf16>, vector<8x512xf32> -> vector<8x512xf32>
    %133 = arith.addf %130, %132 : vector<8x512xf32>
    %134 = vector.extract_strided_slice %133 {offsets = [0, 0], sizes = [8, 384], strides = [1, 1]} : vector<8x512xf32> to vector<8x384xf32>
    %135 = arith.negf %134 : vector<8x384xf32>
    %136 = math.exp %135 : vector<8x384xf32>
    %cst_38 = arith.constant 1.000000e+00 : f32
    %137 = vector.broadcast %cst_38 : f32 to vector<8x384xf32>
    %138 = arith.addf %137, %136 : vector<8x384xf32>
    %139 = arith.divf %137, %138 : vector<8x384xf32>
    %140 = vector.extract_strided_slice %139 {offsets = [0, 0], sizes = [8, 128], strides = [1, 1]} : vector<8x384xf32> to vector<8x128xf32>
    %141 = vector.extract_strided_slice %139 {offsets = [0, 128], sizes = [8, 128], strides = [1, 1]} : vector<8x384xf32> to vector<8x128xf32>
    %142 = vector.extract_strided_slice %139 {offsets = [0, 256], sizes = [8, 128], strides = [1, 1]} : vector<8x384xf32> to vector<8x128xf32>
    %143 = vector.extract_strided_slice %133 {offsets = [0, 384], sizes = [8, 128], strides = [1, 1]} : vector<8x512xf32> to vector<8x128xf32>
    %144 = math.tanh %143 : vector<8x128xf32>
    %145 = arith.mulf %141, %104 : vector<8x128xf32>
    %146 = arith.mulf %140, %144 : vector<8x128xf32>
    %147 = arith.addf %145, %146 : vector<8x128xf32>
    %148 = math.tanh %147 : vector<8x128xf32>
    %149 = arith.mulf %142, %148 : vector<8x128xf32>
    %150 = arith.truncf %125 : vector<8x128xf32> to vector<8x128xbf16>
    %cst_39 = arith.constant dense<0.000000e+00> : vector<8x512xf32>
    %151 = tpu.matmul %150, %17, %cst_39 {dimension_numbers = #tpu.dot_dimension_numbers<[1], [0], [0], [1], [0, 0, 1, 1], [], []>} : vector<8x128xbf16>, vector<128x512xbf16>, vector<8x512xf32> -> vector<8x512xf32>
    %152 = arith.addf %129, %151 : vector<8x512xf32>
    %153 = vector.extract_strided_slice %152 {offsets = [0, 0], sizes = [8, 384], strides = [1, 1]} : vector<8x512xf32> to vector<8x384xf32>
    %154 = arith.negf %153 : vector<8x384xf32>
    %155 = math.exp %154 : vector<8x384xf32>
    %cst_40 = arith.constant 1.000000e+00 : f32
    %156 = vector.broadcast %cst_40 : f32 to vector<8x384xf32>
    %157 = arith.addf %156, %155 : vector<8x384xf32>
    %158 = arith.divf %156, %157 : vector<8x384xf32>
    %159 = vector.extract_strided_slice %158 {offsets = [0, 0], sizes = [8, 128], strides = [1, 1]} : vector<8x384xf32> to vector<8x128xf32>
    %160 = vector.extract_strided_slice %158 {offsets = [0, 128], sizes = [8, 128], strides = [1, 1]} : vector<8x384xf32> to vector<8x128xf32>
    %161 = vector.extract_strided_slice %158 {offsets = [0, 256], sizes = [8, 128], strides = [1, 1]} : vector<8x384xf32> to vector<8x128xf32>
    %162 = vector.extract_strided_slice %152 {offsets = [0, 384], sizes = [8, 128], strides = [1, 1]} : vector<8x512xf32> to vector<8x128xf32>
    %163 = math.tanh %162 : vector<8x128xf32>
    %164 = arith.mulf %160, %123 : vector<8x128xf32>
    %165 = arith.mulf %159, %163 : vector<8x128xf32>
    %166 = arith.addf %164, %165 : vector<8x128xf32>
    %167 = math.tanh %166 : vector<8x128xf32>
    %168 = arith.mulf %161, %167 : vector<8x128xf32>
    %169 = arith.truncf %149 : vector<8x128xf32> to vector<8x128xbf16>
    %cst_41 = arith.constant dense<0.000000e+00> : vector<8x512xf32>
    %170 = tpu.matmul %169, %16, %cst_41 {dimension_numbers = #tpu.dot_dimension_numbers<[1], [0], [0], [1], [0, 0, 1, 1], [], []>} : vector<8x128xbf16>, vector<128x512xbf16>, vector<8x512xf32> -> vector<8x512xf32>
    %171 = vector.broadcast %18 : vector<1x512xf32> to vector<8x512xf32>
    %172 = arith.addf %170, %171 : vector<8x512xf32>
    %c32 = arith.constant 32 : index
    %c0_42 = arith.constant 0 : index
    %173 = vector.load %arg11[%c32, %c0_42] : memref<64x512xf32, #tpu.memory_space<vmem>>, vector<8x512xf32>
    %174 = arith.truncf %149 : vector<8x128xf32> to vector<8x128xbf16>
    %cst_43 = arith.constant dense<0.000000e+00> : vector<8x512xf32>
    %175 = tpu.matmul %174, %15, %cst_43 {dimension_numbers = #tpu.dot_dimension_numbers<[1], [0], [0], [1], [0, 0, 1, 1], [], []>} : vector<8x128xbf16>, vector<128x512xbf16>, vector<8x512xf32> -> vector<8x512xf32>
    %176 = arith.addf %173, %175 : vector<8x512xf32>
    %177 = vector.extract_strided_slice %176 {offsets = [0, 0], sizes = [8, 384], strides = [1, 1]} : vector<8x512xf32> to vector<8x384xf32>
    %178 = arith.negf %177 : vector<8x384xf32>
    %179 = math.exp %178 : vector<8x384xf32>
    %cst_44 = arith.constant 1.000000e+00 : f32
    %180 = vector.broadcast %cst_44 : f32 to vector<8x384xf32>
    %181 = arith.addf %180, %179 : vector<8x384xf32>
    %182 = arith.divf %180, %181 : vector<8x384xf32>
    %183 = vector.extract_strided_slice %182 {offsets = [0, 0], sizes = [8, 128], strides = [1, 1]} : vector<8x384xf32> to vector<8x128xf32>
    %184 = vector.extract_strided_slice %182 {offsets = [0, 128], sizes = [8, 128], strides = [1, 1]} : vector<8x384xf32> to vector<8x128xf32>
    %185 = vector.extract_strided_slice %182 {offsets = [0, 256], sizes = [8, 128], strides = [1, 1]} : vector<8x384xf32> to vector<8x128xf32>
    %186 = vector.extract_strided_slice %176 {offsets = [0, 384], sizes = [8, 128], strides = [1, 1]} : vector<8x512xf32> to vector<8x128xf32>
    %187 = math.tanh %186 : vector<8x128xf32>
    %188 = arith.mulf %184, %147 : vector<8x128xf32>
    %189 = arith.mulf %183, %187 : vector<8x128xf32>
    %190 = arith.addf %188, %189 : vector<8x128xf32>
    %191 = math.tanh %190 : vector<8x128xf32>
    %192 = arith.mulf %185, %191 : vector<8x128xf32>
    %193 = arith.truncf %168 : vector<8x128xf32> to vector<8x128xbf16>
    %cst_45 = arith.constant dense<0.000000e+00> : vector<8x512xf32>
    %194 = tpu.matmul %193, %17, %cst_45 {dimension_numbers = #tpu.dot_dimension_numbers<[1], [0], [0], [1], [0, 0, 1, 1], [], []>} : vector<8x128xbf16>, vector<128x512xbf16>, vector<8x512xf32> -> vector<8x512xf32>
    %195 = arith.addf %172, %194 : vector<8x512xf32>
    %196 = vector.extract_strided_slice %195 {offsets = [0, 0], sizes = [8, 384], strides = [1, 1]} : vector<8x512xf32> to vector<8x384xf32>
    %197 = arith.negf %196 : vector<8x384xf32>
    %198 = math.exp %197 : vector<8x384xf32>
    %cst_46 = arith.constant 1.000000e+00 : f32
    %199 = vector.broadcast %cst_46 : f32 to vector<8x384xf32>
    %200 = arith.addf %199, %198 : vector<8x384xf32>
    %201 = arith.divf %199, %200 : vector<8x384xf32>
    %202 = vector.extract_strided_slice %201 {offsets = [0, 0], sizes = [8, 128], strides = [1, 1]} : vector<8x384xf32> to vector<8x128xf32>
    %203 = vector.extract_strided_slice %201 {offsets = [0, 128], sizes = [8, 128], strides = [1, 1]} : vector<8x384xf32> to vector<8x128xf32>
    %204 = vector.extract_strided_slice %201 {offsets = [0, 256], sizes = [8, 128], strides = [1, 1]} : vector<8x384xf32> to vector<8x128xf32>
    %205 = vector.extract_strided_slice %195 {offsets = [0, 384], sizes = [8, 128], strides = [1, 1]} : vector<8x512xf32> to vector<8x128xf32>
    %206 = math.tanh %205 : vector<8x128xf32>
    %207 = arith.mulf %203, %166 : vector<8x128xf32>
    %208 = arith.mulf %202, %206 : vector<8x128xf32>
    %209 = arith.addf %207, %208 : vector<8x128xf32>
    %210 = math.tanh %209 : vector<8x128xf32>
    %211 = arith.mulf %204, %210 : vector<8x128xf32>
    %212 = arith.truncf %192 : vector<8x128xf32> to vector<8x128xbf16>
    %cst_47 = arith.constant dense<0.000000e+00> : vector<8x512xf32>
    %213 = tpu.matmul %212, %16, %cst_47 {dimension_numbers = #tpu.dot_dimension_numbers<[1], [0], [0], [1], [0, 0, 1, 1], [], []>} : vector<8x128xbf16>, vector<128x512xbf16>, vector<8x512xf32> -> vector<8x512xf32>
    %214 = vector.broadcast %18 : vector<1x512xf32> to vector<8x512xf32>
    %215 = arith.addf %213, %214 : vector<8x512xf32>
    %c40 = arith.constant 40 : index
    %c0_48 = arith.constant 0 : index
    %216 = vector.load %arg11[%c40, %c0_48] : memref<64x512xf32, #tpu.memory_space<vmem>>, vector<8x512xf32>
    %217 = arith.truncf %192 : vector<8x128xf32> to vector<8x128xbf16>
    %cst_49 = arith.constant dense<0.000000e+00> : vector<8x512xf32>
    %218 = tpu.matmul %217, %15, %cst_49 {dimension_numbers = #tpu.dot_dimension_numbers<[1], [0], [0], [1], [0, 0, 1, 1], [], []>} : vector<8x128xbf16>, vector<128x512xbf16>, vector<8x512xf32> -> vector<8x512xf32>
    %219 = arith.addf %216, %218 : vector<8x512xf32>
    %220 = vector.extract_strided_slice %219 {offsets = [0, 0], sizes = [8, 384], strides = [1, 1]} : vector<8x512xf32> to vector<8x384xf32>
    %221 = arith.negf %220 : vector<8x384xf32>
    %222 = math.exp %221 : vector<8x384xf32>
    %cst_50 = arith.constant 1.000000e+00 : f32
    %223 = vector.broadcast %cst_50 : f32 to vector<8x384xf32>
    %224 = arith.addf %223, %222 : vector<8x384xf32>
    %225 = arith.divf %223, %224 : vector<8x384xf32>
    %226 = vector.extract_strided_slice %225 {offsets = [0, 0], sizes = [8, 128], strides = [1, 1]} : vector<8x384xf32> to vector<8x128xf32>
    %227 = vector.extract_strided_slice %225 {offsets = [0, 128], sizes = [8, 128], strides = [1, 1]} : vector<8x384xf32> to vector<8x128xf32>
    %228 = vector.extract_strided_slice %225 {offsets = [0, 256], sizes = [8, 128], strides = [1, 1]} : vector<8x384xf32> to vector<8x128xf32>
    %229 = vector.extract_strided_slice %219 {offsets = [0, 384], sizes = [8, 128], strides = [1, 1]} : vector<8x512xf32> to vector<8x128xf32>
    %230 = math.tanh %229 : vector<8x128xf32>
    %231 = arith.mulf %227, %190 : vector<8x128xf32>
    %232 = arith.mulf %226, %230 : vector<8x128xf32>
    %233 = arith.addf %231, %232 : vector<8x128xf32>
    %234 = math.tanh %233 : vector<8x128xf32>
    %235 = arith.mulf %228, %234 : vector<8x128xf32>
    %236 = arith.truncf %211 : vector<8x128xf32> to vector<8x128xbf16>
    %cst_51 = arith.constant dense<0.000000e+00> : vector<8x512xf32>
    %237 = tpu.matmul %236, %17, %cst_51 {dimension_numbers = #tpu.dot_dimension_numbers<[1], [0], [0], [1], [0, 0, 1, 1], [], []>} : vector<8x128xbf16>, vector<128x512xbf16>, vector<8x512xf32> -> vector<8x512xf32>
    %238 = arith.addf %215, %237 : vector<8x512xf32>
    %239 = vector.extract_strided_slice %238 {offsets = [0, 0], sizes = [8, 384], strides = [1, 1]} : vector<8x512xf32> to vector<8x384xf32>
    %240 = arith.negf %239 : vector<8x384xf32>
    %241 = math.exp %240 : vector<8x384xf32>
    %cst_52 = arith.constant 1.000000e+00 : f32
    %242 = vector.broadcast %cst_52 : f32 to vector<8x384xf32>
    %243 = arith.addf %242, %241 : vector<8x384xf32>
    %244 = arith.divf %242, %243 : vector<8x384xf32>
    %245 = vector.extract_strided_slice %244 {offsets = [0, 0], sizes = [8, 128], strides = [1, 1]} : vector<8x384xf32> to vector<8x128xf32>
    %246 = vector.extract_strided_slice %244 {offsets = [0, 128], sizes = [8, 128], strides = [1, 1]} : vector<8x384xf32> to vector<8x128xf32>
    %247 = vector.extract_strided_slice %244 {offsets = [0, 256], sizes = [8, 128], strides = [1, 1]} : vector<8x384xf32> to vector<8x128xf32>
    %248 = vector.extract_strided_slice %238 {offsets = [0, 384], sizes = [8, 128], strides = [1, 1]} : vector<8x512xf32> to vector<8x128xf32>
    %249 = math.tanh %248 : vector<8x128xf32>
    %250 = arith.mulf %246, %209 : vector<8x128xf32>
    %251 = arith.mulf %245, %249 : vector<8x128xf32>
    %252 = arith.addf %250, %251 : vector<8x128xf32>
    %253 = math.tanh %252 : vector<8x128xf32>
    %254 = arith.mulf %247, %253 : vector<8x128xf32>
    %255 = arith.truncf %235 : vector<8x128xf32> to vector<8x128xbf16>
    %cst_53 = arith.constant dense<0.000000e+00> : vector<8x512xf32>
    %256 = tpu.matmul %255, %16, %cst_53 {dimension_numbers = #tpu.dot_dimension_numbers<[1], [0], [0], [1], [0, 0, 1, 1], [], []>} : vector<8x128xbf16>, vector<128x512xbf16>, vector<8x512xf32> -> vector<8x512xf32>
    %257 = vector.broadcast %18 : vector<1x512xf32> to vector<8x512xf32>
    %258 = arith.addf %256, %257 : vector<8x512xf32>
    %c48 = arith.constant 48 : index
    %c0_54 = arith.constant 0 : index
    %259 = vector.load %arg11[%c48, %c0_54] : memref<64x512xf32, #tpu.memory_space<vmem>>, vector<8x512xf32>
    %260 = arith.truncf %235 : vector<8x128xf32> to vector<8x128xbf16>
    %cst_55 = arith.constant dense<0.000000e+00> : vector<8x512xf32>
    %261 = tpu.matmul %260, %15, %cst_55 {dimension_numbers = #tpu.dot_dimension_numbers<[1], [0], [0], [1], [0, 0, 1, 1], [], []>} : vector<8x128xbf16>, vector<128x512xbf16>, vector<8x512xf32> -> vector<8x512xf32>
    %262 = arith.addf %259, %261 : vector<8x512xf32>
    %263 = vector.extract_strided_slice %262 {offsets = [0, 0], sizes = [8, 384], strides = [1, 1]} : vector<8x512xf32> to vector<8x384xf32>
    %264 = arith.negf %263 : vector<8x384xf32>
    %265 = math.exp %264 : vector<8x384xf32>
    %cst_56 = arith.constant 1.000000e+00 : f32
    %266 = vector.broadcast %cst_56 : f32 to vector<8x384xf32>
    %267 = arith.addf %266, %265 : vector<8x384xf32>
    %268 = arith.divf %266, %267 : vector<8x384xf32>
    %269 = vector.extract_strided_slice %268 {offsets = [0, 0], sizes = [8, 128], strides = [1, 1]} : vector<8x384xf32> to vector<8x128xf32>
    %270 = vector.extract_strided_slice %268 {offsets = [0, 128], sizes = [8, 128], strides = [1, 1]} : vector<8x384xf32> to vector<8x128xf32>
    %271 = vector.extract_strided_slice %268 {offsets = [0, 256], sizes = [8, 128], strides = [1, 1]} : vector<8x384xf32> to vector<8x128xf32>
    %272 = vector.extract_strided_slice %262 {offsets = [0, 384], sizes = [8, 128], strides = [1, 1]} : vector<8x512xf32> to vector<8x128xf32>
    %273 = math.tanh %272 : vector<8x128xf32>
    %274 = arith.mulf %270, %233 : vector<8x128xf32>
    %275 = arith.mulf %269, %273 : vector<8x128xf32>
    %276 = arith.addf %274, %275 : vector<8x128xf32>
    %277 = math.tanh %276 : vector<8x128xf32>
    %278 = arith.mulf %271, %277 : vector<8x128xf32>
    %279 = arith.truncf %254 : vector<8x128xf32> to vector<8x128xbf16>
    %cst_57 = arith.constant dense<0.000000e+00> : vector<8x512xf32>
    %280 = tpu.matmul %279, %17, %cst_57 {dimension_numbers = #tpu.dot_dimension_numbers<[1], [0], [0], [1], [0, 0, 1, 1], [], []>} : vector<8x128xbf16>, vector<128x512xbf16>, vector<8x512xf32> -> vector<8x512xf32>
    %281 = arith.addf %258, %280 : vector<8x512xf32>
    %282 = vector.extract_strided_slice %281 {offsets = [0, 0], sizes = [8, 384], strides = [1, 1]} : vector<8x512xf32> to vector<8x384xf32>
    %283 = arith.negf %282 : vector<8x384xf32>
    %284 = math.exp %283 : vector<8x384xf32>
    %cst_58 = arith.constant 1.000000e+00 : f32
    %285 = vector.broadcast %cst_58 : f32 to vector<8x384xf32>
    %286 = arith.addf %285, %284 : vector<8x384xf32>
    %287 = arith.divf %285, %286 : vector<8x384xf32>
    %288 = vector.extract_strided_slice %287 {offsets = [0, 0], sizes = [8, 128], strides = [1, 1]} : vector<8x384xf32> to vector<8x128xf32>
    %289 = vector.extract_strided_slice %287 {offsets = [0, 128], sizes = [8, 128], strides = [1, 1]} : vector<8x384xf32> to vector<8x128xf32>
    %290 = vector.extract_strided_slice %287 {offsets = [0, 256], sizes = [8, 128], strides = [1, 1]} : vector<8x384xf32> to vector<8x128xf32>
    %291 = vector.extract_strided_slice %281 {offsets = [0, 384], sizes = [8, 128], strides = [1, 1]} : vector<8x512xf32> to vector<8x128xf32>
    %292 = math.tanh %291 : vector<8x128xf32>
    %293 = arith.mulf %289, %252 : vector<8x128xf32>
    %294 = arith.mulf %288, %292 : vector<8x128xf32>
    %295 = arith.addf %293, %294 : vector<8x128xf32>
    %296 = math.tanh %295 : vector<8x128xf32>
    %297 = arith.mulf %290, %296 : vector<8x128xf32>
    %298 = arith.truncf %278 : vector<8x128xf32> to vector<8x128xbf16>
    %cst_59 = arith.constant dense<0.000000e+00> : vector<8x512xf32>
    %299 = tpu.matmul %298, %16, %cst_59 {dimension_numbers = #tpu.dot_dimension_numbers<[1], [0], [0], [1], [0, 0, 1, 1], [], []>} : vector<8x128xbf16>, vector<128x512xbf16>, vector<8x512xf32> -> vector<8x512xf32>
    %300 = vector.broadcast %18 : vector<1x512xf32> to vector<8x512xf32>
    %301 = arith.addf %299, %300 : vector<8x512xf32>
    %c56 = arith.constant 56 : index
    %c0_60 = arith.constant 0 : index
    %302 = vector.load %arg11[%c56, %c0_60] : memref<64x512xf32, #tpu.memory_space<vmem>>, vector<8x512xf32>
    %303 = arith.truncf %278 : vector<8x128xf32> to vector<8x128xbf16>
    %cst_61 = arith.constant dense<0.000000e+00> : vector<8x512xf32>
    %304 = tpu.matmul %303, %15, %cst_61 {dimension_numbers = #tpu.dot_dimension_numbers<[1], [0], [0], [1], [0, 0, 1, 1], [], []>} : vector<8x128xbf16>, vector<128x512xbf16>, vector<8x512xf32> -> vector<8x512xf32>
    %305 = arith.addf %302, %304 : vector<8x512xf32>
    %306 = vector.extract_strided_slice %305 {offsets = [0, 0], sizes = [8, 384], strides = [1, 1]} : vector<8x512xf32> to vector<8x384xf32>
    %307 = arith.negf %306 : vector<8x384xf32>
    %308 = math.exp %307 : vector<8x384xf32>
    %cst_62 = arith.constant 1.000000e+00 : f32
    %309 = vector.broadcast %cst_62 : f32 to vector<8x384xf32>
    %310 = arith.addf %309, %308 : vector<8x384xf32>
    %311 = arith.divf %309, %310 : vector<8x384xf32>
    %312 = vector.extract_strided_slice %311 {offsets = [0, 0], sizes = [8, 128], strides = [1, 1]} : vector<8x384xf32> to vector<8x128xf32>
    %313 = vector.extract_strided_slice %311 {offsets = [0, 128], sizes = [8, 128], strides = [1, 1]} : vector<8x384xf32> to vector<8x128xf32>
    %314 = vector.extract_strided_slice %311 {offsets = [0, 256], sizes = [8, 128], strides = [1, 1]} : vector<8x384xf32> to vector<8x128xf32>
    %315 = vector.extract_strided_slice %305 {offsets = [0, 384], sizes = [8, 128], strides = [1, 1]} : vector<8x512xf32> to vector<8x128xf32>
    %316 = math.tanh %315 : vector<8x128xf32>
    %317 = arith.mulf %313, %276 : vector<8x128xf32>
    %318 = arith.mulf %312, %316 : vector<8x128xf32>
    %319 = arith.addf %317, %318 : vector<8x128xf32>
    %320 = math.tanh %319 : vector<8x128xf32>
    %321 = arith.mulf %314, %320 : vector<8x128xf32>
    %322 = arith.truncf %297 : vector<8x128xf32> to vector<8x128xbf16>
    %cst_63 = arith.constant dense<0.000000e+00> : vector<8x512xf32>
    %323 = tpu.matmul %322, %17, %cst_63 {dimension_numbers = #tpu.dot_dimension_numbers<[1], [0], [0], [1], [0, 0, 1, 1], [], []>} : vector<8x128xbf16>, vector<128x512xbf16>, vector<8x512xf32> -> vector<8x512xf32>
    %324 = arith.addf %301, %323 : vector<8x512xf32>
    %325 = vector.extract_strided_slice %324 {offsets = [0, 0], sizes = [8, 384], strides = [1, 1]} : vector<8x512xf32> to vector<8x384xf32>
    %326 = arith.negf %325 : vector<8x384xf32>
    %327 = math.exp %326 : vector<8x384xf32>
    %cst_64 = arith.constant 1.000000e+00 : f32
    %328 = vector.broadcast %cst_64 : f32 to vector<8x384xf32>
    %329 = arith.addf %328, %327 : vector<8x384xf32>
    %330 = arith.divf %328, %329 : vector<8x384xf32>
    %331 = vector.extract_strided_slice %330 {offsets = [0, 0], sizes = [8, 128], strides = [1, 1]} : vector<8x384xf32> to vector<8x128xf32>
    %332 = vector.extract_strided_slice %330 {offsets = [0, 128], sizes = [8, 128], strides = [1, 1]} : vector<8x384xf32> to vector<8x128xf32>
    %333 = vector.extract_strided_slice %330 {offsets = [0, 256], sizes = [8, 128], strides = [1, 1]} : vector<8x384xf32> to vector<8x128xf32>
    %334 = vector.extract_strided_slice %324 {offsets = [0, 384], sizes = [8, 128], strides = [1, 1]} : vector<8x512xf32> to vector<8x128xf32>
    %335 = math.tanh %334 : vector<8x128xf32>
    %336 = arith.mulf %332, %295 : vector<8x128xf32>
    %337 = arith.mulf %331, %335 : vector<8x128xf32>
    %338 = arith.addf %336, %337 : vector<8x128xf32>
    %339 = math.tanh %338 : vector<8x128xf32>
    %340 = arith.mulf %333, %339 : vector<8x128xf32>
    %341 = arith.truncf %321 : vector<8x128xf32> to vector<8x128xbf16>
    %cst_65 = arith.constant dense<0.000000e+00> : vector<8x512xf32>
    %342 = tpu.matmul %341, %16, %cst_65 {dimension_numbers = #tpu.dot_dimension_numbers<[1], [0], [0], [1], [0, 0, 1, 1], [], []>} : vector<8x128xbf16>, vector<128x512xbf16>, vector<8x512xf32> -> vector<8x512xf32>
    %343 = vector.broadcast %18 : vector<1x512xf32> to vector<8x512xf32>
    %344 = arith.addf %342, %343 : vector<8x512xf32>
    %345 = arith.truncf %340 : vector<8x128xf32> to vector<8x128xbf16>
    %cst_66 = arith.constant dense<0.000000e+00> : vector<8x512xf32>
    %346 = tpu.matmul %345, %17, %cst_66 {dimension_numbers = #tpu.dot_dimension_numbers<[1], [0], [0], [1], [0, 0, 1, 1], [], []>} : vector<8x128xbf16>, vector<128x512xbf16>, vector<8x512xf32> -> vector<8x512xf32>
    %347 = arith.addf %344, %346 : vector<8x512xf32>
    %348 = vector.extract_strided_slice %347 {offsets = [0, 0], sizes = [8, 384], strides = [1, 1]} : vector<8x512xf32> to vector<8x384xf32>
    %349 = arith.negf %348 : vector<8x384xf32>
    %350 = math.exp %349 : vector<8x384xf32>
    %cst_67 = arith.constant 1.000000e+00 : f32
    %351 = vector.broadcast %cst_67 : f32 to vector<8x384xf32>
    %352 = arith.addf %351, %350 : vector<8x384xf32>
    %353 = arith.divf %351, %352 : vector<8x384xf32>
    %354 = vector.extract_strided_slice %353 {offsets = [0, 0], sizes = [8, 128], strides = [1, 1]} : vector<8x384xf32> to vector<8x128xf32>
    %355 = vector.extract_strided_slice %353 {offsets = [0, 128], sizes = [8, 128], strides = [1, 1]} : vector<8x384xf32> to vector<8x128xf32>
    %356 = vector.extract_strided_slice %353 {offsets = [0, 256], sizes = [8, 128], strides = [1, 1]} : vector<8x384xf32> to vector<8x128xf32>
    %357 = vector.extract_strided_slice %347 {offsets = [0, 384], sizes = [8, 128], strides = [1, 1]} : vector<8x512xf32> to vector<8x128xf32>
    %358 = math.tanh %357 : vector<8x128xf32>
    %359 = arith.mulf %355, %338 : vector<8x128xf32>
    %360 = arith.mulf %354, %358 : vector<8x128xf32>
    %361 = arith.addf %359, %360 : vector<8x128xf32>
    %362 = math.tanh %361 : vector<8x128xf32>
    %363 = arith.mulf %356, %362 : vector<8x128xf32>
    %c0_68 = arith.constant 0 : index
    %c0_69 = arith.constant 0 : index
    %364 = vector.load %arg8[%c0_68, %c0_69] : memref<128x128xf32, #tpu.memory_space<vmem>>, vector<128x128xf32>
    %cst_70 = arith.constant dense<0.000000e+00> : vector<8x128xf32>
    %365 = tpu.matmul %363, %364, %cst_70 {dimension_numbers = #tpu.dot_dimension_numbers<[1], [0], [0], [1], [0, 0, 1, 1], [], []>} : vector<8x128xf32>, vector<128x128xf32>, vector<8x128xf32> -> vector<8x128xf32>
    %c0_71 = arith.constant 0 : index
    %c0_72 = arith.constant 0 : index
    %366 = vector.load %arg9[%c0_71, %c0_72] : memref<1x128xf32, #tpu.memory_space<vmem>>, vector<1x128xf32>
    %367 = vector.broadcast %366 : vector<1x128xf32> to vector<8x128xf32>
    %368 = arith.addf %365, %367 : vector<8x128xf32>
    %c0_73 = arith.constant 0 : index
    %c0_74 = arith.constant 0 : index
    %369 = vector.load %arg10[%c0_73, %c0_74] : memref<8x128xf32, #tpu.memory_space<vmem>>, vector<8x128xf32>
    tpu.vector_store %arg10[%c0_73, %c0_74], %368 {strides = array<i32>} : memref<8x128xf32, #tpu.memory_space<vmem>>, vector<8x128xf32>,
    return
  }
}

</mosaic_0001>

<bundles_post_ra>
// kernel: lstm_model_forward.1
= control target key start
LH: loop header
LB: loop body
LE: loop exit
PB: predicated region body
PF: predicated region fallthrough
CT: control target
= control target key end

     0   :  { %15 = vsyncpa [#allocation4], 0  ;;  %s6395_s0 = inlined_call_operand.vmem [shape: s32[64,1], index: 0, kind: input, shape index: {}]   ;;  %s6396_s1 = inlined_call_operand.vmem [shape: f32[128,64], index: 1, kind: input, shape index: {}]   ;;  %s6397_s2 = inlined_call_operand.vmem [shape: bf16[64,512], index: 2, kind: input, shape index: {}]   ;;  %s6398_s3 = inlined_call_operand.hbm [shape: bf16[128,512], index: 3, kind: input, shape index: {}]   ;;  %s6399_s4 = inlined_call_operand.vmem [shape: f32[1,512], index: 4, kind: input, shape index: {}]   ;;  %s6400_s5 = inlined_call_operand.hbm [shape: bf16[128,512], index: 5, kind: input, shape index: {}]   ;;  %s6401_s6 = inlined_call_operand.hbm [shape: bf16[128,512], index: 6, kind: input, shape index: {}]   ;;  %s6402_s7 = inlined_call_operand.vmem [shape: f32[1,512], index: 7, kind: input, shape index: {}]   ;;  %s6403_s8 = inlined_call_operand.hbm [shape: f32[128,128], index: 8, kind: input, shape index: {}]   ;;  %s6404_s9 = inlined_call_operand.vmem [shape: f32[1,128], index: 9, kind: input, shape index: {}]   ;;  %s6405_s10 = inlined_call_operand.vmem [shape: f32[8,128], index: 10, kind: output, shape index: {}]  }
   0x1   :  { %16 = vsyncpa [#allocation6], 0 }
   0x2   :  { %17 = vsyncpa [#allocation9], 0  ;;  %s43_s15 = sshll.u32 %s6400_s5, 4  ;;  %s4498_s16 = smov [#allocation5]   ;;  %s44_s15 = int_to_ptr.hbm [resolvable:$true] %s43_s15 }
   0x3   :  { %s45_s17 = sshll.u32 %s4498_s16, 4  ;;  %s28_s20 = sshll.u32 %s6398_s3, 4  ;;  %s46_s17 = int_to_ptr.vmem [resolvable:$true] %s45_s17  ;;  %s29_s20 = int_to_ptr.hbm [resolvable:$true] %s28_s20 }
   0x4   :  { %s4499_s21 = smov 256   ;;  %s4500_s22 = smov 16  }
   0x5   :  { %51 = dma.hbm_to_vmem [thread:$0]  %s44_s15, 4096, %s46_s17, [#allocation6], %s4499_s21, %s4499_s21, %s4500_s22  }
   0x6   :  { %s4501_s23 = smov [#allocation3]   ;;  %s56_s27 = sshll.u32 %s6401_s6, 4  ;;  %s57_s27 = int_to_ptr.hbm [resolvable:$true] %s56_s27 }
   0x7   :  { %s30_s24 = sshll.u32 %s4501_s23, 4  ;;  %s71_s29 = sshll.u32 %s6403_s8, 4  ;;  %s31_s24 = int_to_ptr.vmem [resolvable:$true] %s30_s24  ;;  %s72_s29 = int_to_ptr.hbm [resolvable:$true] %s71_s29 }
   0x8   :  { %36 = dma.hbm_to_vmem [thread:$0]  %s29_s20, 4096, %s31_s24, [#allocation4], %s4499_s21, %s4499_s21, %s4500_s22  }
   0x9   :  { %s4502_s30 = smov [#allocation7]   ;;  %s4503_s3 = smov [#allocation8]  }
   0xa   :  { %s58_s11 = sshll.u32 %s4502_s30, 4  ;;  %s73_s12 = sshll.u32 %s4503_s3, 4  ;;  %s59_s11 = int_to_ptr.vmem [resolvable:$true] %s58_s11  ;;  %s74_s12 = int_to_ptr.vmem [resolvable:$true] %s73_s12 }
   0xb   :  { %64 = dma.hbm_to_vmem [thread:$0]  %s57_s27, 4096, %s59_s11, [#allocation6], %s4499_s21, %s4499_s21, %s4500_s22  }
   0xc   :  { %s4504_s13 = smov 128   ;;  %s4505_s14 = smov 8  }
   0xd   :  { %79 = dma.hbm_to_vmem [thread:$0]  %s72_s29, 2048, %s74_s12, [#allocation9], %s4504_s13, %s4504_s13, %s4505_s14  }
   0xe   :  { %4492 = dma.done.wait [#allocation4], 4096  }
   0xf   :  { %4493 = vsyncadd [#allocation4], 4294963200 }
  0x10   :  { %4494 = dma.done.wait [#allocation6], 8192  }
  0x11   :  { %4495 = vsyncadd [#allocation6], 4294959104 }
  0x12   :  { %4496 = dma.done.wait [#allocation9], 2048  }
  0x13   :  { %4497 = vsyncadd [#allocation9], 4294965248  ;;  %v6406_v0 = vmov 0   ;;  %v101_v1 = vld [vmem:[%s6395_s0 + $0x10] sm:$0xff]  ;;  %v99_v2 = vld [vmem:[%s6395_s0] sm:$0xff]  ;;  %v107_v25 = vlaneseq  ;;  %v4507_v28 = vmov 1.0  }
  0x14   :  { %4137 = vset.pattern.permute.xlu1 %v6406_v0  ;;  %4136 = vset.pattern.permute.xlu0 %v6406_v0  ;;  %v103_v3 = vld [vmem:[%s6395_s0 + $0x20] sm:$0xff]  ;;  %v172_v4 = vld [vmem:[%s6396_s1 + $0x78] sm:$0xff]  ;;  %v171_v5 = vld [vmem:[%s6396_s1 + $0x70] sm:$0xff]  ;;  %vm324_vm8 = vcmask 523264  }
  0x15   :  { %4138 = vset.pattern.permute.xlu2 %v6406_v0  ;;  %116 = vperm.xlu1 %4137, %v101_v1   ;;  %v170_v6 = vld [vmem:[%s6396_s1 + $0x68] sm:$0xff]  ;;  %v102_v7 = vld [vmem:[%s6395_s0 + $0x18] sm:$0xff]  ;;  %v169_v9 = vld [vmem:[%s6396_s1 + $0x60] sm:$0xff]  ;;  %v108_v26 = vand.u32 127, %v107_v25 }
  0x16   :  { %110 = vperm.xlu0 %4136, %v99_v2   ;;  %122 = vperm.xlu2 %4138, %v103_v3   ;;  %v100_v8 = vld [vmem:[%s6395_s0 + $0x8] sm:$0xff]  ;;  %v168_v11 = vld [vmem:[%s6396_s1 + $0x58] sm:$0xff]  ;;  %v167_v12 = vld [vmem:[%s6396_s1 + $0x50] sm:$0xff] }
  0x17   :  { %173 = vmatpush.msra.mxu0 %v172_v4  ;;  %v104_v10 = vld [vmem:[%s6395_s0 + $0x28] sm:$0xff]  ;;  %v106_v14 = vld [vmem:[%s6395_s0 + $0x38] sm:$0xff]  ;;  %v105_v15 = vld [vmem:[%s6395_s0 + $0x30] sm:$0xff] }
  0x18   :  { %v166_v13 = vld [vmem:[%s6396_s1 + $0x48] sm:$0xff]  ;;  %v165_v16 = vld [vmem:[%s6396_s1 + $0x40] sm:$0xff]  ;;  %v164_v17 = vld [vmem:[%s6396_s1 + $0x38] sm:$0xff] }
  0x19   :  { %174 = vmatpush.msra.mxu0 %v171_v5  ;;  %v163_v18 = vld [vmem:[%s6396_s1 + $0x30] sm:$0xff]  ;;  %v162_v19 = vld [vmem:[%s6396_s1 + $0x28] sm:$0xff]  ;;  %v161_v20 = vld [vmem:[%s6396_s1 + $0x20] sm:$0xff] }
  0x1a   :  { %v160_v21 = vld [vmem:[%s6396_s1 + $0x18] sm:$0xff]  ;;  %v159_v22 = vld [vmem:[%s6396_s1 + $0x10] sm:$0xff]  ;;  %v158_v23 = vld [vmem:[%s6396_s1 + $0x8] sm:$0xff] }
  0x1b   :  { %175 = vmatpush.msra.mxu0 %v170_v6  ;;  %v157_v24 = vld [vmem:[%s6396_s1] sm:$0xff]  ;;  %v3704_v32 = vld [vmem:[#allocation3 + $0xe8] sm:$0xf]  ;;  %v4061_v33 = vld [vmem:[#allocation3 + $0xf4] sm:$0xf0] }
  0x1c   :  { %v3688_v34 = vld [vmem:[#allocation3 + $0xc8] sm:$0xf]  ;;  %v4650_v35 = vor.u32 %v4061_v33, %v3704_v32  ;;  %v4057_v36 = vld [vmem:[#allocation3 + $0xd4] sm:$0xf0]  ;;  %v3552_v37 = vld [vmem:[%s6397_s2 + $0x60] sm:$0xf] }
  0x1d   :  { %119 = vperm.xlu1 %4137, %v102_v7   ;;  %176 = vmatpush.msra.mxu0 %v169_v9  ;;  %v4028_v38 = vld [vmem:[%s6397_s2 + $0x6c] sm:$0xf0]  ;;  %v4026_v41 = vld [vmem:[%s6397_s2 + $0x64] sm:$0xf]  ;;  %v3554_v42 = vld [vmem:[%s6397_s2 + $0x70] sm:$0xf0]  ;;  %v4668_v44 = vor.u32 %v4057_v36, %v3688_v34 }
  0x1e   :  { %113 = vperm.xlu0 %4136, %v100_v8   ;;  %125 = vperm.xlu2 %4138, %v104_v10   ;;  %6601 = vst [vmem:[#allocation13_spill] sm:$0xff] %v4650_v35  ;;  %v3553_v40 = vor.u32 %v4028_v38, %v3552_v37  ;;  %v3560_v43 = vld [vmem:[%s6397_s2 + $0x68] sm:$0xf]  ;;  %v3557_v45 = vor.u32 %v4026_v41, %v3554_v42  ;;  %v4029_v46 = vld [vmem:[%s6397_s2 + $0x74] sm:$0xf0] }
  0x1f   :  { %177 = vmatpush.msra.mxu0 %v168_v11  ;;  %6602 = vst [vmem:[#allocation14_spill] sm:$0xff] %v4668_v44  ;;  %v3561_v47 = vor.u32 %v4029_v46, %v3560_v43  ;;  %v3672_v48 = vld [vmem:[#allocation3 + $0xa8] sm:$0xf]  ;;  %v4053_v49 = vld [vmem:[#allocation3 + $0xb4] sm:$0xf0] }
  0x20   :  { %341 = vmatpush.bf16.msra.mxu1 %v3553_v40  ;;  %370 = vmatpush.bf16.msra.mxu2 %v3557_v45  ;;  %v4674_v50 = vor.u32 %v4053_v49, %v3672_v48  ;;  %v3536_v54 = vld [vmem:[%s6397_s2 + $0x40] sm:$0xf]  ;;  %v4024_v55 = vld [vmem:[%s6397_s2 + $0x4c] sm:$0xf0]  ;;  %v4022_v56 = vld [vmem:[%s6397_s2 + $0x44] sm:$0xf] }
  0x21   :  { %178 = vmatpush.msra.mxu0 %v167_v12  ;;  %399 = vmatpush.bf16.msra.mxu3 %v3561_v47  ;;  %v3537_v57 = vor.u32 %v4024_v55, %v3536_v54  ;;  %v3538_v58 = vld [vmem:[%s6397_s2 + $0x50] sm:$0xf0]  ;;  %v3544_v59 = vld [vmem:[%s6397_s2 + $0x48] sm:$0xf]  ;;  %v4025_v60 = vld [vmem:[%s6397_s2 + $0x54] sm:$0xf0] }
  0x22   :  { %6603 = vst [vmem:[#allocation15_spill] sm:$0xff] %v4674_v50  ;;  %v3541_v61 = vor.u32 %v4022_v56, %v3538_v58  ;;  %v3545_v62 = vor.u32 %v4025_v60, %v3544_v59  ;;  %v3656_v63 = vld [vmem:[#allocation3 + $0x88] sm:$0xf]  ;;  %v4049_v1 = vld [vmem:[#allocation3 + $0x94] sm:$0xf0] }
  0x23   :  { %179 = vmatpush.msra.mxu0 %v166_v13  ;;  %v4695_v2 = vor.u32 %v4049_v1, %v3656_v63  ;;  %v3520_v3 = vld [vmem:[%s6397_s2 + $0x20] sm:$0xf]  ;;  %v4020_v4 = vld [vmem:[%s6397_s2 + $0x2c] sm:$0xf0]  ;;  %v4018_v5 = vld [vmem:[%s6397_s2 + $0x24] sm:$0xf] }
  0x24   :  { %342 = vmatpush.bf16.msra.mxu1 %v3537_v57  ;;  %371 = vmatpush.bf16.msra.mxu2 %v3541_v61  ;;  %v3521_v6 = vor.u32 %v4020_v4, %v3520_v3  ;;  %v3522_v7 = vld [vmem:[%s6397_s2 + $0x30] sm:$0xf0]  ;;  %v3528_v8 = vld [vmem:[%s6397_s2 + $0x28] sm:$0xf]  ;;  %v4021_v9 = vld [vmem:[%s6397_s2 + $0x34] sm:$0xf0] }
  0x25   :  { %131 = vperm.xlu1 %4137, %v106_v14   ;;  %180 = vmatpush.msra.mxu0 %v165_v16  ;;  %6604 = vst [vmem:[#allocation16_spill] sm:$0xff] %v4695_v2  ;;  %v3525_v10 = vor.u32 %v4018_v5, %v3522_v7  ;;  %v3529_v11 = vor.u32 %v4021_v9, %v3528_v8  ;;  %v3640_v12 = vld [vmem:[#allocation3 + $0x68] sm:$0xf]  ;;  %v4045_v13 = vld [vmem:[#allocation3 + $0x74] sm:$0xf0] }
  0x26   :  { %128 = vperm.xlu0 %4136, %v105_v15   ;;  %400 = vmatpush.bf16.msra.mxu3 %v3545_v62  ;;  %v4716_v14 = vor.u32 %v4045_v13, %v3640_v12  ;;  %v3504_v15 = vld [vmem:[%s6397_s2] sm:$0xf]  ;;  %v4016_v16 = vld [vmem:[%s6397_s2 + $0xc] sm:$0xf0]  ;;  %v4041_v25 = vld [vmem:[#allocation3 + $0x54] sm:$0xf0] }
  0x27   :  { %181 = vmatpush.msra.mxu0 %v164_v17  ;;  %v4014_v17 = vld [vmem:[%s6397_s2 + $0x4] sm:$0xf]  ;;  %v3698_v34 = vld [vmem:[#allocation3 + $0xf0] sm:$0xf0]  ;;  %v3592_v37 = vld [vmem:[#allocation3 + $0x8] sm:$0xf] }
  0x28   :  { %6605 = vst [vmem:[#allocation17_spill] sm:$0xff] %v4716_v14  ;;  %343 = vmatpush.bf16.msra.mxu1 %v3521_v6  ;;  %372 = vmatpush.bf16.msra.mxu2 %v3525_v10  ;;  %v4058_v32 = vld [vmem:[#allocation3 + $0xe4] sm:$0xf]  ;;  %v4033_v38 = vld [vmem:[#allocation3 + $0x14] sm:$0xf0] }
  0x29   :  { %182 = vmatpush.msra.mxu0 %v163_v18  ;;  %v3505_v18 = vor.u32 %v4016_v16, %v3504_v15  ;;  %v4744_v36 = vor.u32 %v4058_v32, %v3698_v34  ;;  %v3680_v40 = vld [vmem:[#allocation3 + $0xc0] sm:$0xf]  ;;  %v4056_v41 = vld [vmem:[#allocation3 + $0xcc] sm:$0xf0]  ;;  %v4054_v42 = vld [vmem:[#allocation3 + $0xc4] sm:$0xf] }
  0x2a   :  { %401 = vmatpush.bf16.msra.mxu3 %v3529_v11  ;;  %v4751_v43 = vor.u32 %v4056_v41, %v3680_v40  ;;  %v3682_v45 = vld [vmem:[#allocation3 + $0xd0] sm:$0xf0]  ;;  %v3664_v47 = vld [vmem:[#allocation3 + $0xa0] sm:$0xf]  ;;  %v4052_v48 = vld [vmem:[#allocation3 + $0xac] sm:$0xf0] }
  0x2b   :  { %183 = vmatpush.msra.mxu0 %v162_v19  ;;  %v3506_v19 = vld [vmem:[%s6397_s2 + $0x10] sm:$0xf0]  ;;  %6609 = vst [vmem:[#allocation21_spill] sm:$0xff] %v4744_v36  ;;  %v4754_v46 = vor.u32 %v4054_v42, %v3682_v45  ;;  %v4050_v49 = vld [vmem:[#allocation3 + $0xa4] sm:$0xf] }
  0x2c   :  { %344 = vmatpush.bf16.msra.mxu1 %v3505_v18  ;;  %6611 = vst [vmem:[#allocation23_spill] sm:$0xff] %v4751_v43  ;;  %v3648_v55 = vld [vmem:[#allocation3 + $0x80] sm:$0xf]  ;;  %v4048_v56 = vld [vmem:[#allocation3 + $0x8c] sm:$0xf0] }
  0x2d   :  { %184 = vmatpush.msra.mxu0 %v161_v20  ;;  %v3512_v20 = vld [vmem:[%s6397_s2 + $0x8] sm:$0xf]  ;;  %6612 = vst [vmem:[#allocation24_spill] sm:$0xff] %v4754_v46  ;;  %v4046_v57 = vld [vmem:[#allocation3 + $0x84] sm:$0xf]  ;;  %v4765_v58 = vor.u32 %v4048_v56, %v3648_v55 }
  0x2e   :  { %v3650_v59 = vld [vmem:[#allocation3 + $0x90] sm:$0xf0]  ;;  %v4027_v60 = vld [vmem:[%s6397_s2 + $0x6c] sm:$0xf]  ;;  %v3562_v61 = vld [vmem:[%s6397_s2 + $0x78] sm:$0xf0] }
  0x2f   :  { %185 = vmatpush.msra.mxu0 %v160_v21  ;;  %v4017_v21 = vld [vmem:[%s6397_s2 + $0x14] sm:$0xf0]  ;;  %6615 = vst [vmem:[#allocation27_spill] sm:$0xff] %v4765_v58  ;;  %v4773_v62 = vor.u32 %v4046_v57, %v3650_v59  ;;  %v3565_v63 = vor.u32 %v4027_v60, %v3562_v61  ;;  %v3632_v4 = vld [vmem:[#allocation3 + $0x60] sm:$0xf] }
  0x30   :  { %v4044_v5 = vld [vmem:[#allocation3 + $0x6c] sm:$0xf0]  ;;  %v4042_v6 = vld [vmem:[#allocation3 + $0x64] sm:$0xf]  ;;  %v3634_v8 = vld [vmem:[#allocation3 + $0x70] sm:$0xf0] }
  0x31   :  { %186 = vmatpush.msra.mxu0 %v159_v22  ;;  %v3509_v22 = vor.u32 %v4014_v17, %v3506_v19  ;;  %6616 = vst [vmem:[#allocation28_spill] sm:$0xff] %v4773_v62  ;;  %428 = vmatpush.bf16.msrb.mxu1 %v3565_v63  ;;  %v4785_v7 = vor.u32 %v4044_v5, %v3632_v4  ;;  %v3616_v11 = vld [vmem:[#allocation3 + $0x40] sm:$0xf]  ;;  %v4040_v12 = vld [vmem:[#allocation3 + $0x4c] sm:$0xf0] }
  0x32   :  { %v4787_v9 = vor.u32 %v4042_v6, %v3634_v8  ;;  %v4038_v13 = vld [vmem:[#allocation3 + $0x44] sm:$0xf]  ;;  %v4791_v15 = vor.u32 %v4040_v12, %v3616_v11  ;;  %v3618_v16 = vld [vmem:[#allocation3 + $0x50] sm:$0xf0]  ;;  %v4023_v17 = vld [vmem:[%s6397_s2 + $0x4c] sm:$0xf] }
  0x33   :  { %187 = vmatpush.msra.mxu0 %v158_v23  ;;  %v3513_v23 = vor.u32 %v4017_v21, %v3512_v20  ;;  %373 = vmatpush.bf16.msra.mxu2 %v3509_v22  ;;  %6617 = vst [vmem:[#allocation29_spill] sm:$0xff] %v4785_v7  ;;  %v3546_v18 = vld [vmem:[%s6397_s2 + $0x58] sm:$0xf0]  ;;  %v4799_v19 = vor.u32 %v4038_v13, %v3618_v16  ;;  %v3600_v21 = vld [vmem:[#allocation3 + $0x20] sm:$0xf] }
  0x34   :  { %6618 = vst [vmem:[#allocation30_spill] sm:$0xff] %v4787_v9  ;;  %v3549_v20 = vor.u32 %v4023_v17, %v3546_v18  ;;  %v4036_v22 = vld [vmem:[#allocation3 + $0x2c] sm:$0xf0]  ;;  %v3706_v32 = vld [vmem:[#allocation3 + $0xf8] sm:$0xf0] }
  0x35   :  { %188 = vmatpush.msra.mxu0 %v157_v24  ;;  %v3624_v24 = vld [vmem:[#allocation3 + $0x48] sm:$0xf]  ;;  %402 = vmatpush.bf16.msra.mxu3 %v3513_v23  ;;  %6619 = vst [vmem:[#allocation31_spill] sm:$0xff] %v4791_v15  ;;  %v4802_v23 = vor.u32 %v4036_v22, %v3600_v21  ;;  %v4055_v40 = vld [vmem:[#allocation3 + $0xcc] sm:$0xf] }
  0x36   :  { %6620 = vst [vmem:[#allocation32_spill] sm:$0xff] %v4799_v19  ;;  %429 = vmatpush.bf16.msrb.mxu1 %v3549_v20  ;;  %v3690_v42 = vld [vmem:[#allocation3 + $0xd8] sm:$0xf0]  ;;  %v4030_v45 = vld [vmem:[#allocation3 + $0x4] sm:$0xf] }
  0x37   :  { %772 = vmatpush.bf16.msrb.mxu0 %v4650_v35  ;;  %6621 = vst [vmem:[#allocation33_spill] sm:$0xff] %v4802_v23  ;;  %v3674_v57 = vld [vmem:[#allocation3 + $0xb8] sm:$0xf0]  ;;  %v4015_v59 = vld [vmem:[%s6397_s2 + $0xc] sm:$0xf] }
  0x38   :  { %v3514_v60 = vld [vmem:[%s6397_s2 + $0x18] sm:$0xf0]  ;;  %v4047_v4 = vld [vmem:[#allocation3 + $0x8c] sm:$0xf] }
  0x39   :  { %759 = vmatpush.bf16.msrb.mxu3 %v4744_v36  ;;  %v3658_v5 = vld [vmem:[#allocation3 + $0x98] sm:$0xf0]  ;;  %v4043_v11 = vld [vmem:[#allocation3 + $0x6c] sm:$0xf] }
  0x3a   :  { %v4844_v6 = vor.u32 %v4047_v4, %v3658_v5  ;;  %v3642_v12 = vld [vmem:[#allocation3 + $0x78] sm:$0xf0]  ;;  %v4039_v16 = vld [vmem:[#allocation3 + $0x4c] sm:$0xf] }
  0x3b   :  { %773 = vmatpush.bf16.msrb.mxu0 %v4668_v44  ;;  %v4849_v13 = vor.u32 %v4043_v11, %v3642_v12  ;;  %v3626_v17 = vld [vmem:[#allocation3 + $0x58] sm:$0xf0]  ;;  %v4035_v20 = vld [vmem:[#allocation3 + $0x2c] sm:$0xf]  ;;  %v3827_v12 = vld [vmem:[#allocation5 + $0xe0] sm:$0xf] }
  0x3c   :  { %6628 = vst [vmem:[#allocation40_spill] sm:$0xff] %v4844_v6  ;;  %v4853_v18 = vor.u32 %v4039_v16, %v3626_v17  ;;  %v3610_v21 = vld [vmem:[#allocation3 + $0x38] sm:$0xf0]  ;;  %v4092_v16 = vld [vmem:[#allocation5 + $0xec] sm:$0xf0] }
  0x3d   :  { %760 = vmatpush.bf16.msrb.mxu3 %v4754_v46  ;;  %6629 = vst [vmem:[#allocation41_spill] sm:$0xff] %v4849_v13  ;;  %v4912_v17 = vor.u32 %v4092_v16, %v3827_v12  ;;  %v3813_v12 = vld [vmem:[#allocation5 + $0xd0] sm:$0xf0]  ;;  %v3819_v16 = vld [vmem:[#allocation5 + $0xc8] sm:$0xf] }
  0x3e   :  { %6630 = vst [vmem:[#allocation42_spill] sm:$0xff] %v4853_v18 }
  0x3f   :  { %774 = vmatpush.bf16.msrb.mxu0 %v4674_v50  ;;  %6643 = vst [vmem:[#allocation55_spill] sm:$0xff] %v4912_v17 }
  0x43   :  { %775 = vmatpush.bf16.msrb.mxu0 %v4695_v2 }
  0x47   :  { %776 = vmatpush.bf16.msrb.mxu0 %v4716_v14 }
  0x70   :  { %v123_v39 = vpop.permute.xlu2 %122 }
  0x71   :  { %vm137_vm4 = vcmp.eq.s32.totalorder %v108_v26, %v123_v39  ;;  %v4748_v39 = vor.u32 %v4033_v38, %v3592_v37  ;;  %v4034_v37 = vld [vmem:[#allocation3 + $0x24] sm:$0xf]  ;;  %v3602_v38 = vld [vmem:[#allocation3 + $0x30] sm:$0xf0] }
  0x72   :  { %v4819_v41 = vor.u32 %v4034_v37, %v3602_v38 }
  0x73   :  { %6610 = vst [vmem:[#allocation22_spill] sm:$0xff] %v4748_v39 }
  0x74   :  { %6624 = vst [vmem:[#allocation36_spill] sm:$0xff] %v4819_v41 }
  0x78   :  { %v126_v51 = vpop.permute.xlu2 %125 }
  0x79   :  { %vm138_vm5 = vcmp.eq.s32.totalorder %v108_v26, %v126_v51  ;;  %v4759_v51 = vor.u32 %v4052_v48, %v3664_v47  ;;  %v3586_v47 = vld [vmem:[#allocation3 + $0x10] sm:$0xf0]  ;;  %v4822_v48 = vor.u32 %v4055_v40, %v3690_v42 }
  0x7a   :  { %v4831_v55 = vor.u32 %v4030_v45, %v3586_v47 }
  0x7b   :  { %6613 = vst [vmem:[#allocation25_spill] sm:$0xff] %v4759_v51 }
  0x7c   :  { %6625 = vst [vmem:[#allocation37_spill] sm:$0xff] %v4822_v48 }
  0x7d   :  { %6626 = vst [vmem:[#allocation38_spill] sm:$0xff] %v4831_v55 }
  0x87   :  { %v117_v30 = vpop.permute.xlu1 %116 }
  0x88   :  { %v111_v27 = vpop.permute.xlu0 %110  ;;  %vm135_vm2 = vcmp.eq.s32.totalorder %v108_v26, %v117_v30  ;;  %v3696_v30 = vld [vmem:[#allocation3 + $0xe0] sm:$0xf] }
  0x89   :  { %vm133_vm0 = vcmp.eq.s32.totalorder %v108_v26, %v111_v27  ;;  %v3608_v27 = vld [vmem:[#allocation3 + $0x28] sm:$0xf] }
  0x8a   :  { %3494 = vmatmul.msk.f32.vlgmr.msra.gmra.mxu0 %vm133_vm0, %v4507_v28 }
  0x8f   :  { %v120_v31 = vpop.permute.xlu1 %119 }
  0x90   :  { %v114_v29 = vpop.permute.xlu0 %113  ;;  %vm136_vm3 = vcmp.eq.s32.totalorder %v108_v26, %v120_v31  ;;  %v4060_v31 = vld [vmem:[#allocation3 + $0xec] sm:$0xf0] }
  0x91   :  { %vm134_vm1 = vcmp.eq.s32.totalorder %v108_v26, %v114_v29  ;;  %v4742_v33 = vor.u32 %v4060_v31, %v3696_v30  ;;  %v4059_v31 = vld [vmem:[#allocation3 + $0xec] sm:$0xf] }
  0x92   :  { %3495 = vmatmul.msk.f32.gmra.mxu0 %vm134_vm1, %v4507_v28  ;;  %v4814_v34 = vor.u32 %v4059_v31, %v3706_v32 }
  0x93   :  { %6608 = vst [vmem:[#allocation20_spill] sm:$0xff] %v4742_v33  ;;  %746 = vmatpush.bf16.msrb.mxu2 %v4742_v33 }
  0x94   :  { %6623 = vst [vmem:[#allocation35_spill] sm:$0xff] %v4814_v34 }
  0x97   :  { %v132_v53 = vpop.permute.xlu1 %131  ;;  %747 = vmatpush.bf16.msrb.mxu2 %v4751_v43 }
  0x98   :  { %v129_v52 = vpop.permute.xlu0 %128  ;;  %vm140_vm7 = vcmp.eq.s32.totalorder %v108_v26, %v132_v53 }
  0x99   :  { %vm139_vm6 = vcmp.eq.s32.totalorder %v108_v26, %v129_v52  ;;  %v4737_v26 = vor.u32 %v4041_v25, %v3624_v24  ;;  %v3666_v52 = vld [vmem:[#allocation3 + $0xb0] sm:$0xf0] }
  0x9a   :  { %3496 = vmatmul.msk.f32.gmra.mxu0 %vm135_vm2, %v4507_v28  ;;  %v4761_v53 = vor.u32 %v4050_v49, %v3666_v52  ;;  %v4019_v49 = vld [vmem:[%s6397_s2 + $0x2c] sm:$0xf]  ;;  %v3530_v52 = vld [vmem:[%s6397_s2 + $0x38] sm:$0xf0] }
  0x9b   :  { %6606 = vst [vmem:[#allocation18_spill] sm:$0xff] %v4737_v26  ;;  %777 = vmatpush.bf16.msrb.mxu0 %v4737_v26  ;;  %748 = vmatpush.bf16.msrb.mxu2 %v4759_v51  ;;  %v3533_v56 = vor.u32 %v4019_v49, %v3530_v52 }
  0x9c   :  { %6614 = vst [vmem:[#allocation26_spill] sm:$0xff] %v4761_v53  ;;  %761 = vmatpush.bf16.msrb.mxu3 %v4761_v53 }
  0x9d   :  { %430 = vmatpush.bf16.msrb.mxu1 %v3533_v56 }
  0x9f   :  { %749 = vmatpush.bf16.msrb.mxu2 %v4765_v58 }
  0xa0   :  { %762 = vmatpush.bf16.msrb.mxu3 %v4773_v62 }
  0xa2   :  { %3497 = vmatmul.msk.f32.gmra.mxu0 %vm136_vm3, %v4507_v28 }
  0xa3   :  { %750 = vmatpush.bf16.msrb.mxu2 %v4785_v7 }
  0xa4   :  { %763 = vmatpush.bf16.msrb.mxu3 %v4787_v9 }
  0xa7   :  { %751 = vmatpush.bf16.msrb.mxu2 %v4791_v15 }
  0xa8   :  { %764 = vmatpush.bf16.msrb.mxu3 %v4799_v19 }
  0xaa   :  { %3498 = vmatmul.msk.f32.gmra.mxu0 %vm137_vm4, %v4507_v28 }
  0xab   :  { %752 = vmatpush.bf16.msrb.mxu2 %v4802_v23 }
  0xac   :  { %765 = vmatpush.bf16.msrb.mxu3 %v4819_v41 }
  0xb0   :  { %766 = vmatpush.bf16.msrb.mxu3 %v4831_v55 }
  0xb2   :  { %3499 = vmatmul.msk.f32.gmra.mxu0 %vm138_vm5, %v4507_v28 }
  0xba   :  { %3500 = vmatmul.msk.f32.gmra.mxu0 %vm139_vm6, %v4507_v28 }
  0xc2   :  { %3501 = vmatmul.msk.f32.gmra.mxu0 %vm140_vm7, %v4507_v28  ;;  %v4037_v28 = vld [vmem:[#allocation3 + $0x34] sm:$0xf0] }
  0xc3   :  { %v4740_v29 = vor.u32 %v4037_v28, %v3608_v27  ;;  %v3584_v27 = vld [vmem:[#allocation3] sm:$0xf]  ;;  %v4032_v28 = vld [vmem:[#allocation3 + $0xc] sm:$0xf0] }
  0xc4   :  { %v4808_v30 = vor.u32 %v4032_v28, %v3584_v27  ;;  %v4031_v27 = vld [vmem:[#allocation3 + $0xc] sm:$0xf]  ;;  %v3594_v28 = vld [vmem:[#allocation3 + $0x18] sm:$0xf0] }
  0xc5   :  { %6607 = vst [vmem:[#allocation19_spill] sm:$0xff] %v4740_v29  ;;  %778 = vmatpush.bf16.msrb.mxu0 %v4740_v29  ;;  %v4859_v31 = vor.u32 %v4031_v27, %v3594_v28  ;;  %v4093_v28 = vld [vmem:[#allocation5 + $0xf4] sm:$0xf0] }
  0xc6   :  { %6622 = vst [vmem:[#allocation34_spill] sm:$0xff] %v4808_v30  ;;  %753 = vmatpush.bf16.msrb.mxu2 %v4808_v30 }
  0xc7   :  { %6632 = vst [vmem:[#allocation44_spill] sm:$0xff] %v4859_v31 }
  0xc9   :  { %779 = vmatpush.bf16.msrb.mxu0 %v4748_v39 }
  0xcc   :  { %780 = vmatmul.bf16.vlgmr.msrb.gmra.mxu0 %v6406_v0 }
 0x107   :  { %v190_v54 = vpop.f32.mrf.mxu0 }
 0x10f   :  { %v193_v1 = vpop.f32.mrf.mxu0 }
 0x110   :  { %v4777_v3 = vpack.c.bf16 %v193_v1, %v190_v54  ;;  %v4051_v54 = vld [vmem:[#allocation3 + $0xac] sm:$0xf]  ;;  %v3517_v1 = vor.u32 %v4015_v59, %v3514_v60 }
 0x111   :  { %v4840_v63 = vor.u32 %v4051_v54, %v3674_v57 }
 0x112   :  { %3566 = vmatmul.msk.bf16.vlgmr.msra.gmra.mxu1 %vm324_vm8, %v4777_v3  ;;  %3570 = vmatmul.msk.bf16.vlgmr.msra.gmra.mxu2 %vm324_vm8, %v4777_v3 }
 0x113   :  { %3574 = vmatmul.msk.bf16.vlgmr.msra.gmra.mxu3 %vm324_vm8, %v4777_v3  ;;  %785 = vmatpush.bf16.msra.mxu2 %v4814_v34  ;;  %6627 = vst [vmem:[#allocation39_spill] sm:$0xff] %v4840_v63 }
 0x114   :  { %431 = vmatpush.bf16.msrb.mxu1 %v3517_v1  ;;  %1035 = vmatpush.bf16.msra.mxu3 %v4912_v17 }
 0x117   :  { %v196_v10 = vpop.f32.mrf.mxu0  ;;  %786 = vmatpush.bf16.msra.mxu2 %v4822_v48 }
 0x11b   :  { %787 = vmatpush.bf16.msra.mxu2 %v4840_v63 }
 0x11f   :  { %v199_v24 = vpop.f32.mrf.mxu0  ;;  %788 = vmatpush.bf16.msra.mxu2 %v4844_v6 }
 0x120   :  { %v4806_v25 = vpack.c.bf16 %v199_v24, %v196_v10  ;;  %v4856_v24 = vor.u32 %v4035_v20, %v3610_v21  ;;  %v4090_v20 = vld [vmem:[#allocation5 + $0xe4] sm:$0xf]  ;;  %v3829_v21 = vld [vmem:[#allocation5 + $0xf0] sm:$0xf0] }
 0x121   :  { %v4914_v27 = vor.u32 %v4090_v20, %v3829_v21  ;;  %v4089_v20 = vld [vmem:[#allocation5 + $0xd4] sm:$0xf0] }
 0x122   :  { %3567 = vmatmul.msk.bf16.gmra.mxu1 %vm324_vm8, %v4806_v25  ;;  %3571 = vmatmul.msk.bf16.gmra.mxu2 %vm324_vm8, %v4806_v25  ;;  %6631 = vst [vmem:[#allocation43_spill] sm:$0xff] %v4856_v24 }
 0x123   :  { %3575 = vmatmul.msk.bf16.gmra.mxu3 %vm324_vm8, %v4806_v25  ;;  %789 = vmatpush.bf16.msra.mxu2 %v4849_v13  ;;  %6644 = vst [vmem:[#allocation56_spill] sm:$0xff] %v4914_v27 }
 0x124   :  { %1048 = vmatpush.bf16.msra.mxu0 %v4914_v27 }
 0x127   :  { %v202_v61 = vpop.f32.mrf.mxu0  ;;  %790 = vmatpush.bf16.msra.mxu2 %v4853_v18 }
 0x12b   :  { %791 = vmatpush.bf16.msra.mxu2 %v4856_v24 }
 0x12f   :  { %v205_v8 = vpop.f32.mrf.mxu0  ;;  %792 = vmatpush.bf16.msra.mxu2 %v4859_v31 }
 0x130   :  { %v216_v10 = vpack.c.bf16 %v205_v8, %v202_v61 }
 0x132   :  { %3568 = vmatmul.msk.bf16.gmra.mxu1 %vm324_vm8, %v216_v10  ;;  %3572 = vmatmul.msk.bf16.gmra.mxu2 %vm324_vm8, %v216_v10 }
 0x133   :  { %3576 = vmatmul.msk.bf16.gmra.mxu3 %vm324_vm8, %v216_v10 }
 0x137   :  { %v208_v22 = vpop.f32.mrf.mxu0 }
 0x13f   :  { %v211_v32 = vpop.f32.mrf.mxu0 }
 0x140   :  { %v217_v37 = vpack.c.bf16 %v211_v32, %v208_v22  ;;  %v3835_v22 = vld [vmem:[#allocation5 + $0xe8] sm:$0xf]  ;;  %v4091_v32 = vld [vmem:[#allocation5 + $0xec] sm:$0xf] }
 0x142   :  { %3569 = vmatmul.msk.bf16.gmra.mxu1 %vm324_vm8, %v217_v37  ;;  %3573 = vmatmul.msk.bf16.gmra.mxu2 %vm324_vm8, %v217_v37 }
 0x143   :  { %3577 = vmatmul.msk.bf16.gmra.mxu3 %vm324_vm8, %v217_v37 }
 0x149   :  { %v781_v38 = vpop.f32.mrf.mxu0 }
 0x151   :  { %v783_v40 = vpop.f32.mrf.mxu0 }
 0x152   :  { %3578 = vmatmul.msk.bf16.vlgmr.msrb.gmra.mxu1 %vm324_vm8, %v4777_v3  ;;  %754 = vmatmul.bf16.vlgmr.msrb.gmra.mxu2 %v6406_v0  ;;  %v4879_v3 = vld [vmem:[%s6399_s4] sm:$0xf] }
 0x153   :  { %767 = vmatmul.bf16.vlgmr.msrb.gmra.mxu3 %v6406_v0  ;;  %v4882_v45 = vperm.slane %v4879_v3, 2  ;;  %v4894_v57 = vperm.slane %v4879_v3, 0  ;;  %v4902_v1 = vperm.slane %v4879_v3, 1 }
 0x155   :  { %6633 = vst [vmem:[#allocation45_spill] sm:$0xff] %v4882_v45 }
 0x156   :  { %6636 = vst [vmem:[#allocation48_spill] sm:$0xff] %v4894_v57 }
 0x157   :  { %6639 = vst [vmem:[#allocation51_spill] sm:$0xff] %v4902_v1 }
 0x162   :  { %3579 = vmatmul.msk.bf16.gmra.mxu1 %vm324_vm8, %v4806_v25  ;;  %793 = vmatmul.bf16.vlgmr.msra.gmra.mxu2 %v6406_v0 }
 0x172   :  { %3580 = vmatmul.msk.bf16.gmra.mxu1 %vm324_vm8, %v216_v10 }
 0x182   :  { %3581 = vmatmul.msk.bf16.gmra.mxu1 %vm324_vm8, %v217_v37  ;;  %v3837_v37 = vld [vmem:[#allocation5 + $0xf8] sm:$0xf0] }
 0x183   :  { %v4919_v40 = vor.u32 %v4091_v32, %v3837_v37  ;;  %v4087_v32 = vld [vmem:[#allocation5 + $0xcc] sm:$0xf]  ;;  %v3821_v37 = vld [vmem:[#allocation5 + $0xd8] sm:$0xf0] }
 0x185   :  { %6646 = vst [vmem:[#allocation58_spill] sm:$0xff] %v4919_v40  ;;  %1074 = vmatpush.bf16.msrb.mxu2 %v4919_v40 }
 0x18f   :  { %v4874_v42 = vpop.f32.mrf.mxu1 }
 0x195   :  { %v4884_v47 = vpop.f32.mrf.mxu2 }
 0x196   :  { %v404_v25 = vpop.f32.mrf.mxu3 }
 0x197   :  { %v405_v49 = vadd.f32 %v404_v25, %v4882_v45  ;;  %v4887_v52 = vpop.f32.mrf.mxu1  ;;  %v3811_v25 = vld [vmem:[#allocation5 + $0xc0] sm:$0xf] }
 0x198   :  { %6634 = vst [vmem:[#allocation46_spill] sm:$0xff] %v4887_v52  ;;  %v4078_v52 = vld [vmem:[#allocation5 + $0x84] sm:$0xf] }
 0x199   :  { %v4889_v54 = vadd.f32 %v781_v38, %v405_v49  ;;  %v4917_v38 = vor.u32 %v4093_v28, %v3835_v22  ;;  %v4088_v49 = vld [vmem:[#allocation5 + $0xcc] sm:$0xf0]  ;;  %v4932_v28 = vor.u32 %v4089_v20, %v3819_v16  ;;  %v3803_v16 = vld [vmem:[#allocation5 + $0xa8] sm:$0xf]  ;;  %v4085_v20 = vld [vmem:[#allocation5 + $0xb4] sm:$0xf0] }
 0x19b   :  { %6645 = vst [vmem:[#allocation57_spill] sm:$0xff] %v4917_v38  ;;  %1061 = vmatpush.bf16.msra.mxu1 %v4917_v38 }
 0x19c   :  { %6651 = vst [vmem:[#allocation63_spill] sm:$0xff] %v4932_v28 }
 0x19d   :  { %v4891_v56 = vpop.f32.mrf.mxu2 }
 0x19e   :  { %6635 = vst [vmem:[#allocation47_spill] sm:$0xff] %v4891_v56  ;;  %v4896_v59 = vpop.f32.mrf.mxu3  ;;  %v4079_v56 = vld [vmem:[#allocation5 + $0x8c] sm:$0xf] }
 0x19f   :  { %6637 = vst [vmem:[#allocation49_spill] sm:$0xff] %v4896_v59  ;;  %v351_v60 = vpop.f32.mrf.mxu1  ;;  %1062 = vmatpush.bf16.msra.mxu1 %v4932_v28 }
 0x1a0   :  { %v4899_v61 = vadd.f32 %v351_v60, %v4894_v57  ;;  %v4086_v60 = vld [vmem:[#allocation5 + $0xc4] sm:$0xf] }
 0x1a1   :  { %v4930_v22 = vor.u32 %v4086_v60, %v3813_v12  ;;  %v3797_v12 = vld [vmem:[#allocation5 + $0xb0] sm:$0xf0] }
 0x1a2   :  { %6638 = vst [vmem:[#allocation50_spill] sm:$0xff] %v4899_v61  ;;  %v4082_v61 = vld [vmem:[#allocation5 + $0xa4] sm:$0xf] }
 0x1a3   :  { %6650 = vst [vmem:[#allocation62_spill] sm:$0xff] %v4930_v22  ;;  %1049 = vmatpush.bf16.msra.mxu0 %v4930_v22 }
 0x1a5   :  { %v380_v4 = vpop.f32.mrf.mxu2 }
 0x1a6   :  { %v409_v5 = vpop.f32.mrf.mxu3  ;;  %v4905_v8 = vadd.f32 %v380_v4, %v4902_v1 }
 0x1a7   :  { %v4908_v10 = vadd.f32 %v409_v5, %v4882_v45  ;;  %v4910_v11 = vpop.f32.mrf.mxu1  ;;  %v4926_v5 = vor.u32 %v4088_v49, %v3811_v25  ;;  %v3795_v25 = vld [vmem:[#allocation5 + $0xa0] sm:$0xf]  ;;  %v4084_v49 = vld [vmem:[#allocation5 + $0xac] sm:$0xf0] }
 0x1a8   :  { %6640 = vst [vmem:[#allocation52_spill] sm:$0xff] %v4905_v8  ;;  %v4943_v60 = vor.u32 %v4084_v49, %v3795_v25  ;;  %v4080_v8 = vld [vmem:[#allocation5 + $0x8c] sm:$0xf0]  ;;  %v3781_v49 = vld [vmem:[#allocation5 + $0x90] sm:$0xf0] }
 0x1a9   :  { %6641 = vst [vmem:[#allocation53_spill] sm:$0xff] %v4908_v10  ;;  %1036 = vmatpush.bf16.msra.mxu3 %v4926_v5  ;;  %v3779_v10 = vld [vmem:[#allocation5 + $0x80] sm:$0xf] }
 0x1aa   :  { %6642 = vst [vmem:[#allocation54_spill] sm:$0xff] %v4910_v11  ;;  %v4935_v11 = vor.u32 %v4087_v32, %v3821_v37  ;;  %v4947_v32 = vor.u32 %v4085_v20, %v3803_v16  ;;  %v3805_v37 = vld [vmem:[#allocation5 + $0xb8] sm:$0xf0]  ;;  %v4081_v16 = vld [vmem:[#allocation5 + $0x94] sm:$0xf0] }
 0x1ab   :  { %6648 = vst [vmem:[#allocation60_spill] sm:$0xff] %v4926_v5 }
 0x1ac   :  { %6652 = vst [vmem:[#allocation64_spill] sm:$0xff] %v4935_v11  ;;  %1075 = vmatpush.bf16.msrb.mxu2 %v4935_v11  ;;  %1063 = vmatpush.bf16.msra.mxu1 %v4947_v32 }
 0x1ad   :  { %v4922_v4 = vpop.f32.mrf.mxu2  ;;  %6654 = vst [vmem:[#allocation66_spill] sm:$0xff] %v4943_v60  ;;  %1037 = vmatpush.bf16.msra.mxu3 %v4943_v60 }
 0x1ae   :  { %6647 = vst [vmem:[#allocation59_spill] sm:$0xff] %v4922_v4  ;;  %v4928_v21 = vpop.f32.mrf.mxu3 }
 0x1af   :  { %6649 = vst [vmem:[#allocation61_spill] sm:$0xff] %v4928_v21  ;;  %v356_v0 = vpop.f32.mrf.mxu1  ;;  %v4945_v21 = vor.u32 %v4082_v61, %v3797_v12  ;;  %v4955_v61 = vor.u32 %v4080_v8, %v3779_v10  ;;  %v3787_v12 = vld [vmem:[#allocation5 + $0x88] sm:$0xf]  ;;  %v3763_v10 = vld [vmem:[#allocation5 + $0x60] sm:$0xf] }
 0x1b0   :  { %v4938_v4 = vadd.f32 %v356_v0, %v4894_v57  ;;  %6656 = vst [vmem:[#allocation68_spill] sm:$0xff] %v4947_v32  ;;  %v4083_v0 = vld [vmem:[#allocation5 + $0xac] sm:$0xf]  ;;  %v4962_v59 = vor.u32 %v4081_v16, %v3787_v12  ;;  %v3771_v12 = vld [vmem:[#allocation5 + $0x68] sm:$0xf] }
 0x1b1   :  { %6655 = vst [vmem:[#allocation67_spill] sm:$0xff] %v4945_v21  ;;  %1050 = vmatpush.bf16.msra.mxu0 %v4945_v21  ;;  %v3789_v21 = vld [vmem:[#allocation5 + $0x98] sm:$0xf0]  ;;  %1038 = vmatpush.bf16.msra.mxu3 %v4955_v61  ;;  %v4077_v16 = vld [vmem:[#allocation5 + $0x74] sm:$0xf0] }
 0x1b2   :  { %6653 = vst [vmem:[#allocation65_spill] sm:$0xff] %v4938_v4  ;;  %v4950_v4 = vor.u32 %v4083_v0, %v3805_v37  ;;  %v4960_v37 = vor.u32 %v4078_v52, %v3781_v49  ;;  %v4970_v8 = vor.u32 %v4079_v56, %v3789_v21  ;;  %1064 = vmatpush.bf16.msra.mxu1 %v4962_v59  ;;  %v3765_v49 = vld [vmem:[#allocation5 + $0x70] sm:$0xf0]  ;;  %v4075_v56 = vld [vmem:[#allocation5 + $0x6c] sm:$0xf] }
 0x1b3   :  { %6658 = vst [vmem:[#allocation70_spill] sm:$0xff] %v4955_v61  ;;  %v3773_v21 = vld [vmem:[#allocation5 + $0x78] sm:$0xf0] }
 0x1b4   :  { %6657 = vst [vmem:[#allocation69_spill] sm:$0xff] %v4950_v4  ;;  %1076 = vmatpush.bf16.msrb.mxu2 %v4950_v4 }
 0x1b5   :  { %v385_v25 = vpop.f32.mrf.mxu2  ;;  %6660 = vst [vmem:[#allocation72_spill] sm:$0xff] %v4960_v37  ;;  %1051 = vmatpush.bf16.msra.mxu0 %v4960_v37  ;;  %v4072_v37 = vld [vmem:[#allocation5 + $0x4c] sm:$0xf0] }
 0x1b6   :  { %v4958_v20 = vadd.f32 %v385_v25, %v4902_v1  ;;  %v414_v0 = vpop.f32.mrf.mxu3  ;;  %6661 = vst [vmem:[#allocation73_spill] sm:$0xff] %v4962_v59  ;;  %v4076_v25 = vld [vmem:[#allocation5 + $0x6c] sm:$0xf0]  ;;  %v3747_v59 = vld [vmem:[#allocation5 + $0x40] sm:$0xf] }
 0x1b7   :  { %v4965_v60 = vadd.f32 %v414_v0, %v4882_v45  ;;  %v4967_v32 = vpop.f32.mrf.mxu1  ;;  %6664 = vst [vmem:[#allocation76_spill] sm:$0xff] %v4970_v8  ;;  %v4975_v52 = vor.u32 %v4076_v25, %v3763_v10  ;;  %v3749_v25 = vld [vmem:[#allocation5 + $0x50] sm:$0xf0] }
 0x1b8   :  { %6659 = vst [vmem:[#allocation71_spill] sm:$0xff] %v4958_v20  ;;  %v4074_v20 = vld [vmem:[#allocation5 + $0x64] sm:$0xf]  ;;  %1077 = vmatpush.bf16.msrb.mxu2 %v4970_v8 }
 0x1b9   :  { %6662 = vst [vmem:[#allocation74_spill] sm:$0xff] %v4965_v60  ;;  %v4977_v0 = vor.u32 %v4074_v20, %v3765_v49  ;;  %1039 = vmatpush.bf16.msra.mxu3 %v4975_v52  ;;  %v4982_v60 = vor.u32 %v4075_v56, %v3773_v21  ;;  %v4070_v8 = vld [vmem:[#allocation5 + $0x44] sm:$0xf]  ;;  %v4989_v20 = vor.u32 %v4072_v37, %v3747_v59  ;;  %v3755_v49 = vld [vmem:[#allocation5 + $0x48] sm:$0xf] }
 0x1ba   :  { %6663 = vst [vmem:[#allocation75_spill] sm:$0xff] %v4967_v32  ;;  %v4979_v32 = vor.u32 %v4077_v16, %v3771_v12  ;;  %v4073_v12 = vld [vmem:[#allocation5 + $0x54] sm:$0xf0]  ;;  %v4993_v56 = vor.u32 %v4070_v8, %v3749_v25  ;;  %v3731_v59 = vld [vmem:[#allocation5 + $0x20] sm:$0xf] }
 0x1bb   :  { %6665 = vst [vmem:[#allocation77_spill] sm:$0xff] %v4975_v52  ;;  %1052 = vmatpush.bf16.msra.mxu0 %v4977_v0  ;;  %v4995_v21 = vor.u32 %v4073_v12, %v3755_v49  ;;  %v3757_v52 = vld [vmem:[#allocation5 + $0x58] sm:$0xf0]  ;;  %v4068_v37 = vld [vmem:[#allocation5 + $0x2c] sm:$0xf0] }
 0x1bc   :  { %6666 = vst [vmem:[#allocation78_spill] sm:$0xff] %v4977_v0  ;;  %1065 = vmatpush.bf16.msra.mxu1 %v4979_v32  ;;  %1078 = vmatpush.bf16.msrb.mxu2 %v4982_v60  ;;  %v4071_v0 = vld [vmem:[#allocation5 + $0x4c] sm:$0xf]  ;;  %v5006_v8 = vor.u32 %v4068_v37, %v3731_v59  ;;  %v3733_v25 = vld [vmem:[#allocation5 + $0x30] sm:$0xf0] }
 0x1bd   :  { %6667 = vst [vmem:[#allocation79_spill] sm:$0xff] %v4979_v32  ;;  %v4985_v10 = vpop.f32.mrf.mxu2  ;;  %1040 = vmatpush.bf16.msra.mxu3 %v4989_v20  ;;  %v4066_v32 = vld [vmem:[#allocation5 + $0x24] sm:$0xf]  ;;  %v3739_v49 = vld [vmem:[#allocation5 + $0x28] sm:$0xf] }
 0x1be   :  { %6668 = vst [vmem:[#allocation80_spill] sm:$0xff] %v4982_v60  ;;  %v4991_v16 = vpop.f32.mrf.mxu3  ;;  %v4069_v12 = vld [vmem:[#allocation5 + $0x34] sm:$0xf0]  ;;  %v3717_v37 = vld [vmem:[#allocation5 + $0x10] sm:$0xf0] }
 0x1bf   :  { %6669 = vst [vmem:[#allocation81_spill] sm:$0xff] %v4985_v10  ;;  %v361_v61 = vpop.f32.mrf.mxu1  ;;  %v4998_v10 = vor.u32 %v4071_v0, %v3757_v52  ;;  %1053 = vmatpush.bf16.msra.mxu0 %v4993_v56  ;;  %v5010_v52 = vor.u32 %v4069_v12, %v3739_v49  ;;  %v3741_v0 = vld [vmem:[#allocation5 + $0x38] sm:$0xf0]  ;;  %v4065_v49 = vld [vmem:[#allocation5 + $0x14] sm:$0xf0] }
 0x1c0   :  { %6670 = vst [vmem:[#allocation82_spill] sm:$0xff] %v4989_v20  ;;  %v5001_v60 = vadd.f32 %v361_v61, %v4894_v57  ;;  %1066 = vmatpush.bf16.msra.mxu1 %v4995_v21  ;;  %v4067_v61 = vld [vmem:[#allocation5 + $0x2c] sm:$0xf]  ;;  %v3725_v20 = vld [vmem:[#allocation5 + $0x18] sm:$0xf0] }
 0x1c1   :  { %6671 = vst [vmem:[#allocation83_spill] sm:$0xff] %v4991_v16  ;;  %1079 = vmatpush.bf16.msrb.mxu2 %v4998_v10  ;;  %v5008_v16 = vor.u32 %v4066_v32, %v3733_v25  ;;  %1041 = vmatpush.bf16.msra.mxu3 %v5006_v8  ;;  %v3723_v25 = vld [vmem:[#allocation5 + $0x8] sm:$0xf] }
 0x1c2   :  { %6672 = vst [vmem:[#allocation84_spill] sm:$0xff] %v4993_v56  ;;  %v4064_v56 = vld [vmem:[#allocation5 + $0xc] sm:$0xf0] }
 0x1c3   :  { %6673 = vst [vmem:[#allocation85_spill] sm:$0xff] %v4995_v21  ;;  %1054 = vmatpush.bf16.msra.mxu0 %v5008_v16  ;;  %v3715_v21 = vld [vmem:[#allocation5] sm:$0xf] }
 0x1c4   :  { %6674 = vst [vmem:[#allocation86_spill] sm:$0xff] %v4998_v10  ;;  %v4062_v10 = vld [vmem:[#allocation5 + $0x4] sm:$0xf]  ;;  %1067 = vmatpush.bf16.msra.mxu1 %v5010_v52  ;;  %v5018_v32 = vor.u32 %v4064_v56, %v3715_v21 }
 0x1c5   :  { %6675 = vst [vmem:[#allocation87_spill] sm:$0xff] %v5001_v60  ;;  %v5013_v60 = vor.u32 %v4067_v61, %v3741_v0  ;;  %v390_v59 = vpop.f32.mrf.mxu2  ;;  %v5023_v0 = vor.u32 %v4062_v10, %v3717_v37  ;;  %v376_v37 = vadd.f32 %v4884_v47, %v4902_v1 }
 0x1c6   :  { %6676 = vst [vmem:[#allocation88_spill] sm:$0xff] %v5006_v8  ;;  %v5021_v12 = vadd.f32 %v390_v59, %v4902_v1  ;;  %v419_v61 = vpop.f32.mrf.mxu3  ;;  %v4063_v8 = vld [vmem:[#allocation5 + $0xc] sm:$0xf]  ;;  %1042 = vmatpush.bf16.msra.mxu3 %v5018_v32  ;;  %v347_v59 = vadd.f32 %v4874_v42, %v4894_v57 }
 0x1c7   :  { %6677 = vst [vmem:[#allocation89_spill] sm:$0xff] %v5008_v16  ;;  %1080 = vmatpush.bf16.msrb.mxu2 %v5013_v60  ;;  %v5025_v16 = vor.u32 %v4065_v49, %v3723_v25  ;;  %v5028_v4 = vadd.f32 %v419_v61, %v4882_v45  ;;  %v5033_v56 = vor.u32 %v4063_v8, %v3725_v20  ;;  %v3712_v8 = vmul.f32 -1.442695, %v4889_v54 }
 0x1c8   :  { %6678 = vst [vmem:[#allocation90_spill] sm:$0xff] %v5010_v52  ;;  %v5030_v52 = vpop.f32.mrf.mxu1  ;;  %1055 = vmatpush.bf16.msra.mxu0 %v5023_v0 }
 0x1c9   :  { %6679 = vst [vmem:[#allocation91_spill] sm:$0xff] %v5013_v60  ;;  %1068 = vmatpush.bf16.msra.mxu1 %v5025_v16  ;;  %4140 = vpow2.f32 %v3712_v8 }
 0x1ca   :  { %6680 = vst [vmem:[#allocation92_spill] sm:$0xff] %v5018_v32  ;;  %1091 = vmatpush.bf16.msrb.mxu3 %v4742_v33 }
 0x1cb   :  { %6681 = vst [vmem:[#allocation93_spill] sm:$0xff] %v5021_v12  ;;  %1081 = vmatpush.bf16.msrb.mxu2 %v5033_v56 }
 0x1cc   :  { %6682 = vst [vmem:[#allocation94_spill] sm:$0xff] %v5023_v0  ;;  %1104 = vmatpush.bf16.msrb.mxu0 %v4744_v36 }
 0x1cd   :  { %6683 = vst [vmem:[#allocation95_spill] sm:$0xff] %v5025_v16  ;;  %1117 = vmatpush.bf16.msrb.mxu1 %v4650_v35  ;;  %v5043_v10 = vpop.f32.mrf.mxu2 }
 0x1ce   :  { %6684 = vst [vmem:[#allocation96_spill] sm:$0xff] %v5028_v4  ;;  %1092 = vmatpush.bf16.msrb.mxu3 %v4751_v43  ;;  %v5045_v20 = vpop.f32.mrf.mxu3 }
 0x1cf   :  { %6685 = vst [vmem:[#allocation97_spill] sm:$0xff] %v5030_v52  ;;  %1130 = vmatpush.bf16.msra.mxu2 %v4814_v34  ;;  %v4141_v47 = vpop.eup %4140 }
 0x1d0   :  { %6686 = vst [vmem:[#allocation98_spill] sm:$0xff] %v5033_v56  ;;  %1105 = vmatpush.bf16.msrb.mxu0 %v4754_v46  ;;  %v433_v21 = vpop.f32.mrf.mxu1 }
 0x1d1   :  { %6687 = vst [vmem:[#allocation99_spill] sm:$0xff] %v5043_v10  ;;  %1118 = vmatpush.bf16.msrb.mxu1 %v4668_v44 }
 0x1d2   :  { %6688 = vst [vmem:[#allocation100_spill] sm:$0xff] %v5045_v20  ;;  %1093 = vmatpush.bf16.msrb.mxu3 %v4759_v51 }
 0x1d3   :  { %1131 = vmatpush.bf16.msra.mxu2 %v4822_v48 }
 0x1d4   :  { %1106 = vmatpush.bf16.msrb.mxu0 %v4761_v53 }
 0x1d5   :  { %1119 = vmatpush.bf16.msrb.mxu1 %v4674_v50  ;;  %v755_v25 = vpop.f32.mrf.mxu2 }
 0x1d6   :  { %1094 = vmatpush.bf16.msrb.mxu3 %v4765_v58  ;;  %v798_v49 = vadd.f32 %v755_v25, %v347_v59  ;;  %v768_v61 = vpop.f32.mrf.mxu3  ;;  %v5070_v59 = vadd.f32 1.0, %v4141_v47 }
 0x1d7   :  { %1132 = vmatpush.bf16.msra.mxu2 %v4840_v63  ;;  %v799_v54 = vadd.f32 %v768_v61, %v376_v37  ;;  %v5073_v37 = vperm.slane %v4879_v3, 3 }
 0x1d8   :  { %1107 = vmatpush.bf16.msrb.mxu0 %v4773_v62  ;;  %v5062_v52 = vpop.f32.mrf.mxu1  ;;  %v3710_v20 = vmul.f32 -1.442695, %v798_v49  ;;  %vm849_vm2 = vweird.f32 %v5070_v59 }
 0x1d9   :  { %1120 = vmatpush.bf16.msrb.mxu1 %v4695_v2  ;;  %6689 = vst [vmem:[#allocation101_spill] sm:$0xff] %v5062_v52  ;;  %v3711_v42 = vmul.f32 -1.442695, %v799_v54 }
 0x1da   :  { %1095 = vmatpush.bf16.msrb.mxu3 %v4785_v7  ;;  %4142 = vpow2.f32 %v3710_v20  ;;  %6690 = vst [vmem:[#allocation102_spill] sm:$0xff] %v5073_v37 }
 0x1db   :  { %1133 = vmatpush.bf16.msra.mxu2 %v4844_v6  ;;  %4144 = vpow2.f32 %v3711_v42 }
 0x1dc   :  { %1108 = vmatpush.bf16.msrb.mxu0 %v4787_v9  ;;  %4146 = vrcp.f32 %v5070_v59 }
 0x1dd   :  { %1121 = vmatpush.bf16.msrb.mxu1 %v4716_v14  ;;  %v757_v8 = vpop.f32.mrf.mxu2 }
 0x1de   :  { %1096 = vmatpush.bf16.msrb.mxu3 %v4791_v15  ;;  %v770_v25 = vpop.f32.mrf.mxu3  ;;  %v434_v8 = vadd.f32 %v433_v21, %v5073_v37 }
 0x1df   :  { %1134 = vmatpush.bf16.msra.mxu2 %v4849_v13 }
 0x1e0   :  { %1109 = vmatpush.bf16.msrb.mxu0 %v4799_v19  ;;  %v438_v20 = vpop.f32.mrf.mxu1  ;;  %v4143_v49 = vpop.eup %4142 }
 0x1e1   :  { %1122 = vmatpush.bf16.msrb.mxu1 %v4737_v26  ;;  %v5079_v61 = vadd.f32 %v438_v20, %v5073_v37  ;;  %v4145_v54 = vpop.eup %4144  ;;  %v811_v42 = vadd.f32 1.0, %v4143_v49 }
 0x1e2   :  { %1097 = vmatpush.bf16.msrb.mxu3 %v4802_v23  ;;  %v812_v3 = vadd.f32 1.0, %v4145_v54  ;;  %v4147_v20 = vpop.eup %4146 }
 0x1e3   :  { %1135 = vmatpush.bf16.msra.mxu2 %v4853_v18  ;;  %6691 = vst [vmem:[#allocation103_spill] sm:$0xff] %v5079_v61  ;;  %4148 = vrcp.f32 %v811_v42  ;;  %v845_v61 = vmul.f32 %v4147_v20, %v5070_v59  ;;  %v825_v45 = vand.u32 2147483648, %v811_v42  ;;  %v823_v21 = vand.u32 2147483647, %v811_v42 }
 0x1e4   :  { %1110 = vmatpush.bf16.msrb.mxu0 %v4819_v41  ;;  %4150 = vrcp.f32 %v812_v3  ;;  %vm819_vm11 = vweird.f32 %v811_v42  ;;  %vm834_vm12 = vweird.f32 %v812_v3  ;;  %vm850_vm1 = vweird.f32 %v4147_v20 }
 0x1e5   :  { %1123 = vmatpush.bf16.msrb.mxu1 %v4740_v29  ;;  %v794_v47 = vpop.f32.mrf.mxu2  ;;  %vm824_vm14 = vcmp.eq.f32.partialorder %v823_v21, 8.507059e+37  ;;  %vm851_vm3 = vmor %vm849_vm2, %vm850_vm1  ;;  %v4122_v21 = vld [vmem:[#allocation7 + $0xe4] sm:$0xf] }
 0x1e6   :  { %1098 = vmatpush.bf16.msrb.mxu3 %v4808_v30  ;;  %v801_v54 = vadd.f32 %v794_v47, %v434_v8 }
 0x1e7   :  { %1136 = vmatpush.bf16.msra.mxu2 %v4856_v24  ;;  %v846_v24 = vsub.f32 1.0, %v845_v61 }
 0x1e8   :  { %1111 = vmatpush.bf16.msrb.mxu0 %v4831_v55  ;;  %v5090_v25 = vpop.f32.mrf.mxu1  ;;  %4152 = vtanh.f32 %v801_v54 }
 0x1e9   :  { %1124 = vmatpush.bf16.msrb.mxu1 %v4748_v39  ;;  %6692 = vst [vmem:[#allocation104_spill] sm:$0xff] %v5090_v25  ;;  %v4149_v49 = vpop.eup %4148  ;;  %v840_v39 = vand.u32 2147483648, %v812_v3  ;;  %v847_v41 = vmul.f32 %v4147_v20, %v846_v24 }
 0x1ea   :  { %v4151_v10 = vpop.eup %4150  ;;  %v815_v4 = vmul.f32 %v4149_v49, %v811_v42  ;;  %vm820_vm9 = vweird.f32 %v4149_v49 }
 0x1eb   :  { %1137 = vmatpush.bf16.msra.mxu2 %v4859_v31  ;;  %v830_v12 = vmul.f32 %v4151_v10, %v812_v3  ;;  %vm835_vm10 = vweird.f32 %v4151_v10  ;;  %v838_v31 = vand.u32 2147483647, %v812_v3  ;;  %vm821_vm13 = vmor %vm819_vm11, %vm820_vm9  ;;  %v841_v54 = vor.u32 1.1754944e-38, %v840_v39 }
 0x1ec   :  { %v816_v52 = vsub.f32 1.0, %v815_v4  ;;  %v826_v4 = vor.u32 1.1754944e-38, %v825_v45  ;;  %vm836_vm15 = vmor %vm834_vm12, %vm835_vm10  ;;  %v848_v3 = vadd.f32 %v4147_v20, %v847_v41  ;;  %v855_v45 = vand.u32 2147483648, %v5070_v59  ;;  %v3960_v41 = vld [vmem:[#allocation7 + $0xf0] sm:$0xf0] }
 0x1ed   :  { %v831_v57 = vsub.f32 1.0, %v830_v12  ;;  %v796_v1 = vpop.f32.mrf.mxu2  ;;  %vm839_vm0 = vcmp.eq.f32.partialorder %v838_v31, 8.507059e+37  ;;  %v853_v39 = vand.u32 2147483647, %v5070_v59 }
 0x1ee   :  { %v817_v55 = vmul.f32 %v4149_v49, %v816_v52  ;;  %v4153_v52 = vpop.eup %4152  ;;  %v852_v31 = vsel %vm851_vm3, %v4147_v20, %v848_v3  ;;  %v856_v24 = vor.u32 1.1754944e-38, %v855_v45 }
 0x1ef   :  { %v832_v25 = vmul.f32 %v4151_v10, %v831_v57  ;;  %vm854_vm4 = vcmp.eq.f32.partialorder %v853_v39, 8.507059e+37  ;;  %v4118_v39 = vld [vmem:[#allocation7 + $0xc4] sm:$0xf] }
 0x1f0   :  { %v443_v30 = vpop.f32.mrf.mxu1  ;;  %v818_v47 = vadd.f32 %v4149_v49, %v817_v55 }
 0x1f1   :  { %v5095_v8 = vadd.f32 %v443_v30, %v5073_v37  ;;  %v833_v12 = vadd.f32 %v4151_v10, %v832_v25  ;;  %v857_v25 = vsel %vm854_vm4, %v856_v24, %v852_v31  ;;  %v3944_v31 = vld [vmem:[#allocation7 + $0xd0] sm:$0xf0]  ;;  %v3950_v24 = vld [vmem:[#allocation7 + $0xc8] sm:$0xf] }
 0x1f2   :  { %v822_v1 = vsel %vm821_vm13, %v4149_v49, %v818_v47  ;;  %v3966_v47 = vld [vmem:[#allocation7 + $0xe8] sm:$0xf] }
 0x1f3   :  { %6693 = vst [vmem:[#allocation105_spill] sm:$0xff] %v5095_v8  ;;  %v827_v29 = vsel %vm824_vm14, %v826_v4, %v822_v1  ;;  %v837_v57 = vsel %vm836_vm15, %v4151_v10, %v833_v12  ;;  %v4123_v1 = vld [vmem:[#allocation7 + $0xec] sm:$0xf]  ;;  %v3936_v8 = vld [vmem:[#allocation7 + $0xb8] sm:$0xf0] }
 0x1f4   :  { %v842_v23 = vsel %vm839_vm0, %v841_v54, %v837_v57  ;;  %v861_v61 = vmul.f32 %v4153_v52, %v827_v29  ;;  %v3958_v29 = vld [vmem:[#allocation7 + $0xe0] sm:$0xf]  ;;  %v4125_v54 = vld [vmem:[#allocation7 + $0xf4] sm:$0xf0]  ;;  %v3968_v52 = vld [vmem:[#allocation7 + $0xf8] sm:$0xf0]  ;;  %v5112_v57 = vor.u32 %v4122_v21, %v3960_v41 }
 0x1f5   :  { %v860_v55 = vmul.f32 0.0, %v842_v23  ;;  %v4124_v23 = vld [vmem:[#allocation7 + $0xec] sm:$0xf0]  ;;  %v5114_v3 = vor.u32 %v4125_v54, %v3966_v47  ;;  %v5116_v45 = vor.u32 %v4123_v1, %v3968_v52  ;;  %v3926_v21 = vld [vmem:[#allocation7 + $0xa0] sm:$0xf] }
 0x1f6   :  { %v5110_v20 = vor.u32 %v4124_v23, %v3958_v29  ;;  %v5126_v23 = vor.u32 %v4118_v39, %v3944_v31  ;;  %v4116_v41 = vld [vmem:[#allocation7 + $0xac] sm:$0xf0]  ;;  %v4114_v54 = vld [vmem:[#allocation7 + $0xa4] sm:$0xf]  ;;  %v3928_v1 = vld [vmem:[#allocation7 + $0xb0] sm:$0xf0] }
 0x1f7   :  { %v5097_v42 = vadd.f32 %v861_v61, %v860_v55  ;;  %v3942_v61 = vld [vmem:[#allocation7 + $0xc0] sm:$0xf]  ;;  %v4120_v55 = vld [vmem:[#allocation7 + $0xcc] sm:$0xf0]  ;;  %6696 = vst [vmem:[#allocation108_spill] sm:$0xff] %v5114_v3 }
 0x1f8   :  { %v5099_v30 = vpop.f32.mrf.mxu1  ;;  %6697 = vst [vmem:[#allocation109_spill] sm:$0xff] %v5116_v45  ;;  %v5124_v29 = vor.u32 %v4120_v55, %v3942_v61  ;;  %v3934_v52 = vld [vmem:[#allocation7 + $0xa8] sm:$0xf]  ;;  %v5136_v61 = vor.u32 %v4116_v41, %v3926_v21  ;;  %v5138_v55 = vor.u32 %v4114_v54, %v3928_v1  ;;  %v3910_v39 = vld [vmem:[#allocation7 + $0x80] sm:$0xf] }
 0x1f9   :  { %6694 = vst [vmem:[#allocation106_spill] sm:$0xff] %v5099_v30  ;;  %4154 = vtanh.f32 %v5097_v42  ;;  %v4115_v30 = vld [vmem:[#allocation7 + $0xac] sm:$0xf]  ;;  %v4112_v31 = vld [vmem:[#allocation7 + $0x8c] sm:$0xf0] }
 0x1fa   :  { %6698 = vst [vmem:[#allocation110_spill] sm:$0xff] %v5124_v29  ;;  %v5148_v21 = vor.u32 %v4112_v31, %v3910_v39  ;;  %v3894_v54 = vld [vmem:[#allocation7 + $0x60] sm:$0xf]  ;;  %v4108_v1 = vld [vmem:[#allocation7 + $0x6c] sm:$0xf0] }
 0x1fb   :  { %6699 = vst [vmem:[#allocation111_spill] sm:$0xff] %v5126_v23  ;;  %v5160_v39 = vor.u32 %v4108_v1, %v3894_v54  ;;  %v4105_v54 = vld [vmem:[#allocation7 + $0x54] sm:$0xf0]  ;;  %v4103_v1 = vld [vmem:[#allocation7 + $0x4c] sm:$0xf] }
 0x1fc   :  { %6702 = vst [vmem:[#allocation114_spill] sm:$0xff] %v5136_v61 }
 0x1fd   :  { %6703 = vst [vmem:[#allocation115_spill] sm:$0xff] %v5138_v55 }
 0x1fe   :  { %6705 = vst [vmem:[#allocation117_spill] sm:$0xff] %v5148_v21 }
 0x1ff   :  { %v4155_v10 = vpop.eup %4154  ;;  %6709 = vst [vmem:[#allocation121_spill] sm:$0xff] %v5160_v39 }
 0x200   :  { %v448_v49 = vpop.f32.mrf.mxu1  ;;  %v864_v4 = vmul.f32 %v4155_v10, %v857_v25  ;;  %v4121_v10 = vld [vmem:[#allocation7 + $0xd4] sm:$0xf0]  ;;  %v4119_v25 = vld [vmem:[#allocation7 + $0xcc] sm:$0xf] }
 0x201   :  { %v5106_v12 = vadd.f32 %v448_v49, %v5073_v37  ;;  %v3952_v49 = vld [vmem:[#allocation7 + $0xd8] sm:$0xf0]  ;;  %v5130_v47 = vor.u32 %v4121_v10, %v3950_v24  ;;  %v5144_v10 = vor.u32 %v4115_v30, %v3936_v8 }
 0x202   :  { %v5108_v59 = vpack.c.bf16 %v864_v4, %v864_v4  ;;  %v5132_v4 = vor.u32 %v4119_v25, %v3952_v49  ;;  %v4110_v25 = vld [vmem:[#allocation7 + $0x84] sm:$0xf]  ;;  %v3912_v49 = vld [vmem:[#allocation7 + $0x90] sm:$0xf0] }
 0x203   :  { %6695 = vst [vmem:[#allocation107_spill] sm:$0xff] %v5106_v12  ;;  %v4117_v12 = vld [vmem:[#allocation7 + $0xb4] sm:$0xf0]  ;;  %v5150_v41 = vor.u32 %v4110_v25, %v3912_v49  ;;  %v3878_v25 = vld [vmem:[#allocation7 + $0x40] sm:$0xf] }
 0x204   :  { %1043 = vmatmul.bf16.vlgmr.msra.gmra.mxu3 %v5108_v59  ;;  %1056 = vmatmul.bf16.vlgmr.msra.gmra.mxu0 %v5108_v59  ;;  %6700 = vst [vmem:[#allocation112_spill] sm:$0xff] %v5130_v47  ;;  %v5142_v24 = vor.u32 %v4117_v12, %v3934_v52  ;;  %v4106_v12 = vld [vmem:[#allocation7 + $0x64] sm:$0xf]  ;;  %v3896_v52 = vld [vmem:[#allocation7 + $0x70] sm:$0xf0] }
 0x205   :  { %1069 = vmatmul.bf16.vlgmr.msra.gmra.mxu1 %v5108_v59  ;;  %1082 = vmatmul.bf16.vlgmr.msrb.gmra.mxu2 %v5108_v59  ;;  %6701 = vst [vmem:[#allocation113_spill] sm:$0xff] %v5132_v4  ;;  %v5162_v31 = vor.u32 %v4106_v12, %v3896_v52  ;;  %v4104_v49 = vld [vmem:[#allocation7 + $0x4c] sm:$0xf0]  ;;  %v3888_v12 = vld [vmem:[#allocation7 + $0x58] sm:$0xf0] }
 0x206   :  { %1370 = vmatpush.bf16.msra.mxu3 %v5110_v20  ;;  %1383 = vmatpush.bf16.msra.mxu0 %v5112_v57  ;;  %6704 = vst [vmem:[#allocation116_spill] sm:$0xff] %v5144_v10 }
 0x207   :  { %1396 = vmatpush.bf16.msra.mxu1 %v5114_v3  ;;  %1409 = vmatpush.bf16.msrb.mxu2 %v5116_v45  ;;  %v3918_v45 = vld [vmem:[#allocation7 + $0x88] sm:$0xf]  ;;  %v4111_v3 = vld [vmem:[#allocation7 + $0x8c] sm:$0xf]  ;;  %6706 = vst [vmem:[#allocation118_spill] sm:$0xff] %v5150_v41 }
 0x208   :  { %6710 = vst [vmem:[#allocation122_spill] sm:$0xff] %v5162_v31 }
 0x20a   :  { %1371 = vmatpush.bf16.msra.mxu3 %v5124_v29  ;;  %1384 = vmatpush.bf16.msra.mxu0 %v5126_v23  ;;  %v4113_v29 = vld [vmem:[#allocation7 + $0x94] sm:$0xf0]  ;;  %v3920_v23 = vld [vmem:[#allocation7 + $0x98] sm:$0xf0] }
 0x20b   :  { %1397 = vmatpush.bf16.msra.mxu1 %v5130_v47  ;;  %1410 = vmatpush.bf16.msrb.mxu2 %v5132_v4  ;;  %v5154_v8 = vor.u32 %v4113_v29, %v3918_v45  ;;  %v5156_v30 = vor.u32 %v4111_v3, %v3920_v23  ;;  %v3902_v4 = vld [vmem:[#allocation7 + $0x68] sm:$0xf]  ;;  %v4107_v47 = vld [vmem:[#allocation7 + $0x6c] sm:$0xf]  ;;  %v4102_v29 = vld [vmem:[#allocation7 + $0x44] sm:$0xf] }
 0x20c   :  { %v3880_v23 = vld [vmem:[#allocation7 + $0x50] sm:$0xf0] }
 0x20d   :  { %6707 = vst [vmem:[#allocation119_spill] sm:$0xff] %v5154_v8 }
 0x20e   :  { %1372 = vmatpush.bf16.msra.mxu3 %v5136_v61  ;;  %1385 = vmatpush.bf16.msra.mxu0 %v5138_v55  ;;  %6708 = vst [vmem:[#allocation120_spill] sm:$0xff] %v5156_v30  ;;  %v4109_v61 = vld [vmem:[#allocation7 + $0x74] sm:$0xf0]  ;;  %v3904_v55 = vld [vmem:[#allocation7 + $0x78] sm:$0xf0] }
 0x20f   :  { %1398 = vmatpush.bf16.msra.mxu1 %v5142_v24  ;;  %1411 = vmatpush.bf16.msrb.mxu2 %v5144_v10  ;;  %v5166_v3 = vor.u32 %v4109_v61, %v3902_v4  ;;  %v5168_v45 = vor.u32 %v4107_v47, %v3904_v55  ;;  %v3886_v10 = vld [vmem:[#allocation7 + $0x48] sm:$0xf]  ;;  %v5176_v47 = vor.u32 %v4104_v49, %v3878_v25  ;;  %v3862_v61 = vld [vmem:[#allocation7 + $0x20] sm:$0xf]  ;;  %v4100_v55 = vld [vmem:[#allocation7 + $0x2c] sm:$0xf0] }
 0x210   :  { %v5178_v4 = vor.u32 %v4102_v29, %v3880_v23  ;;  %v5182_v52 = vor.u32 %v4105_v54, %v3886_v10  ;;  %v5188_v25 = vor.u32 %v4100_v55, %v3862_v61  ;;  %v3846_v29 = vld [vmem:[#allocation7] sm:$0xf]  ;;  %v4096_v23 = vld [vmem:[#allocation7 + $0xc] sm:$0xf0]  ;;  %v6722_v55 = vld [vmem:[#allocation72_spill] sm:$0xff] }
 0x211   :  { %6711 = vst [vmem:[#allocation123_spill] sm:$0xff] %v5166_v3 }
 0x212   :  { %1373 = vmatpush.bf16.msra.mxu3 %v5148_v21  ;;  %1386 = vmatpush.bf16.msra.mxu0 %v5150_v41  ;;  %6712 = vst [vmem:[#allocation124_spill] sm:$0xff] %v5168_v45  ;;  %v3870_v41 = vld [vmem:[#allocation7 + $0x28] sm:$0xf]  ;;  %v4099_v21 = vld [vmem:[#allocation7 + $0x2c] sm:$0xf] }
 0x213   :  { %1399 = vmatpush.bf16.msra.mxu1 %v5154_v8  ;;  %1412 = vmatpush.bf16.msrb.mxu2 %v5156_v30  ;;  %6713 = vst [vmem:[#allocation125_spill] sm:$0xff] %v5176_v47  ;;  %v5184_v30 = vor.u32 %v4103_v1, %v3888_v12  ;;  %v4098_v8 = vld [vmem:[#allocation7 + $0x24] sm:$0xf]  ;;  %v3848_v12 = vld [vmem:[#allocation7 + $0x10] sm:$0xf0] }
 0x214   :  { %1099 = vmatmul.bf16.vlgmr.msrb.gmra.mxu3 %v5108_v59  ;;  %1112 = vmatmul.bf16.vlgmr.msrb.gmra.mxu0 %v5108_v59  ;;  %6714 = vst [vmem:[#allocation126_spill] sm:$0xff] %v5178_v4  ;;  %v4094_v1 = vld [vmem:[#allocation7 + $0x4] sm:$0xf] }
 0x215   :  { %1125 = vmatmul.bf16.vlgmr.msrb.gmra.mxu1 %v5108_v59  ;;  %1138 = vmatmul.bf16.vlgmr.msra.gmra.mxu2 %v5108_v59  ;;  %v3864_v59 = vld [vmem:[#allocation7 + $0x30] sm:$0xf0]  ;;  %v5202_v61 = vor.u32 %v4094_v1, %v3848_v12  ;;  %v6726_v1 = vld [vmem:[#allocation78_spill] sm:$0xff] }
 0x216   :  { %1374 = vmatpush.bf16.msra.mxu3 %v5160_v39  ;;  %1387 = vmatpush.bf16.msra.mxu0 %v5162_v31  ;;  %v4101_v39 = vld [vmem:[#allocation7 + $0x34] sm:$0xf0]  ;;  %v3872_v31 = vld [vmem:[#allocation7 + $0x38] sm:$0xf0]  ;;  %v5190_v49 = vor.u32 %v4098_v8, %v3864_v59  ;;  %v5200_v8 = vor.u32 %v4096_v23, %v3846_v29  ;;  %v6723_v59 = vld [vmem:[#allocation73_spill] sm:$0xff] }
 0x217   :  { %1400 = vmatpush.bf16.msra.mxu1 %v5166_v3  ;;  %1413 = vmatpush.bf16.msrb.mxu2 %v5168_v45  ;;  %v5194_v10 = vor.u32 %v4101_v39, %v3870_v41  ;;  %v5196_v54 = vor.u32 %v4099_v21, %v3872_v31  ;;  %v3854_v45 = vld [vmem:[#allocation7 + $0x8] sm:$0xf]  ;;  %v4095_v3 = vld [vmem:[#allocation7 + $0xc] sm:$0xf]  ;;  %v6716_v39 = vmov 0   ;;  %v6724_v29 = vld [vmem:[#allocation76_spill] sm:$0xff] }
 0x218   :  { %v6717_v31 = vld [vmem:[#allocation66_spill] sm:$0xff]  ;;  %v6725_v23 = vld [vmem:[#allocation77_spill] sm:$0xff]  ;;  %v6727_v12 = vld [vmem:[#allocation79_spill] sm:$0xff] }
 0x21a   :  { %1375 = vmatpush.bf16.msra.mxu3 %v5176_v47  ;;  %1388 = vmatpush.bf16.msra.mxu0 %v5178_v4  ;;  %v4097_v47 = vld [vmem:[#allocation7 + $0x14] sm:$0xf0]  ;;  %v3856_v4 = vld [vmem:[#allocation7 + $0x18] sm:$0xf0] }
 0x21b   :  { %1401 = vmatpush.bf16.msra.mxu1 %v5182_v52  ;;  %1414 = vmatpush.bf16.msrb.mxu2 %v5184_v30  ;;  %v5206_v21 = vor.u32 %v4097_v47, %v3854_v45  ;;  %v5208_v41 = vor.u32 %v4095_v3, %v3856_v4  ;;  %v6718_v3 = vld [vmem:[#allocation67_spill] sm:$0xff]  ;;  %v6719_v45 = vld [vmem:[#allocation68_spill] sm:$0xff]  ;;  %v6720_v47 = vld [vmem:[#allocation69_spill] sm:$0xff] }
 0x21c   :  { %v6721_v4 = vld [vmem:[#allocation70_spill] sm:$0xff] }
 0x21d   :  { %6715 = vst [vmem:[#allocation127_spill] sm:$0xff] %v5208_v41 }
 0x21e   :  { %1376 = vmatpush.bf16.msra.mxu3 %v5188_v25  ;;  %1389 = vmatpush.bf16.msra.mxu0 %v5190_v49 }
 0x21f   :  { %1402 = vmatpush.bf16.msra.mxu1 %v5194_v10  ;;  %1415 = vmatpush.bf16.msrb.mxu2 %v5196_v54 }
 0x222   :  { %1377 = vmatpush.bf16.msra.mxu3 %v5200_v8  ;;  %1390 = vmatpush.bf16.msra.mxu0 %v5202_v61 }
 0x223   :  { %1403 = vmatpush.bf16.msra.mxu1 %v5206_v21  ;;  %1416 = vmatpush.bf16.msrb.mxu2 %v5208_v41 }
 0x225   :  { %1378 = vmatmul.bf16.vlgmr.msra.gmra.mxu3 %v6716_v39  ;;  %1391 = vmatmul.bf16.vlgmr.msra.gmra.mxu0 %v6716_v39 }
 0x226   :  { %1490 = vmatpush.bf16.msrb.mxu3 %v4912_v17  ;;  %1503 = vmatpush.bf16.msrb.mxu0 %v4914_v27 }
 0x227   :  { %1404 = vmatmul.bf16.vlgmr.msra.gmra.mxu1 %v6716_v39  ;;  %1417 = vmatmul.bf16.vlgmr.msrb.gmra.mxu2 %v6716_v39  ;;  %v6728_v39 = vld [vmem:[#allocation80_spill] sm:$0xff] }
 0x228   :  { %1516 = vmatpush.bf16.msrb.mxu1 %v4917_v38  ;;  %1529 = vmatpush.bf16.msra.mxu2 %v4919_v40 }
 0x22a   :  { %1491 = vmatpush.bf16.msrb.mxu3 %v4926_v5  ;;  %1504 = vmatpush.bf16.msrb.mxu0 %v4930_v22 }
 0x22c   :  { %1517 = vmatpush.bf16.msrb.mxu1 %v4932_v28  ;;  %1530 = vmatpush.bf16.msra.mxu2 %v4935_v11 }
 0x22e   :  { %1492 = vmatpush.bf16.msrb.mxu3 %v6717_v31  ;;  %1505 = vmatpush.bf16.msrb.mxu0 %v6718_v3  ;;  %v6729_v3 = vld [vmem:[#allocation82_spill] sm:$0xff] }
 0x230   :  { %1518 = vmatpush.bf16.msrb.mxu1 %v6719_v45  ;;  %1531 = vmatpush.bf16.msra.mxu2 %v6720_v47  ;;  %v6730_v45 = vld [vmem:[#allocation84_spill] sm:$0xff]  ;;  %v6731_v47 = vld [vmem:[#allocation85_spill] sm:$0xff] }
 0x232   :  { %1493 = vmatpush.bf16.msrb.mxu3 %v6721_v4  ;;  %1506 = vmatpush.bf16.msrb.mxu0 %v6722_v55  ;;  %v6732_v4 = vld [vmem:[#allocation86_spill] sm:$0xff]  ;;  %v6733_v55 = vld [vmem:[#allocation88_spill] sm:$0xff] }
 0x234   :  { %1519 = vmatpush.bf16.msrb.mxu1 %v6723_v59  ;;  %1532 = vmatpush.bf16.msra.mxu2 %v6724_v29  ;;  %v6734_v59 = vld [vmem:[#allocation89_spill] sm:$0xff]  ;;  %v6735_v29 = vld [vmem:[#allocation90_spill] sm:$0xff] }
 0x236   :  { %1494 = vmatpush.bf16.msrb.mxu3 %v6725_v23  ;;  %1507 = vmatpush.bf16.msrb.mxu0 %v6726_v1 }
 0x238   :  { %1520 = vmatpush.bf16.msrb.mxu1 %v6727_v12  ;;  %1533 = vmatpush.bf16.msra.mxu2 %v6728_v39 }
 0x23a   :  { %1495 = vmatpush.bf16.msrb.mxu3 %v6729_v3  ;;  %1508 = vmatpush.bf16.msrb.mxu0 %v6730_v45 }
 0x23c   :  { %1521 = vmatpush.bf16.msrb.mxu1 %v6731_v47  ;;  %1534 = vmatpush.bf16.msra.mxu2 %v6732_v4 }
 0x23e   :  { %1496 = vmatpush.bf16.msrb.mxu3 %v6733_v55  ;;  %1509 = vmatpush.bf16.msrb.mxu0 %v6734_v59 }
 0x240   :  { %1522 = vmatpush.bf16.msrb.mxu1 %v6735_v29  ;;  %1535 = vmatpush.bf16.msra.mxu2 %v5013_v60 }
 0x242   :  { %1497 = vmatpush.bf16.msrb.mxu3 %v5018_v32  ;;  %1510 = vmatpush.bf16.msrb.mxu0 %v5023_v0 }
 0x244   :  { %1523 = vmatpush.bf16.msrb.mxu1 %v5025_v16  ;;  %1536 = vmatpush.bf16.msra.mxu2 %v5033_v56 }
 0x246   :  { %1546 = vmatpush.bf16.msra.mxu3 %v4742_v33  ;;  %1559 = vmatpush.bf16.msra.mxu0 %v4744_v36 }
 0x248   :  { %1572 = vmatpush.bf16.msra.mxu1 %v4650_v35  ;;  %1585 = vmatpush.bf16.msrb.mxu2 %v4814_v34  ;;  %v6749_v34 = vld [vmem:[#allocation48_spill] sm:$0xff]  ;;  %v6750_v35 = vld [vmem:[#allocation46_spill] sm:$0xff] }
 0x249   :  { %v349_v56 = vadd.f32 %v6750_v35, %v6749_v34 }
 0x24a   :  { %1547 = vmatpush.bf16.msra.mxu3 %v4751_v43  ;;  %1560 = vmatpush.bf16.msra.mxu0 %v4754_v46 }
 0x24c   :  { %1573 = vmatpush.bf16.msra.mxu1 %v4668_v44  ;;  %1586 = vmatpush.bf16.msrb.mxu2 %v4822_v48 }
 0x24e   :  { %1548 = vmatpush.bf16.msra.mxu3 %v4759_v51  ;;  %1561 = vmatpush.bf16.msra.mxu0 %v4761_v53  ;;  %v6747_v51 = vld [vmem:[#allocation45_spill] sm:$0xff] }
 0x250   :  { %1574 = vmatpush.bf16.msra.mxu1 %v4674_v50  ;;  %1587 = vmatpush.bf16.msrb.mxu2 %v4840_v63  ;;  %v6745_v50 = vld [vmem:[#allocation51_spill] sm:$0xff] }
 0x252   :  { %1549 = vmatpush.bf16.msra.mxu3 %v4765_v58  ;;  %1562 = vmatpush.bf16.msra.mxu0 %v4773_v62  ;;  %v6736_v62 = vld [vmem:[#allocation33_spill] sm:$0xff] }
 0x254   :  { %1575 = vmatpush.bf16.msra.mxu1 %v4695_v2  ;;  %1588 = vmatpush.bf16.msrb.mxu2 %v4844_v6  ;;  %v6737_v2 = vld [vmem:[#allocation36_spill] sm:$0xff]  ;;  %v6738_v6 = vld [vmem:[#allocation19_spill] sm:$0xff] }
 0x256   :  { %1550 = vmatpush.bf16.msra.mxu3 %v4785_v7  ;;  %1563 = vmatpush.bf16.msra.mxu0 %v4787_v9  ;;  %v6739_v7 = vld [vmem:[#allocation43_spill] sm:$0xff]  ;;  %v6740_v9 = vld [vmem:[#allocation34_spill] sm:$0xff] }
 0x258   :  { %1576 = vmatpush.bf16.msra.mxu1 %v4716_v14  ;;  %1589 = vmatpush.bf16.msrb.mxu2 %v4849_v13  ;;  %v6741_v14 = vld [vmem:[#allocation38_spill] sm:$0xff] }
 0x259   :  { %v6742_v13 = vld [vmem:[#allocation22_spill] sm:$0xff] }
 0x25a   :  { %1551 = vmatpush.bf16.msra.mxu3 %v4791_v15  ;;  %1564 = vmatpush.bf16.msra.mxu0 %v4799_v19  ;;  %v6743_v15 = vld [vmem:[#allocation44_spill] sm:$0xff]  ;;  %v5282_v19 = vpop.f32.mrf.mxu1 }
 0x25b   :  { %6744 = vst [vmem:[#allocation128_spill] sm:$0xff] %v5282_v19 }
 0x25c   :  { %1577 = vmatpush.bf16.msra.mxu1 %v4737_v26  ;;  %1590 = vmatpush.bf16.msrb.mxu2 %v4853_v18 }
 0x25e   :  { %1552 = vmatpush.bf16.msra.mxu3 %v6736_v62  ;;  %1565 = vmatpush.bf16.msra.mxu0 %v6737_v2 }
 0x260   :  { %1578 = vmatpush.bf16.msra.mxu1 %v6738_v6  ;;  %1591 = vmatpush.bf16.msrb.mxu2 %v6739_v7  ;;  %v6746_v7 = vld [vmem:[#allocation47_spill] sm:$0xff] }
 0x261   :  { %v378_v53 = vadd.f32 %v6746_v7, %v6745_v50  ;;  %v5295_v7 = vld [vmem:[%s6402_s7] sm:$0xf] }
 0x262   :  { %1553 = vmatpush.bf16.msra.mxu3 %v6740_v9  ;;  %1566 = vmatpush.bf16.msra.mxu0 %v6741_v14  ;;  %v6748_v14 = vld [vmem:[#allocation49_spill] sm:$0xff] }
 0x263   :  { %v407_v48 = vadd.f32 %v6748_v14, %v6747_v51  ;;  %v6754_v51 = vld [vmem:[#allocation101_spill] sm:$0xff] }
 0x264   :  { %1579 = vmatpush.bf16.msra.mxu1 %v6742_v13  ;;  %1592 = vmatpush.bf16.msrb.mxu2 %v6743_v15  ;;  %v436_v50 = vadd.f32 %v6754_v51, %v5073_v37 }
 0x281   :  { %v1057_v26 = vpop.f32.mrf.mxu0 }
 0x282   :  { %v1070_v18 = vpop.f32.mrf.mxu1 }
 0x287   :  { %v1044_v58 = vpop.f32.mrf.mxu3 }
 0x288   :  { %v5284_v62 = vpop.f32.mrf.mxu2 }
 0x289   :  { %v1059_v2 = vpop.f32.mrf.mxu0 }
 0x28a   :  { %v1072_v63 = vpop.f32.mrf.mxu1 }
 0x28f   :  { %v1046_v6 = vpop.f32.mrf.mxu3 }
 0x290   :  { %v1085_v9 = vpop.f32.mrf.mxu2 }
 0x291   :  { %v1113_v13 = vpop.f32.mrf.mxu0 }
 0x292   :  { %v1144_v44 = vadd.f32 %v1113_v13, %v378_v53  ;;  %v1126_v15 = vpop.f32.mrf.mxu1 }
 0x293   :  { %v1145_v46 = vadd.f32 %v1126_v15, %v407_v48 }
 0x294   :  { %v3842_v19 = vmul.f32 -1.442695, %v1144_v44 }
 0x295   :  { %v3843_v43 = vmul.f32 -1.442695, %v1145_v46  ;;  %v5298_v46 = vperm.slane %v5295_v7, 1 }
 0x296   :  { %4156 = vpow2.f32 %v3842_v19 }
 0x297   :  { %4158 = vpow2.f32 %v3843_v43  ;;  %v1100_v2 = vpop.f32.mrf.mxu3  ;;  %6751 = vst [vmem:[#allocation47_spill] sm:$0xff] %v5298_v46  ;;  %v1058_v48 = vadd.f32 %v1057_v26, %v5298_v46 }
 0x298   :  { %v1143_v63 = vadd.f32 %v1100_v2, %v349_v56  ;;  %v1139_v6 = vpop.f32.mrf.mxu2  ;;  %v5304_v56 = vperm.slane %v5295_v7, 0 }
 0x299   :  { %v1115_v16 = vpop.f32.mrf.mxu0  ;;  %v1146_v0 = vadd.f32 %v1139_v6, %v436_v50 }
 0x29a   :  { %v3841_v14 = vmul.f32 -1.442695, %v1143_v63  ;;  %v1128_v53 = vpop.f32.mrf.mxu1  ;;  %6752 = vst [vmem:[#allocation49_spill] sm:$0xff] %v5304_v56 }
 0x29c   :  { %v4157_v9 = vpop.eup %4156  ;;  %4160 = vpow2.f32 %v3841_v14 }
 0x29d   :  { %v4159_v44 = vpop.eup %4158  ;;  %v1157_v35 = vadd.f32 1.0, %v4157_v9 }
 0x29e   :  { %v5300_v15 = vadd.f32 1.0, %v4159_v44  ;;  %v5308_v44 = vperm.slane %v5295_v7, 2 }
 0x29f   :  { %4162 = vrcp.f32 %v1157_v35  ;;  %v1102_v43 = vpop.f32.mrf.mxu3  ;;  %vm1179_vm6 = vweird.f32 %v1157_v35 }
 0x2a0   :  { %v1141_v19 = vpop.f32.mrf.mxu2  ;;  %4164 = vrcp.f32 %v5300_v15  ;;  %6753 = vst [vmem:[#allocation46_spill] sm:$0xff] %v5308_v44  ;;  %v1045_v43 = vadd.f32 %v1044_v58, %v5304_v56  ;;  %vm1194_vm14 = vweird.f32 %v5300_v15 }
 0x2a2   :  { %v4161_v13 = vpop.eup %4160  ;;  %v1392_v16 = vpop.f32.mrf.mxu0 }
 0x2a3   :  { %v1156_v2 = vadd.f32 1.0, %v4161_v13  ;;  %v1423_v63 = vadd.f32 %v1392_v16, %v1058_v48 }
 0x2a4   :  { %v1405_v14 = vpop.f32.mrf.mxu1 }
 0x2a5   :  { %v4163_v53 = vpop.eup %4162  ;;  %4166 = vrcp.f32 %v1156_v2  ;;  %v3973_v34 = vmul.f32 -1.442695, %v1423_v63  ;;  %v1071_v63 = vadd.f32 %v1070_v18, %v5308_v44  ;;  %v1170_v50 = vand.u32 2147483648, %v1156_v2 }
 0x2a6   :  { %v1175_v9 = vmul.f32 %v4163_v53, %v1157_v35  ;;  %v5315_v16 = vpop.eup %4164  ;;  %vm1180_vm5 = vweird.f32 %v4163_v53  ;;  %v1168_v6 = vand.u32 2147483647, %v1156_v2  ;;  %vm1164_vm9 = vweird.f32 %v1156_v2 }
 0x2a7   :  { %4168 = vpow2.f32 %v3973_v34  ;;  %v1190_v51 = vmul.f32 %v5315_v16, %v5300_v15  ;;  %vm5320_vm7 = vmor %vm1179_vm6, %vm1180_vm5  ;;  %vm1195_vm13 = vweird.f32 %v5315_v16 }
 0x2a8   :  { %v1176_v26 = vsub.f32 1.0, %v1175_v9  ;;  %v1379_v19 = vpop.f32.mrf.mxu3  ;;  %v1185_v9 = vand.u32 2147483648, %v1157_v35  ;;  %vm1169_vm12 = vcmp.eq.f32.partialorder %v1168_v6, 8.507059e+37  ;;  %vm1196_vm15 = vmor %vm1194_vm14, %vm1195_vm13  ;;  %v5345_v6 = vperm.slane %v5295_v7, 3 }
 0x2a9   :  { %v1422_v13 = vadd.f32 %v1379_v19, %v1045_v43  ;;  %v1424_v43 = vadd.f32 %v1405_v14, %v1071_v63 }
 0x2aa   :  { %v5313_v48 = vpop.f32.mrf.mxu2  ;;  %v1177_v46 = vmul.f32 %v4163_v53, %v1176_v26  ;;  %v1394_v36 = vpop.f32.mrf.mxu0  ;;  %v1183_v26 = vand.u32 2147483647, %v1157_v35 }
 0x2ab   :  { %v4167_v33 = vpop.eup %4166  ;;  %v3972_v32 = vmul.f32 -1.442695, %v1422_v13  ;;  %v1191_v13 = vsub.f32 1.0, %v1190_v51  ;;  %v3974_v63 = vmul.f32 -1.442695, %v1424_v43 }
 0x2ac   :  { %v1407_v60 = vpop.f32.mrf.mxu1  ;;  %v1160_v58 = vmul.f32 %v4167_v33, %v1156_v2  ;;  %v1178_v34 = vadd.f32 %v4163_v53, %v1177_v46  ;;  %vm1165_vm8 = vweird.f32 %v4167_v33  ;;  %vm1184_vm10 = vcmp.eq.f32.partialorder %v1183_v26, 8.507059e+37 }
 0x2ad   :  { %4170 = vpow2.f32 %v3972_v32  ;;  %v4169_v19 = vpop.eup %4168  ;;  %v1186_v32 = vor.u32 1.1754944e-38, %v1185_v9  ;;  %vm1166_vm11 = vmor %vm1164_vm9, %vm1165_vm8  ;;  %v1198_v36 = vand.u32 2147483647, %v5300_v15 }
 0x2ae   :  { %v1161_v37 = vsub.f32 1.0, %v1160_v58  ;;  %4172 = vtanh.f32 %v1146_v0  ;;  %v5324_v18 = vadd.f32 1.0, %v4169_v19  ;;  %v1182_v46 = vsel %vm5320_vm7, %v4163_v53, %v1178_v34 }
 0x2af   :  { %v1171_v0 = vor.u32 1.1754944e-38, %v1170_v50  ;;  %v1187_v19 = vsel %vm1184_vm10, %v1186_v32, %v1182_v46  ;;  %v1192_v53 = vmul.f32 %v5315_v16, %v1191_v13  ;;  %vm1199_vm0 = vcmp.eq.f32.partialorder %v1198_v36, 8.507059e+37 }
 0x2b0   :  { %v1162_v60 = vmul.f32 %v4167_v33, %v1161_v37  ;;  %v1381_v14 = vpop.f32.mrf.mxu3  ;;  %4174 = vrcp.f32 %v5324_v18  ;;  %v1205_v9 = vmul.f32 %v1187_v19, %v5097_v42  ;;  %vm1458_vm5 = vweird.f32 %v5324_v18 }
 0x2b1   :  { %4176 = vpow2.f32 %v3974_v63  ;;  %v1193_v26 = vadd.f32 %v5315_v16, %v1192_v53 }
 0x2b2   :  { %v1420_v58 = vpop.f32.mrf.mxu2  ;;  %v1163_v35 = vadd.f32 %v4167_v33, %v1162_v60 }
 0x2b3   :  { %v4171_v44 = vpop.eup %4170  ;;  %v1197_v50 = vsel %vm1196_vm15, %v5315_v16, %v1193_v26  ;;  %v6760_v26 = vld [vmem:[#allocation109_spill] sm:$0xff] }
 0x2b4   :  { %v1167_v37 = vsel %vm1166_vm11, %v4167_v33, %v1163_v35  ;;  %v1435_v56 = vadd.f32 1.0, %v4171_v44  ;;  %v4173_v29 = vpop.eup %4172  ;;  %v1200_v33 = vand.u32 2147483648, %v5300_v15 }
 0x2b5   :  { %v1172_v34 = vsel %vm1169_vm12, %v1171_v0, %v1167_v37  ;;  %v1084_v0 = vadd.f32 %v5284_v62, %v5345_v6  ;;  %v1464_v62 = vand.u32 2147483648, %v5324_v18 }
 0x2b6   :  { %v1206_v51 = vmul.f32 %v4173_v29, %v1172_v34  ;;  %4178 = vrcp.f32 %v1435_v56  ;;  %v5331_v2 = vpop.eup %4174  ;;  %v1201_v46 = vor.u32 1.1754944e-38, %v1200_v33  ;;  %v1449_v53 = vand.u32 2147483648, %v1435_v56 }
 0x2b7   :  { %v4177_v44 = vpop.eup %4176  ;;  %v1454_v42 = vmul.f32 %v5331_v2, %v5324_v18  ;;  %v1425_v7 = vadd.f32 %v5313_v48, %v1084_v0  ;;  %vm1443_vm2 = vweird.f32 %v1435_v56  ;;  %v1447_v34 = vand.u32 2147483647, %v1435_v56  ;;  %v6766_v0 = vld [vmem:[#allocation115_spill] sm:$0xff] }
 0x2b8   :  { %v5333_v43 = vadd.f32 %v1206_v51, %v1205_v9  ;;  %v5347_v32 = vadd.f32 1.0, %v4177_v44  ;;  %v1202_v58 = vsel %vm1199_vm0, %v1201_v46, %v1197_v50  ;;  %vm1459_vm3 = vweird.f32 %v5331_v2  ;;  %v6759_v51 = vld [vmem:[#allocation108_spill] sm:$0xff]  ;;  %v6761_v50 = vld [vmem:[#allocation110_spill] sm:$0xff] }
 0x2b9   :  { %v1455_v14 = vsub.f32 1.0, %v1454_v42  ;;  %v1462_v44 = vand.u32 2147483647, %v5324_v18  ;;  %v1450_v36 = vor.u32 1.1754944e-38, %v1449_v53  ;;  %vm1460_vm6 = vmor %vm1458_vm5, %vm1459_vm3  ;;  %vm1448_vm7 = vcmp.eq.f32.partialorder %v1447_v34, 8.507059e+37  ;;  %v6768_v53 = vld [vmem:[#allocation117_spill] sm:$0xff] }
 0x2ba   :  { %4180 = vtanh.f32 %v5333_v43  ;;  %v1465_v46 = vor.u32 1.1754944e-38, %v1464_v62  ;;  %v6769_v34 = vld [vmem:[#allocation118_spill] sm:$0xff]  ;;  %v6771_v62 = vld [vmem:[#allocation120_spill] sm:$0xff]  ;;  %vm1473_vm10 = vweird.f32 %v5347_v32 }
 0x2bb   :  { %v1456_v16 = vmul.f32 %v5331_v2, %v1455_v14  ;;  %4182 = vrcp.f32 %v5347_v32  ;;  %vm1463_vm8 = vcmp.eq.f32.partialorder %v1462_v44, 8.507059e+37  ;;  %v6773_v44 = vld [vmem:[#allocation122_spill] sm:$0xff] }
 0x2bc   :  { %v4179_v29 = vpop.eup %4178  ;;  %4184 = vtanh.f32 %v1425_v7 }
 0x2bd   :  { %v1439_v60 = vmul.f32 %v4179_v29, %v1435_v56  ;;  %vm1444_vm1 = vweird.f32 %v4179_v29  ;;  %v1457_v9 = vadd.f32 %v5331_v2, %v1456_v16  ;;  %v6767_v16 = vld [vmem:[#allocation116_spill] sm:$0xff] }
 0x2be   :  { %vm5359_vm4 = vmor %vm1443_vm2, %vm1444_vm1 }
 0x2bf   :  { %v1440_v13 = vsub.f32 1.0, %v1439_v60  ;;  %v1461_v42 = vsel %vm1460_vm6, %v5331_v2, %v1457_v9  ;;  %v6762_v60 = vld [vmem:[#allocation111_spill] sm:$0xff] }
 0x2c0   :  { %v4181_v63 = vpop.eup %4180  ;;  %v1466_v18 = vsel %vm1463_vm8, %v1465_v46, %v1461_v42  ;;  %v6770_v9 = vld [vmem:[#allocation119_spill] sm:$0xff]  ;;  %v6775_v42 = vld [vmem:[#allocation124_spill] sm:$0xff] }
 0x2c1   :  { %v1209_v15 = vmul.f32 %v4181_v63, %v1202_v58  ;;  %v1441_v35 = vmul.f32 %v4179_v29, %v1440_v13  ;;  %v4183_v56 = vpop.eup %4182  ;;  %v6763_v63 = vld [vmem:[#allocation112_spill] sm:$0xff]  ;;  %v6764_v58 = vld [vmem:[#allocation113_spill] sm:$0xff]  ;;  %v1484_v7 = vmul.f32 0.0, %v1466_v18 }
 0x2c2   :  { %v1469_v14 = vmul.f32 %v4183_v56, %v5347_v32  ;;  %vm1474_vm9 = vweird.f32 %v4183_v56 }
 0x2c3   :  { %v1489_v19 = vpack.c.bf16 %v1209_v15, %v1209_v15  ;;  %v1442_v37 = vadd.f32 %v4179_v29, %v1441_v35  ;;  %v6765_v35 = vld [vmem:[#allocation114_spill] sm:$0xff]  ;;  %vm1475_vm11 = vmor %vm1473_vm10, %vm1474_vm9 }
 0x2c4   :  { %v1470_v2 = vsub.f32 1.0, %v1469_v14  ;;  %v1479_v14 = vand.u32 2147483648, %v5347_v32 }
 0x2c5   :  { %1498 = vmatmul.bf16.vlgmr.msrb.gmra.mxu3 %v1489_v19  ;;  %1511 = vmatmul.bf16.vlgmr.msrb.gmra.mxu0 %v1489_v19  ;;  %v1446_v33 = vsel %vm5359_vm4, %v4179_v29, %v1442_v37  ;;  %v4185_v29 = vpop.eup %4184 }
 0x2c6   :  { %1524 = vmatmul.bf16.vlgmr.msrb.gmra.mxu1 %v1489_v19  ;;  %1537 = vmatmul.bf16.vlgmr.msra.gmra.mxu2 %v1489_v19  ;;  %v1451_v13 = vsel %vm1448_vm7, %v1450_v36, %v1446_v33  ;;  %v1471_v48 = vmul.f32 %v4183_v56, %v1470_v2  ;;  %v6772_v33 = vld [vmem:[#allocation121_spill] sm:$0xff]  ;;  %v6774_v36 = vld [vmem:[#allocation123_spill] sm:$0xff]  ;;  %v1480_v2 = vor.u32 1.1754944e-38, %v1479_v14 }
 0x2c7   :  { %1666 = vmatpush.bf16.msrb.mxu3 %v5110_v20  ;;  %1679 = vmatpush.bf16.msrb.mxu0 %v5112_v57  ;;  %v1485_v15 = vmul.f32 %v4185_v29, %v1451_v13  ;;  %v1477_v13 = vand.u32 2147483647, %v5347_v32  ;;  %v6776_v29 = vld [vmem:[#allocation125_spill] sm:$0xff] }
 0x2c8   :  { %1692 = vmatpush.bf16.msrb.mxu1 %v6759_v51  ;;  %1705 = vmatpush.bf16.msra.mxu2 %v6760_v26  ;;  %v1472_v46 = vadd.f32 %v4183_v56, %v1471_v48  ;;  %v6778_v48 = vld [vmem:[#allocation67_spill] sm:$0xff]  ;;  %v6780_v14 = vld [vmem:[#allocation69_spill] sm:$0xff] }
 0x2c9   :  { %v5379_v37 = vadd.f32 %v1485_v15, %v1484_v7  ;;  %vm1478_vm12 = vcmp.eq.f32.partialorder %v1477_v13, 8.507059e+37  ;;  %v6781_v13 = vld [vmem:[#allocation70_spill] sm:$0xff] }
 0x2ca   :  { %v1476_v18 = vsel %vm1475_vm11, %v4183_v56, %v1472_v46  ;;  %v6779_v46 = vld [vmem:[#allocation68_spill] sm:$0xff] }
 0x2cb   :  { %1667 = vmatpush.bf16.msrb.mxu3 %v6761_v50  ;;  %1680 = vmatpush.bf16.msrb.mxu0 %v6762_v60  ;;  %4186 = vtanh.f32 %v5379_v37  ;;  %v1481_v7 = vsel %vm1478_vm12, %v1480_v2, %v1476_v18  ;;  %v6782_v18 = vld [vmem:[#allocation72_spill] sm:$0xff] }
 0x2cc   :  { %1693 = vmatpush.bf16.msrb.mxu1 %v6763_v63  ;;  %1706 = vmatpush.bf16.msra.mxu2 %v6764_v58  ;;  %v6784_v2 = vld [vmem:[#allocation76_spill] sm:$0xff] }
 0x2cf   :  { %1668 = vmatpush.bf16.msrb.mxu3 %v6765_v35  ;;  %1681 = vmatpush.bf16.msrb.mxu0 %v6766_v0 }
 0x2d0   :  { %1694 = vmatpush.bf16.msrb.mxu1 %v5142_v24  ;;  %1707 = vmatpush.bf16.msra.mxu2 %v6767_v16 }
 0x2d1   :  { %v4187_v15 = vpop.eup %4186 }
 0x2d2   :  { %v1488_v32 = vmul.f32 %v4187_v15, %v1481_v7  ;;  %v6783_v15 = vld [vmem:[#allocation73_spill] sm:$0xff]  ;;  %v6785_v7 = vld [vmem:[#allocation90_spill] sm:$0xff] }
 0x2d3   :  { %1669 = vmatpush.bf16.msrb.mxu3 %v6768_v53  ;;  %1682 = vmatpush.bf16.msrb.mxu0 %v6769_v34 }
 0x2d4   :  { %1695 = vmatpush.bf16.msrb.mxu1 %v6770_v9  ;;  %1708 = vmatpush.bf16.msra.mxu2 %v6771_v62  ;;  %v1665_v56 = vpack.c.bf16 %v1488_v32, %v1488_v32  ;;  %v6786_v32 = vld [vmem:[#allocation91_spill] sm:$0xff] }
 0x2d5   :  { %1554 = vmatmul.bf16.vlgmr.msra.gmra.mxu3 %v1489_v19  ;;  %1567 = vmatmul.bf16.vlgmr.msra.gmra.mxu0 %v1489_v19 }
 0x2d6   :  { %1580 = vmatmul.bf16.vlgmr.msra.gmra.mxu1 %v1489_v19  ;;  %1593 = vmatmul.bf16.vlgmr.msrb.gmra.mxu2 %v1489_v19  ;;  %v6777_v19 = vld [vmem:[#allocation126_spill] sm:$0xff] }
 0x2d7   :  { %1670 = vmatpush.bf16.msrb.mxu3 %v6772_v33  ;;  %1683 = vmatpush.bf16.msrb.mxu0 %v6773_v44 }
 0x2d8   :  { %1696 = vmatpush.bf16.msrb.mxu1 %v6774_v36  ;;  %1709 = vmatpush.bf16.msra.mxu2 %v6775_v42 }
 0x2db   :  { %1671 = vmatpush.bf16.msrb.mxu3 %v6776_v29  ;;  %1684 = vmatpush.bf16.msrb.mxu0 %v6777_v19 }
 0x2dc   :  { %1697 = vmatpush.bf16.msrb.mxu1 %v5182_v52  ;;  %1710 = vmatpush.bf16.msra.mxu2 %v5184_v30 }
 0x2df   :  { %1672 = vmatpush.bf16.msrb.mxu3 %v5188_v25  ;;  %1685 = vmatpush.bf16.msrb.mxu0 %v5190_v49 }
 0x2e0   :  { %1698 = vmatpush.bf16.msrb.mxu1 %v5194_v10  ;;  %1711 = vmatpush.bf16.msra.mxu2 %v5196_v54 }
 0x2e3   :  { %1673 = vmatpush.bf16.msrb.mxu3 %v5200_v8  ;;  %1686 = vmatpush.bf16.msrb.mxu0 %v5202_v61 }
 0x2e4   :  { %1699 = vmatpush.bf16.msrb.mxu1 %v5206_v21  ;;  %1712 = vmatpush.bf16.msra.mxu2 %v5208_v41 }
 0x2e6   :  { %1674 = vmatmul.bf16.vlgmr.msrb.gmra.mxu3 %v1665_v56  ;;  %1687 = vmatmul.bf16.vlgmr.msrb.gmra.mxu0 %v1665_v56 }
 0x2e7   :  { %1786 = vmatpush.bf16.msra.mxu3 %v4912_v17  ;;  %1799 = vmatpush.bf16.msra.mxu0 %v4914_v27 }
 0x2e8   :  { %1700 = vmatmul.bf16.vlgmr.msrb.gmra.mxu1 %v1665_v56  ;;  %1713 = vmatmul.bf16.vlgmr.msra.gmra.mxu2 %v1665_v56  ;;  %v6787_v56 = vld [vmem:[#allocation92_spill] sm:$0xff] }
 0x2e9   :  { %1812 = vmatpush.bf16.msra.mxu1 %v4917_v38  ;;  %1825 = vmatpush.bf16.msrb.mxu2 %v4919_v40 }
 0x2eb   :  { %1787 = vmatpush.bf16.msra.mxu3 %v4926_v5  ;;  %1800 = vmatpush.bf16.msra.mxu0 %v4930_v22  ;;  %v6829_v5 = vld [vmem:[#allocation103_spill] sm:$0xff] }
 0x2ed   :  { %1813 = vmatpush.bf16.msra.mxu1 %v4932_v28  ;;  %1826 = vmatpush.bf16.msrb.mxu2 %v4935_v11 }
 0x2ef   :  { %1788 = vmatpush.bf16.msra.mxu3 %v6717_v31  ;;  %1801 = vmatpush.bf16.msra.mxu0 %v6778_v48 }
 0x2f1   :  { %1814 = vmatpush.bf16.msra.mxu1 %v6779_v46  ;;  %1827 = vmatpush.bf16.msrb.mxu2 %v6780_v14 }
 0x2f3   :  { %1789 = vmatpush.bf16.msra.mxu3 %v6781_v13  ;;  %1802 = vmatpush.bf16.msra.mxu0 %v6782_v18 }
 0x2f5   :  { %1815 = vmatpush.bf16.msra.mxu1 %v6783_v15  ;;  %1828 = vmatpush.bf16.msrb.mxu2 %v6784_v2  ;;  %v6823_v15 = vld [vmem:[#allocation52_spill] sm:$0xff] }
 0x2f7   :  { %1790 = vmatpush.bf16.msra.mxu3 %v6725_v23  ;;  %1803 = vmatpush.bf16.msra.mxu0 %v6726_v1 }
 0x2f9   :  { %1816 = vmatpush.bf16.msra.mxu1 %v6727_v12  ;;  %1829 = vmatpush.bf16.msrb.mxu2 %v6728_v39  ;;  %v6788_v12 = vld [vmem:[#allocation94_spill] sm:$0xff]  ;;  %v6789_v39 = vld [vmem:[#allocation20_spill] sm:$0xff] }
 0x2fb   :  { %1791 = vmatpush.bf16.msra.mxu3 %v6729_v3  ;;  %1804 = vmatpush.bf16.msra.mxu0 %v6730_v45  ;;  %v6790_v3 = vld [vmem:[#allocation21_spill] sm:$0xff]  ;;  %v6791_v45 = vld [vmem:[#allocation95_spill] sm:$0xff] }
 0x2fd   :  { %1817 = vmatpush.bf16.msra.mxu1 %v6731_v47  ;;  %1830 = vmatpush.bf16.msrb.mxu2 %v6732_v4  ;;  %v6792_v47 = vld [vmem:[#allocation98_spill] sm:$0xff]  ;;  %v6793_v4 = vld [vmem:[#allocation13_spill] sm:$0xff] }
 0x2ff   :  { %1792 = vmatpush.bf16.msra.mxu3 %v6733_v55  ;;  %1805 = vmatpush.bf16.msra.mxu0 %v6734_v59  ;;  %v6794_v55 = vld [vmem:[#allocation35_spill] sm:$0xff] }
 0x300   :  { %v6795_v59 = vld [vmem:[#allocation23_spill] sm:$0xff] }
 0x301   :  { %1818 = vmatpush.bf16.msra.mxu1 %v6785_v7  ;;  %1831 = vmatpush.bf16.msrb.mxu2 %v6786_v32  ;;  %v6796_v7 = vld [vmem:[#allocation24_spill] sm:$0xff]  ;;  %v6797_v32 = vld [vmem:[#allocation14_spill] sm:$0xff] }
 0x303   :  { %1793 = vmatpush.bf16.msra.mxu3 %v6787_v56  ;;  %1806 = vmatpush.bf16.msra.mxu0 %v6788_v12  ;;  %v6798_v56 = vld [vmem:[#allocation37_spill] sm:$0xff] }
 0x304   :  { %v6799_v12 = vld [vmem:[#allocation25_spill] sm:$0xff] }
 0x305   :  { %1819 = vmatpush.bf16.msra.mxu1 %v6791_v45  ;;  %1832 = vmatpush.bf16.msrb.mxu2 %v6792_v47  ;;  %v6802_v45 = vld [vmem:[#allocation39_spill] sm:$0xff] }
 0x306   :  { %v6803_v47 = vld [vmem:[#allocation27_spill] sm:$0xff] }
 0x307   :  { %1842 = vmatpush.bf16.msrb.mxu3 %v6789_v39  ;;  %1855 = vmatpush.bf16.msrb.mxu0 %v6790_v3  ;;  %v6800_v39 = vld [vmem:[#allocation26_spill] sm:$0xff]  ;;  %v6801_v3 = vld [vmem:[#allocation15_spill] sm:$0xff] }
 0x309   :  { %1868 = vmatpush.bf16.msrb.mxu1 %v6793_v4  ;;  %1881 = vmatpush.bf16.msra.mxu2 %v6794_v55  ;;  %v6804_v4 = vld [vmem:[#allocation28_spill] sm:$0xff] }
 0x30a   :  { %v6805_v55 = vld [vmem:[#allocation16_spill] sm:$0xff] }
 0x30b   :  { %1843 = vmatpush.bf16.msrb.mxu3 %v6795_v59  ;;  %1856 = vmatpush.bf16.msrb.mxu0 %v6796_v7  ;;  %v6806_v59 = vld [vmem:[#allocation40_spill] sm:$0xff]  ;;  %v6807_v7 = vld [vmem:[#allocation29_spill] sm:$0xff] }
 0x30d   :  { %1869 = vmatpush.bf16.msrb.mxu1 %v6797_v32  ;;  %1882 = vmatpush.bf16.msra.mxu2 %v6798_v56  ;;  %v6808_v32 = vld [vmem:[#allocation30_spill] sm:$0xff]  ;;  %v6809_v56 = vld [vmem:[#allocation17_spill] sm:$0xff] }
 0x30f   :  { %1844 = vmatpush.bf16.msrb.mxu3 %v6799_v12  ;;  %1857 = vmatpush.bf16.msrb.mxu0 %v6800_v39  ;;  %v6810_v12 = vld [vmem:[#allocation41_spill] sm:$0xff]  ;;  %v6811_v39 = vld [vmem:[#allocation31_spill] sm:$0xff] }
 0x311   :  { %1870 = vmatpush.bf16.msrb.mxu1 %v6801_v3  ;;  %1883 = vmatpush.bf16.msra.mxu2 %v6802_v45  ;;  %v6812_v3 = vld [vmem:[#allocation32_spill] sm:$0xff]  ;;  %v6813_v45 = vld [vmem:[#allocation18_spill] sm:$0xff] }
 0x313   :  { %1845 = vmatpush.bf16.msrb.mxu3 %v6803_v47  ;;  %1858 = vmatpush.bf16.msrb.mxu0 %v6804_v4  ;;  %v6814_v47 = vld [vmem:[#allocation42_spill] sm:$0xff]  ;;  %v6815_v4 = vld [vmem:[#allocation33_spill] sm:$0xff] }
 0x315   :  { %1871 = vmatpush.bf16.msrb.mxu1 %v6805_v55  ;;  %1884 = vmatpush.bf16.msra.mxu2 %v6806_v59  ;;  %v6816_v55 = vld [vmem:[#allocation36_spill] sm:$0xff]  ;;  %v6817_v59 = vld [vmem:[#allocation19_spill] sm:$0xff] }
 0x317   :  { %1846 = vmatpush.bf16.msrb.mxu3 %v6807_v7  ;;  %1859 = vmatpush.bf16.msrb.mxu0 %v6808_v32  ;;  %v6818_v7 = vld [vmem:[#allocation43_spill] sm:$0xff]  ;;  %v6819_v32 = vld [vmem:[#allocation34_spill] sm:$0xff] }
 0x319   :  { %1872 = vmatpush.bf16.msrb.mxu1 %v6809_v56  ;;  %1885 = vmatpush.bf16.msra.mxu2 %v6810_v12  ;;  %v6820_v56 = vld [vmem:[#allocation38_spill] sm:$0xff] }
 0x31a   :  { %v6821_v12 = vld [vmem:[#allocation22_spill] sm:$0xff] }
 0x31b   :  { %1847 = vmatpush.bf16.msrb.mxu3 %v6811_v39  ;;  %1860 = vmatpush.bf16.msrb.mxu0 %v6812_v3  ;;  %v6822_v39 = vld [vmem:[#allocation44_spill] sm:$0xff] }
 0x31d   :  { %1873 = vmatpush.bf16.msrb.mxu1 %v6813_v45  ;;  %1886 = vmatpush.bf16.msra.mxu2 %v6814_v47 }
 0x31f   :  { %1848 = vmatpush.bf16.msrb.mxu3 %v6815_v4  ;;  %1861 = vmatpush.bf16.msrb.mxu0 %v6816_v55 }
 0x321   :  { %1874 = vmatpush.bf16.msrb.mxu1 %v6817_v59  ;;  %1887 = vmatpush.bf16.msra.mxu2 %v6818_v7 }
 0x323   :  { %1849 = vmatpush.bf16.msrb.mxu3 %v6819_v32  ;;  %1862 = vmatpush.bf16.msrb.mxu0 %v6820_v56  ;;  %v6824_v32 = vld [vmem:[#allocation53_spill] sm:$0xff] }
 0x325   :  { %1875 = vmatpush.bf16.msrb.mxu1 %v6821_v12  ;;  %1888 = vmatpush.bf16.msra.mxu2 %v6822_v39  ;;  %v6825_v12 = vld [vmem:[#allocation50_spill] sm:$0xff] }
 0x342   :  { %v1512_v3 = vpop.f32.mrf.mxu0 }
 0x343   :  { %v1525_v45 = vpop.f32.mrf.mxu1 }
 0x348   :  { %v1499_v1 = vpop.f32.mrf.mxu3 }
 0x349   :  { %v5469_v47 = vpop.f32.mrf.mxu2 }
 0x34a   :  { %v1514_v4 = vpop.f32.mrf.mxu0 }
 0x34b   :  { %v1527_v23 = vpop.f32.mrf.mxu1 }
 0x350   :  { %v1501_v55 = vpop.f32.mrf.mxu3 }
 0x351   :  { %v1540_v2 = vpop.f32.mrf.mxu2 }
 0x352   :  { %v1568_v59 = vpop.f32.mrf.mxu0 }
 0x353   :  { %v1599_v7 = vadd.f32 %v1568_v59, %v6823_v15  ;;  %v1581_v18 = vpop.f32.mrf.mxu1 }
 0x354   :  { %v1600_v13 = vadd.f32 %v1581_v18, %v6824_v32 }
 0x355   :  { %v3976_v56 = vmul.f32 -1.442695, %v1599_v7  ;;  %v6826_v7 = vld [vmem:[#allocation47_spill] sm:$0xff] }
 0x356   :  { %v3977_v14 = vmul.f32 -1.442695, %v1600_v13  ;;  %v1513_v13 = vadd.f32 %v1512_v3, %v6826_v7 }
 0x357   :  { %4188 = vpow2.f32 %v3976_v56 }
 0x358   :  { %4190 = vpow2.f32 %v3977_v14  ;;  %v1555_v39 = vpop.f32.mrf.mxu3 }
 0x359   :  { %v1598_v46 = vadd.f32 %v1555_v39, %v6825_v12  ;;  %v1594_v48 = vpop.f32.mrf.mxu2 }
 0x35a   :  { %v1570_v31 = vpop.f32.mrf.mxu0  ;;  %v1601_v40 = vadd.f32 %v1594_v48, %v6829_v5 }
 0x35b   :  { %v3975_v11 = vmul.f32 -1.442695, %v1598_v46  ;;  %v1583_v4 = vpop.f32.mrf.mxu1  ;;  %v6827_v46 = vld [vmem:[#allocation49_spill] sm:$0xff] }
 0x35c   :  { %v1500_v4 = vadd.f32 %v1499_v1, %v6827_v46 }
 0x35d   :  { %v4189_v23 = vpop.eup %4188  ;;  %4192 = vpow2.f32 %v3975_v11 }
 0x35e   :  { %v4191_v55 = vpop.eup %4190  ;;  %v1612_v2 = vadd.f32 1.0, %v4189_v23 }
 0x35f   :  { %v5474_v15 = vadd.f32 1.0, %v4191_v55 }
 0x360   :  { %4194 = vrcp.f32 %v1612_v2  ;;  %v1557_v59 = vpop.f32.mrf.mxu3  ;;  %vm1634_vm14 = vweird.f32 %v1612_v2 }
 0x361   :  { %v1596_v18 = vpop.f32.mrf.mxu2  ;;  %4196 = vrcp.f32 %v5474_v15  ;;  %vm1649_vm6 = vweird.f32 %v5474_v15 }
 0x363   :  { %v4193_v32 = vpop.eup %4192  ;;  %v1688_v14 = vpop.f32.mrf.mxu0 }
 0x364   :  { %v1611_v56 = vadd.f32 1.0, %v4193_v32  ;;  %v1719_v28 = vadd.f32 %v1688_v14, %v1513_v13  ;;  %v6828_v14 = vld [vmem:[#allocation46_spill] sm:$0xff] }
 0x365   :  { %v1701_v12 = vpop.f32.mrf.mxu1  ;;  %v1526_v22 = vadd.f32 %v1525_v45, %v6828_v14 }
 0x366   :  { %v4195_v31 = vpop.eup %4194  ;;  %4198 = vrcp.f32 %v1611_v56  ;;  %v3979_v11 = vmul.f32 -1.442695, %v1719_v28  ;;  %v1625_v5 = vand.u32 2147483648, %v1611_v56  ;;  %v1623_v48 = vand.u32 2147483647, %v1611_v56 }
 0x367   :  { %v1630_v39 = vmul.f32 %v4195_v31, %v1612_v2  ;;  %v5481_v3 = vpop.eup %4196  ;;  %vm1635_vm13 = vweird.f32 %v4195_v31  ;;  %vm1619_vm1 = vweird.f32 %v1611_v56 }
 0x368   :  { %4200 = vpow2.f32 %v3979_v11  ;;  %v1645_v11 = vmul.f32 %v5481_v3, %v5474_v15  ;;  %vm5487_vm15 = vmor %vm1634_vm14, %vm1635_vm13  ;;  %vm1624_vm4 = vcmp.eq.f32.partialorder %v1623_v48, 8.507059e+37  ;;  %vm1650_vm5 = vweird.f32 %v5481_v3 }
 0x369   :  { %v1631_v23 = vsub.f32 1.0, %v1630_v39  ;;  %v1675_v55 = vpop.f32.mrf.mxu3  ;;  %v1640_v39 = vand.u32 2147483648, %v1612_v2  ;;  %vm1651_vm7 = vmor %vm1649_vm6, %vm1650_vm5 }
 0x36a   :  { %v1718_v59 = vadd.f32 %v1675_v55, %v1500_v4  ;;  %v1720_v4 = vadd.f32 %v1701_v12, %v1526_v22  ;;  %v1646_v12 = vsub.f32 1.0, %v1645_v11 }
 0x36b   :  { %v5479_v18 = vpop.f32.mrf.mxu2  ;;  %v1632_v7 = vmul.f32 %v4195_v31, %v1631_v23  ;;  %v1690_v32 = vpop.f32.mrf.mxu0 }
 0x36c   :  { %v4199_v13 = vpop.eup %4198  ;;  %v3978_v38 = vmul.f32 -1.442695, %v1718_v59  ;;  %v1638_v32 = vand.u32 2147483647, %v1612_v2  ;;  %v3980_v59 = vmul.f32 -1.442695, %v1720_v4 }
 0x36d   :  { %v1703_v27 = vpop.f32.mrf.mxu1  ;;  %v1615_v28 = vmul.f32 %v4199_v13, %v1611_v56  ;;  %v1633_v1 = vadd.f32 %v4195_v31, %v1632_v7  ;;  %vm1620_vm0 = vweird.f32 %v4199_v13 }
 0x36e   :  { %4202 = vpow2.f32 %v3978_v38  ;;  %v4201_v55 = vpop.eup %4200  ;;  %v1641_v38 = vor.u32 1.1754944e-38, %v1640_v39  ;;  %vm1639_vm2 = vcmp.eq.f32.partialorder %v1638_v32, 8.507059e+37  ;;  %vm1621_vm3 = vmor %vm1619_vm1, %vm1620_vm0  ;;  %v1653_v32 = vand.u32 2147483647, %v5474_v15 }
 0x36f   :  { %v1616_v23 = vsub.f32 1.0, %v1615_v28  ;;  %4204 = vtanh.f32 %v1601_v40  ;;  %v5491_v27 = vadd.f32 1.0, %v4201_v55  ;;  %v1637_v7 = vsel %vm5487_vm15, %v4195_v31, %v1633_v1 }
 0x370   :  { %v1626_v40 = vor.u32 1.1754944e-38, %v1625_v5  ;;  %v1642_v55 = vsel %vm1639_vm2, %v1641_v38, %v1637_v7  ;;  %v1647_v31 = vmul.f32 %v5481_v3, %v1646_v12  ;;  %vm1654_vm8 = vcmp.eq.f32.partialorder %v1653_v32, 8.507059e+37 }
 0x371   :  { %v1617_v45 = vmul.f32 %v4199_v13, %v1616_v23  ;;  %v1677_v22 = vpop.f32.mrf.mxu3  ;;  %4206 = vrcp.f32 %v5491_v27  ;;  %v1660_v1 = vmul.f32 %v1642_v55, %v5333_v43  ;;  %vm1754_vm13 = vweird.f32 %v5491_v27 }
 0x372   :  { %4208 = vpow2.f32 %v3980_v59  ;;  %v1648_v4 = vadd.f32 %v5481_v3, %v1647_v31 }
 0x373   :  { %v1716_v28 = vpop.f32.mrf.mxu2  ;;  %v1618_v2 = vadd.f32 %v4199_v13, %v1617_v45 }
 0x374   :  { %v4203_v14 = vpop.eup %4202  ;;  %v1652_v5 = vsel %vm1651_vm7, %v5481_v3, %v1648_v4  ;;  %v1758_v4 = vand.u32 2147483647, %v5491_v27 }
 0x375   :  { %v1622_v23 = vsel %vm1621_vm3, %v4199_v13, %v1618_v2  ;;  %v1731_v17 = vadd.f32 1.0, %v4203_v14  ;;  %v4205_v41 = vpop.eup %4204  ;;  %v1655_v13 = vand.u32 2147483648, %v5474_v15  ;;  %v1539_v15 = vadd.f32 %v5469_v47, %v5345_v6 }
 0x376   :  { %v1627_v46 = vsel %vm1624_vm4, %v1626_v40, %v1622_v23  ;;  %vm1759_vm0 = vcmp.eq.f32.partialorder %v1758_v4, 8.507059e+37  ;;  %v6843_v4 = vld [vmem:[#allocation66_spill] sm:$0xff] }
 0x377   :  { %v1661_v39 = vmul.f32 %v4205_v41, %v1627_v46  ;;  %4210 = vrcp.f32 %v1731_v17  ;;  %v5498_v56 = vpop.eup %4206  ;;  %v1656_v48 = vor.u32 1.1754944e-38, %v1655_v13  ;;  %v1721_v3 = vadd.f32 %v5479_v18, %v1539_v15  ;;  %v6840_v18 = vld [vmem:[#allocation62_spill] sm:$0xff] }
 0x378   :  { %v4209_v14 = vpop.eup %4208  ;;  %v1750_v41 = vmul.f32 %v5498_v56, %v5491_v27  ;;  %v1745_v31 = vand.u32 2147483648, %v1731_v17  ;;  %vm1755_vm10 = vweird.f32 %v5498_v56  ;;  %vm1739_vm11 = vweird.f32 %v1731_v17 }
 0x379   :  { %v5500_v11 = vadd.f32 %v1661_v39, %v1660_v1  ;;  %v5511_v22 = vadd.f32 1.0, %v4209_v14  ;;  %v1657_v59 = vsel %vm1654_vm8, %v1656_v48, %v1652_v5  ;;  %v1743_v46 = vand.u32 2147483647, %v1731_v17  ;;  %vm1756_vm14 = vmor %vm1754_vm13, %vm1755_vm10 }
 0x37a   :  { %v1751_v7 = vsub.f32 1.0, %v1750_v41  ;;  %v1760_v1 = vand.u32 2147483648, %v5491_v27  ;;  %v1746_v13 = vor.u32 1.1754944e-38, %v1745_v31  ;;  %v6836_v31 = vld [vmem:[#allocation56_spill] sm:$0xff] }
 0x37b   :  { %4212 = vtanh.f32 %v5500_v11  ;;  %vm1744_vm15 = vcmp.eq.f32.partialorder %v1743_v46, 8.507059e+37  ;;  %vm1769_vm2 = vweird.f32 %v5511_v22  ;;  %v6837_v46 = vld [vmem:[#allocation57_spill] sm:$0xff] }
 0x37c   :  { %v1752_v55 = vmul.f32 %v5498_v56, %v1751_v7  ;;  %4214 = vrcp.f32 %v5511_v22  ;;  %v1761_v32 = vor.u32 1.1754944e-38, %v1760_v1  ;;  %v6839_v1 = vld [vmem:[#allocation60_spill] sm:$0xff] }
 0x37d   :  { %v4211_v43 = vpop.eup %4210  ;;  %4216 = vtanh.f32 %v1721_v3 }
 0x37e   :  { %v1735_v45 = vmul.f32 %v4211_v43, %v1731_v17  ;;  %vm1740_vm9 = vweird.f32 %v4211_v43  ;;  %v1753_v47 = vadd.f32 %v5498_v56, %v1752_v55  ;;  %v6834_v55 = vld [vmem:[#allocation127_spill] sm:$0xff] }
 0x37f   :  { %vm5523_vm12 = vmor %vm1739_vm11, %vm1740_vm9 }
 0x380   :  { %v1736_v38 = vsub.f32 1.0, %v1735_v45  ;;  %v1757_v14 = vsel %vm1756_vm14, %v5498_v56, %v1753_v47  ;;  %v6838_v47 = vld [vmem:[#allocation58_spill] sm:$0xff] }
 0x381   :  { %v4213_v12 = vpop.eup %4212 }
 0x382   :  { %v1664_v28 = vmul.f32 %v4213_v12, %v1657_v59  ;;  %v1737_v2 = vmul.f32 %v4211_v43, %v1736_v38  ;;  %v4215_v39 = vpop.eup %4214  ;;  %v1775_v12 = vand.u32 2147483648, %v5511_v22  ;;  %v1773_v59 = vand.u32 2147483647, %v5511_v22 }
 0x383   :  { %v1765_v41 = vmul.f32 %v4215_v39, %v5511_v22  ;;  %v4217_v27 = vpop.eup %4216  ;;  %vm1770_vm1 = vweird.f32 %v4215_v39 }
 0x384   :  { %v1785_v40 = vpack.c.bf16 %v1664_v28, %v1664_v28  ;;  %v1738_v23 = vadd.f32 %v4211_v43, %v1737_v2  ;;  %vm1771_vm3 = vmor %vm1769_vm2, %vm1770_vm1  ;;  %v1776_v15 = vor.u32 1.1754944e-38, %v1775_v12  ;;  %vm1774_vm4 = vcmp.eq.f32.partialorder %v1773_v59, 8.507059e+37  ;;  %v6856_v12 = vld [vmem:[#allocation84_spill] sm:$0xff]  ;;  %v6857_v59 = vld [vmem:[#allocation85_spill] sm:$0xff] }
 0x385   :  { %v1766_v56 = vsub.f32 1.0, %v1765_v41  ;;  %v6847_v41 = vld [vmem:[#allocation70_spill] sm:$0xff] }
 0x386   :  { %1794 = vmatmul.bf16.vlgmr.msra.gmra.mxu3 %v1785_v40  ;;  %1807 = vmatmul.bf16.vlgmr.msra.gmra.mxu0 %v1785_v40  ;;  %v1742_v17 = vsel %vm5523_vm12, %v4211_v43, %v1738_v23  ;;  %v1762_v43 = vsel %vm1759_vm0, %v1761_v32, %v1757_v14  ;;  %v6835_v23 = vld [vmem:[#allocation55_spill] sm:$0xff]  ;;  %v6845_v14 = vld [vmem:[#allocation68_spill] sm:$0xff]  ;;  %v6846_v32 = vld [vmem:[#allocation69_spill] sm:$0xff] }
 0x387   :  { %1820 = vmatmul.bf16.vlgmr.msra.gmra.mxu1 %v1785_v40  ;;  %1833 = vmatmul.bf16.vlgmr.msrb.gmra.mxu2 %v1785_v40  ;;  %v1747_v5 = vsel %vm1744_vm15, %v1746_v13, %v1742_v17  ;;  %v1780_v48 = vmul.f32 %v1762_v43, %v5379_v37  ;;  %v1767_v38 = vmul.f32 %v4215_v39, %v1766_v56  ;;  %v6842_v17 = vld [vmem:[#allocation64_spill] sm:$0xff]  ;;  %v6844_v13 = vld [vmem:[#allocation67_spill] sm:$0xff]  ;;  %v6852_v56 = vld [vmem:[#allocation78_spill] sm:$0xff] }
 0x388   :  { %1962 = vmatpush.bf16.msra.mxu3 %v5110_v20  ;;  %1975 = vmatpush.bf16.msra.mxu0 %v5112_v57  ;;  %v1781_v45 = vmul.f32 %v4217_v27, %v1747_v5  ;;  %v6848_v5 = vld [vmem:[#allocation72_spill] sm:$0xff]  ;;  %v6849_v27 = vld [vmem:[#allocation73_spill] sm:$0xff] }
 0x389   :  { %1988 = vmatpush.bf16.msra.mxu1 %v6759_v51  ;;  %2001 = vmatpush.bf16.msrb.mxu2 %v6760_v26  ;;  %v1768_v37 = vadd.f32 %v4215_v39, %v1767_v38  ;;  %v6850_v43 = vld [vmem:[#allocation76_spill] sm:$0xff] }
 0x38a   :  { %v5546_v7 = vadd.f32 %v1781_v45, %v1780_v48  ;;  %v6851_v45 = vld [vmem:[#allocation77_spill] sm:$0xff]  ;;  %v6853_v48 = vld [vmem:[#allocation79_spill] sm:$0xff]  ;;  %v6854_v38 = vld [vmem:[#allocation80_spill] sm:$0xff] }
 0x38b   :  { %v1772_v28 = vsel %vm1771_vm3, %v4215_v39, %v1768_v37  ;;  %v6841_v39 = vld [vmem:[#allocation63_spill] sm:$0xff]  ;;  %v6855_v37 = vld [vmem:[#allocation82_spill] sm:$0xff] }
 0x38c   :  { %1963 = vmatpush.bf16.msra.mxu3 %v6761_v50  ;;  %1976 = vmatpush.bf16.msra.mxu0 %v6762_v60  ;;  %4218 = vtanh.f32 %v5546_v7 }
 0x38d   :  { %1989 = vmatpush.bf16.msra.mxu1 %v6763_v63  ;;  %2002 = vmatpush.bf16.msrb.mxu2 %v6764_v58 }
 0x390   :  { %1964 = vmatpush.bf16.msra.mxu3 %v6765_v35  ;;  %1977 = vmatpush.bf16.msra.mxu0 %v6766_v0 }
 0x391   :  { %1990 = vmatpush.bf16.msra.mxu1 %v5142_v24  ;;  %2003 = vmatpush.bf16.msrb.mxu2 %v6767_v16 }
 0x392   :  { %v4219_v2 = vpop.eup %4218 }
 0x394   :  { %1965 = vmatpush.bf16.msra.mxu3 %v6768_v53  ;;  %1978 = vmatpush.bf16.msra.mxu0 %v6769_v34 }
 0x395   :  { %1991 = vmatpush.bf16.msra.mxu1 %v6770_v9  ;;  %2004 = vmatpush.bf16.msrb.mxu2 %v6771_v62 }
 0x396   :  { %1850 = vmatmul.bf16.vlgmr.msrb.gmra.mxu3 %v1785_v40  ;;  %1863 = vmatmul.bf16.vlgmr.msrb.gmra.mxu0 %v1785_v40 }
 0x397   :  { %1876 = vmatmul.bf16.vlgmr.msrb.gmra.mxu1 %v1785_v40  ;;  %1889 = vmatmul.bf16.vlgmr.msra.gmra.mxu2 %v1785_v40  ;;  %v1777_v40 = vsel %vm1774_vm4, %v1776_v15, %v1772_v28  ;;  %v6858_v28 = vld [vmem:[#allocation86_spill] sm:$0xff]  ;;  %v6860_v15 = vld [vmem:[#allocation89_spill] sm:$0xff] }
 0x398   :  { %1966 = vmatpush.bf16.msra.mxu3 %v6772_v33  ;;  %1979 = vmatpush.bf16.msra.mxu0 %v6773_v44  ;;  %v1784_v22 = vmul.f32 %v4219_v2, %v1777_v40  ;;  %v6859_v2 = vld [vmem:[#allocation88_spill] sm:$0xff]  ;;  %v6861_v40 = vld [vmem:[#allocation90_spill] sm:$0xff] }
 0x399   :  { %1992 = vmatpush.bf16.msra.mxu1 %v6774_v36  ;;  %2005 = vmatpush.bf16.msrb.mxu2 %v6775_v42 }
 0x39a   :  { %v1961_v3 = vpack.c.bf16 %v1784_v22, %v1784_v22  ;;  %v6862_v22 = vld [vmem:[#allocation91_spill] sm:$0xff] }
 0x39c   :  { %1967 = vmatpush.bf16.msra.mxu3 %v6776_v29  ;;  %1980 = vmatpush.bf16.msra.mxu0 %v6777_v19 }
 0x39d   :  { %1993 = vmatpush.bf16.msra.mxu1 %v5182_v52  ;;  %2006 = vmatpush.bf16.msrb.mxu2 %v5184_v30 }
 0x3a0   :  { %1968 = vmatpush.bf16.msra.mxu3 %v5188_v25  ;;  %1981 = vmatpush.bf16.msra.mxu0 %v5190_v49 }
 0x3a1   :  { %1994 = vmatpush.bf16.msra.mxu1 %v5194_v10  ;;  %2007 = vmatpush.bf16.msrb.mxu2 %v5196_v54 }
 0x3a4   :  { %1969 = vmatpush.bf16.msra.mxu3 %v5200_v8  ;;  %1982 = vmatpush.bf16.msra.mxu0 %v5202_v61 }
 0x3a5   :  { %1995 = vmatpush.bf16.msra.mxu1 %v5206_v21  ;;  %2008 = vmatpush.bf16.msrb.mxu2 %v6834_v55 }
 0x3a7   :  { %1970 = vmatmul.bf16.vlgmr.msra.gmra.mxu3 %v1961_v3  ;;  %1983 = vmatmul.bf16.vlgmr.msra.gmra.mxu0 %v1961_v3 }
 0x3a8   :  { %2082 = vmatpush.bf16.msrb.mxu3 %v6835_v23  ;;  %2095 = vmatpush.bf16.msrb.mxu0 %v6836_v31 }
 0x3a9   :  { %1996 = vmatmul.bf16.vlgmr.msra.gmra.mxu1 %v1961_v3  ;;  %2009 = vmatmul.bf16.vlgmr.msrb.gmra.mxu2 %v1961_v3  ;;  %v6863_v3 = vld [vmem:[#allocation92_spill] sm:$0xff] }
 0x3aa   :  { %2108 = vmatpush.bf16.msrb.mxu1 %v6837_v46  ;;  %2121 = vmatpush.bf16.msra.mxu2 %v6838_v47  ;;  %v6909_v47 = vld [vmem:[#allocation46_spill] sm:$0xff] }
 0x3ac   :  { %2083 = vmatpush.bf16.msrb.mxu3 %v6839_v1  ;;  %2096 = vmatpush.bf16.msrb.mxu0 %v6840_v18 }
 0x3ae   :  { %2109 = vmatpush.bf16.msrb.mxu1 %v6841_v39  ;;  %2122 = vmatpush.bf16.msra.mxu2 %v6842_v17  ;;  %v6904_v17 = vld [vmem:[#allocation54_spill] sm:$0xff] }
 0x3b0   :  { %2084 = vmatpush.bf16.msrb.mxu3 %v6843_v4  ;;  %2097 = vmatpush.bf16.msrb.mxu0 %v6844_v13  ;;  %v6903_v4 = vld [vmem:[#allocation48_spill] sm:$0xff] }
 0x3b1   :  { %v354_v39 = vadd.f32 %v6904_v17, %v6903_v4 }
 0x3b2   :  { %2110 = vmatpush.bf16.msrb.mxu1 %v6845_v14  ;;  %2123 = vmatpush.bf16.msra.mxu2 %v6846_v32 }
 0x3b4   :  { %2085 = vmatpush.bf16.msrb.mxu3 %v6847_v41  ;;  %2098 = vmatpush.bf16.msrb.mxu0 %v6848_v5  ;;  %v6901_v5 = vld [vmem:[#allocation45_spill] sm:$0xff] }
 0x3b6   :  { %2111 = vmatpush.bf16.msrb.mxu1 %v6849_v27  ;;  %2124 = vmatpush.bf16.msra.mxu2 %v6850_v43  ;;  %v6899_v43 = vld [vmem:[#allocation51_spill] sm:$0xff] }
 0x3b8   :  { %2086 = vmatpush.bf16.msrb.mxu3 %v6851_v45  ;;  %2099 = vmatpush.bf16.msrb.mxu0 %v6852_v56 }
 0x3ba   :  { %2112 = vmatpush.bf16.msrb.mxu1 %v6853_v48  ;;  %2125 = vmatpush.bf16.msra.mxu2 %v6854_v38  ;;  %v6864_v48 = vld [vmem:[#allocation94_spill] sm:$0xff]  ;;  %v6865_v38 = vld [vmem:[#allocation20_spill] sm:$0xff] }
 0x3bc   :  { %2087 = vmatpush.bf16.msrb.mxu3 %v6855_v37  ;;  %2100 = vmatpush.bf16.msrb.mxu0 %v6856_v12  ;;  %v6866_v37 = vld [vmem:[#allocation21_spill] sm:$0xff]  ;;  %v6867_v12 = vld [vmem:[#allocation95_spill] sm:$0xff] }
 0x3be   :  { %2113 = vmatpush.bf16.msrb.mxu1 %v6857_v59  ;;  %2126 = vmatpush.bf16.msra.mxu2 %v6858_v28  ;;  %v6868_v59 = vld [vmem:[#allocation98_spill] sm:$0xff]  ;;  %v6869_v28 = vld [vmem:[#allocation13_spill] sm:$0xff] }
 0x3c0   :  { %2088 = vmatpush.bf16.msrb.mxu3 %v6859_v2  ;;  %2101 = vmatpush.bf16.msrb.mxu0 %v6860_v15  ;;  %v6870_v2 = vld [vmem:[#allocation35_spill] sm:$0xff] }
 0x3c1   :  { %v6871_v15 = vld [vmem:[#allocation23_spill] sm:$0xff] }
 0x3c2   :  { %2114 = vmatpush.bf16.msrb.mxu1 %v6861_v40  ;;  %2127 = vmatpush.bf16.msra.mxu2 %v6862_v22  ;;  %v6872_v40 = vld [vmem:[#allocation24_spill] sm:$0xff]  ;;  %v6873_v22 = vld [vmem:[#allocation14_spill] sm:$0xff] }
 0x3c4   :  { %2089 = vmatpush.bf16.msrb.mxu3 %v6863_v3  ;;  %2102 = vmatpush.bf16.msrb.mxu0 %v6864_v48  ;;  %v6874_v3 = vld [vmem:[#allocation37_spill] sm:$0xff] }
 0x3c5   :  { %v6875_v48 = vld [vmem:[#allocation25_spill] sm:$0xff] }
 0x3c6   :  { %2115 = vmatpush.bf16.msrb.mxu1 %v6867_v12  ;;  %2128 = vmatpush.bf16.msra.mxu2 %v6868_v59  ;;  %v6878_v12 = vld [vmem:[#allocation39_spill] sm:$0xff] }
 0x3c7   :  { %v6879_v59 = vld [vmem:[#allocation27_spill] sm:$0xff] }
 0x3c8   :  { %2138 = vmatpush.bf16.msra.mxu3 %v6865_v38  ;;  %2151 = vmatpush.bf16.msra.mxu0 %v6866_v37  ;;  %v6876_v38 = vld [vmem:[#allocation26_spill] sm:$0xff]  ;;  %v6877_v37 = vld [vmem:[#allocation15_spill] sm:$0xff] }
 0x3ca   :  { %2164 = vmatpush.bf16.msra.mxu1 %v6869_v28  ;;  %2177 = vmatpush.bf16.msrb.mxu2 %v6870_v2  ;;  %v6880_v28 = vld [vmem:[#allocation28_spill] sm:$0xff] }
 0x3cb   :  { %v6881_v2 = vld [vmem:[#allocation16_spill] sm:$0xff] }
 0x3cc   :  { %2139 = vmatpush.bf16.msra.mxu3 %v6871_v15  ;;  %2152 = vmatpush.bf16.msra.mxu0 %v6872_v40  ;;  %v6882_v15 = vld [vmem:[#allocation40_spill] sm:$0xff]  ;;  %v6883_v40 = vld [vmem:[#allocation29_spill] sm:$0xff] }
 0x3ce   :  { %2165 = vmatpush.bf16.msra.mxu1 %v6873_v22  ;;  %2178 = vmatpush.bf16.msrb.mxu2 %v6874_v3  ;;  %v6884_v22 = vld [vmem:[#allocation30_spill] sm:$0xff]  ;;  %v6885_v3 = vld [vmem:[#allocation17_spill] sm:$0xff] }
 0x3d0   :  { %2140 = vmatpush.bf16.msra.mxu3 %v6875_v48  ;;  %2153 = vmatpush.bf16.msra.mxu0 %v6876_v38  ;;  %v6886_v48 = vld [vmem:[#allocation41_spill] sm:$0xff]  ;;  %v6887_v38 = vld [vmem:[#allocation31_spill] sm:$0xff] }
 0x3d2   :  { %2166 = vmatpush.bf16.msra.mxu1 %v6877_v37  ;;  %2179 = vmatpush.bf16.msrb.mxu2 %v6878_v12  ;;  %v6888_v37 = vld [vmem:[#allocation32_spill] sm:$0xff]  ;;  %v6889_v12 = vld [vmem:[#allocation18_spill] sm:$0xff] }
 0x3d4   :  { %2141 = vmatpush.bf16.msra.mxu3 %v6879_v59  ;;  %2154 = vmatpush.bf16.msra.mxu0 %v6880_v28  ;;  %v6890_v59 = vld [vmem:[#allocation42_spill] sm:$0xff]  ;;  %v6891_v28 = vld [vmem:[#allocation33_spill] sm:$0xff] }
 0x3d6   :  { %2167 = vmatpush.bf16.msra.mxu1 %v6881_v2  ;;  %2180 = vmatpush.bf16.msrb.mxu2 %v6882_v15  ;;  %v6892_v2 = vld [vmem:[#allocation36_spill] sm:$0xff]  ;;  %v6893_v15 = vld [vmem:[#allocation19_spill] sm:$0xff] }
 0x3d8   :  { %2142 = vmatpush.bf16.msra.mxu3 %v6883_v40  ;;  %2155 = vmatpush.bf16.msra.mxu0 %v6884_v22  ;;  %v6894_v40 = vld [vmem:[#allocation43_spill] sm:$0xff]  ;;  %v6895_v22 = vld [vmem:[#allocation34_spill] sm:$0xff] }
 0x3da   :  { %2168 = vmatpush.bf16.msra.mxu1 %v6885_v3  ;;  %2181 = vmatpush.bf16.msrb.mxu2 %v6886_v48  ;;  %v6896_v3 = vld [vmem:[#allocation38_spill] sm:$0xff] }
 0x3db   :  { %v6897_v48 = vld [vmem:[#allocation22_spill] sm:$0xff] }
 0x3dc   :  { %2143 = vmatpush.bf16.msra.mxu3 %v6887_v38  ;;  %2156 = vmatpush.bf16.msra.mxu0 %v6888_v37  ;;  %v6898_v38 = vld [vmem:[#allocation44_spill] sm:$0xff] }
 0x3de   :  { %2169 = vmatpush.bf16.msra.mxu1 %v6889_v12  ;;  %2182 = vmatpush.bf16.msrb.mxu2 %v6890_v59 }
 0x3e0   :  { %2144 = vmatpush.bf16.msra.mxu3 %v6891_v28  ;;  %2157 = vmatpush.bf16.msra.mxu0 %v6892_v2 }
 0x3e2   :  { %2170 = vmatpush.bf16.msra.mxu1 %v6893_v15  ;;  %2183 = vmatpush.bf16.msrb.mxu2 %v6894_v40  ;;  %v6900_v15 = vld [vmem:[#allocation59_spill] sm:$0xff] }
 0x3e3   :  { %v383_v27 = vadd.f32 %v6900_v15, %v6899_v43 }
 0x3e4   :  { %2145 = vmatpush.bf16.msra.mxu3 %v6895_v22  ;;  %2158 = vmatpush.bf16.msra.mxu0 %v6896_v3  ;;  %v6902_v22 = vld [vmem:[#allocation61_spill] sm:$0xff] }
 0x3e5   :  { %v412_v41 = vadd.f32 %v6902_v22, %v6901_v5 }
 0x3e6   :  { %2171 = vmatpush.bf16.msra.mxu1 %v6897_v48  ;;  %2184 = vmatpush.bf16.msrb.mxu2 %v6898_v38 }
 0x403   :  { %v1808_v37 = vpop.f32.mrf.mxu0 }
 0x404   :  { %v1821_v12 = vpop.f32.mrf.mxu1 }
 0x405   :  { %v1822_v46 = vadd.f32 %v1821_v12, %v6909_v47 }
 0x409   :  { %v1795_v56 = vpop.f32.mrf.mxu3 }
 0x40a   :  { %v5636_v59 = vpop.f32.mrf.mxu2 }
 0x40b   :  { %v1810_v28 = vpop.f32.mrf.mxu0 }
 0x40c   :  { %v1823_v45 = vpop.f32.mrf.mxu1 }
 0x411   :  { %v1797_v2 = vpop.f32.mrf.mxu3 }
 0x412   :  { %v1836_v40 = vpop.f32.mrf.mxu2 }
 0x413   :  { %v1864_v3 = vpop.f32.mrf.mxu0 }
 0x414   :  { %v1895_v32 = vadd.f32 %v1864_v3, %v383_v27  ;;  %v1877_v48 = vpop.f32.mrf.mxu1 }
 0x415   :  { %v1896_v14 = vadd.f32 %v1877_v48, %v412_v41 }
 0x416   :  { %v3982_v38 = vmul.f32 -1.442695, %v1895_v32  ;;  %v6905_v32 = vld [vmem:[#allocation47_spill] sm:$0xff] }
 0x417   :  { %v3983_v13 = vmul.f32 -1.442695, %v1896_v14  ;;  %v1809_v48 = vadd.f32 %v1808_v37, %v6905_v32 }
 0x418   :  { %4220 = vpow2.f32 %v3982_v38 }
 0x419   :  { %4222 = vpow2.f32 %v3983_v13  ;;  %v1851_v45 = vpop.f32.mrf.mxu3 }
 0x41a   :  { %v1894_v28 = vadd.f32 %v1851_v45, %v354_v39  ;;  %v1890_v2 = vpop.f32.mrf.mxu2 }
 0x41b   :  { %v1866_v18 = vpop.f32.mrf.mxu0 }
 0x41c   :  { %v3981_v15 = vmul.f32 -1.442695, %v1894_v28  ;;  %v1879_v40 = vpop.f32.mrf.mxu1 }
 0x41e   :  { %v4221_v43 = vpop.eup %4220  ;;  %4224 = vpow2.f32 %v3981_v15  ;;  %v6906_v15 = vld [vmem:[#allocation49_spill] sm:$0xff] }
 0x41f   :  { %v4223_v22 = vpop.eup %4222  ;;  %v1908_v5 = vadd.f32 1.0, %v4221_v43  ;;  %v1796_v43 = vadd.f32 %v1795_v56, %v6906_v15 }
 0x420   :  { %v5644_v41 = vadd.f32 1.0, %v4223_v22 }
 0x421   :  { %4226 = vrcp.f32 %v1908_v5  ;;  %v1853_v27 = vpop.f32.mrf.mxu3  ;;  %vm1930_vm6 = vweird.f32 %v1908_v5 }
 0x422   :  { %v1892_v14 = vpop.f32.mrf.mxu2  ;;  %4228 = vrcp.f32 %v5644_v41  ;;  %v6907_v27 = vld [vmem:[#allocation102_spill] sm:$0xff]  ;;  %vm1945_vm14 = vweird.f32 %v5644_v41 }
 0x423   :  { %v6908_v14 = vld [vmem:[#allocation104_spill] sm:$0xff] }
 0x424   :  { %v4225_v17 = vpop.eup %4224  ;;  %v1984_v38 = vpop.f32.mrf.mxu0  ;;  %v441_v4 = vadd.f32 %v6908_v14, %v6907_v27 }
 0x425   :  { %v1907_v13 = vadd.f32 1.0, %v4225_v17  ;;  %v2015_v3 = vadd.f32 %v1984_v38, %v1809_v48 }
 0x426   :  { %v1997_v39 = vpop.f32.mrf.mxu1  ;;  %v1897_v31 = vadd.f32 %v1890_v2, %v441_v4 }
 0x427   :  { %v4227_v18 = vpop.eup %4226  ;;  %4230 = vrcp.f32 %v1907_v13  ;;  %v3985_v28 = vmul.f32 -1.442695, %v2015_v3  ;;  %v1921_v4 = vand.u32 2147483648, %v1907_v13  ;;  %v1919_v2 = vand.u32 2147483647, %v1907_v13 }
 0x428   :  { %v1926_v45 = vmul.f32 %v4227_v18, %v1908_v5  ;;  %v5653_v17 = vpop.eup %4228  ;;  %vm1931_vm5 = vweird.f32 %v4227_v18  ;;  %vm1915_vm9 = vweird.f32 %v1907_v13 }
 0x429   :  { %4232 = vpow2.f32 %v3985_v28  ;;  %v1936_v28 = vand.u32 2147483648, %v1908_v5  ;;  %v1941_v14 = vmul.f32 %v5653_v17, %v5644_v41  ;;  %vm5658_vm7 = vmor %vm1930_vm6, %vm1931_vm5  ;;  %vm1920_vm12 = vcmp.eq.f32.partialorder %v1919_v2, 8.507059e+37 }
 0x42a   :  { %v1927_v40 = vsub.f32 1.0, %v1926_v45  ;;  %v1971_v22 = vpop.f32.mrf.mxu3  ;;  %vm1946_vm13 = vweird.f32 %v5653_v17 }
 0x42b   :  { %v2014_v37 = vadd.f32 %v1971_v22, %v1796_v43  ;;  %v2016_v43 = vadd.f32 %v1997_v39, %v1822_v46  ;;  %v1937_v39 = vor.u32 1.1754944e-38, %v1936_v28  ;;  %vm1947_vm15 = vmor %vm1945_vm14, %vm1946_vm13 }
 0x42c   :  { %v5651_v32 = vpop.f32.mrf.mxu2  ;;  %v1928_v48 = vmul.f32 %v4227_v18, %v1927_v40  ;;  %v1986_v38 = vpop.f32.mrf.mxu0  ;;  %v1934_v40 = vand.u32 2147483647, %v1908_v5 }
 0x42d   :  { %v4231_v1 = vpop.eup %4230  ;;  %v3984_v3 = vmul.f32 -1.442695, %v2014_v37  ;;  %v1949_v38 = vand.u32 2147483647, %v5644_v41 }
 0x42e   :  { %v1999_v23 = vpop.f32.mrf.mxu1  ;;  %v1911_v56 = vmul.f32 %v4231_v1, %v1907_v13  ;;  %v1929_v45 = vadd.f32 %v4227_v18, %v1928_v48  ;;  %vm1916_vm8 = vweird.f32 %v4231_v1  ;;  %v1942_v48 = vsub.f32 1.0, %v1941_v14 }
 0x42f   :  { %4234 = vpow2.f32 %v3984_v3  ;;  %v4233_v22 = vpop.eup %4232  ;;  %v3986_v3 = vmul.f32 -1.442695, %v2016_v43  ;;  %vm1935_vm10 = vcmp.eq.f32.partialorder %v1934_v40, 8.507059e+37  ;;  %vm1917_vm11 = vmor %vm1915_vm9, %vm1916_vm8  ;;  %vm1950_vm0 = vcmp.eq.f32.partialorder %v1949_v38, 8.507059e+37 }
 0x430   :  { %v1912_v27 = vsub.f32 1.0, %v1911_v56  ;;  %4236 = vtanh.f32 %v1897_v31  ;;  %v5662_v23 = vadd.f32 1.0, %v4233_v22  ;;  %v1933_v37 = vsel %vm5658_vm7, %v4227_v18, %v1929_v45 }
 0x431   :  { %v1922_v31 = vor.u32 1.1754944e-38, %v1921_v4  ;;  %v1938_v22 = vsel %vm1935_vm10, %v1937_v39, %v1933_v37  ;;  %v1943_v18 = vmul.f32 %v5653_v17, %v1942_v48 }
 0x432   :  { %v1913_v12 = vmul.f32 %v4231_v1, %v1912_v27  ;;  %v1973_v46 = vpop.f32.mrf.mxu3  ;;  %4238 = vrcp.f32 %v5662_v23  ;;  %v1956_v28 = vmul.f32 %v1938_v22, %v5500_v11  ;;  %vm2050_vm5 = vweird.f32 %v5662_v23 }
 0x433   :  { %4240 = vpow2.f32 %v3986_v3  ;;  %v1944_v40 = vadd.f32 %v5653_v17, %v1943_v18 }
 0x434   :  { %v2012_v56 = vpop.f32.mrf.mxu2  ;;  %v1914_v5 = vadd.f32 %v4231_v1, %v1913_v12 }
 0x435   :  { %v4235_v47 = vpop.eup %4234  ;;  %v1948_v4 = vsel %vm1947_vm15, %v5653_v17, %v1944_v40  ;;  %v2054_v40 = vand.u32 2147483647, %v5662_v23 }
 0x436   :  { %v1918_v27 = vsel %vm1917_vm11, %v4231_v1, %v1914_v5  ;;  %v2027_v15 = vadd.f32 1.0, %v4235_v47  ;;  %v4237_v55 = vpop.eup %4236  ;;  %v1951_v1 = vand.u32 2147483648, %v5644_v41  ;;  %v1835_v41 = vadd.f32 %v5636_v59, %v5345_v6 }
 0x437   :  { %v1923_v45 = vsel %vm1920_vm12, %v1922_v31, %v1918_v27  ;;  %vm2055_vm8 = vcmp.eq.f32.partialorder %v2054_v40, 8.507059e+37  ;;  %v6923_v40 = vld [vmem:[#allocation66_spill] sm:$0xff] }
 0x438   :  { %v1957_v14 = vmul.f32 %v4237_v55, %v1923_v45  ;;  %4242 = vrcp.f32 %v2027_v15  ;;  %v5669_v13 = vpop.eup %4238  ;;  %v1952_v2 = vor.u32 1.1754944e-38, %v1951_v1  ;;  %v2017_v17 = vadd.f32 %v5651_v32, %v1835_v41  ;;  %v6920_v32 = vld [vmem:[#allocation62_spill] sm:$0xff] }
 0x439   :  { %v4241_v47 = vpop.eup %4240  ;;  %v2046_v11 = vmul.f32 %v5669_v13, %v5662_v23  ;;  %v2041_v18 = vand.u32 2147483648, %v2027_v15  ;;  %vm2051_vm2 = vweird.f32 %v5669_v13  ;;  %vm2035_vm3 = vweird.f32 %v2027_v15 }
 0x43a   :  { %v5671_v43 = vadd.f32 %v1957_v14, %v1956_v28  ;;  %v5682_v46 = vadd.f32 1.0, %v4241_v47  ;;  %v1953_v3 = vsel %vm1950_vm0, %v1952_v2, %v1948_v4  ;;  %v2039_v45 = vand.u32 2147483647, %v2027_v15  ;;  %vm2052_vm6 = vmor %vm2050_vm5, %vm2051_vm2 }
 0x43b   :  { %v2047_v37 = vsub.f32 1.0, %v2046_v11  ;;  %v2056_v28 = vand.u32 2147483648, %v5662_v23  ;;  %v2042_v1 = vor.u32 1.1754944e-38, %v2041_v18  ;;  %v6916_v18 = vld [vmem:[#allocation56_spill] sm:$0xff] }
 0x43c   :  { %4244 = vtanh.f32 %v5671_v43  ;;  %vm2040_vm7 = vcmp.eq.f32.partialorder %v2039_v45, 8.507059e+37  ;;  %vm2065_vm10 = vweird.f32 %v5682_v46  ;;  %v6917_v45 = vld [vmem:[#allocation57_spill] sm:$0xff] }
 0x43d   :  { %v2048_v22 = vmul.f32 %v5669_v13, %v2047_v37  ;;  %4246 = vrcp.f32 %v5682_v46  ;;  %v2057_v38 = vor.u32 1.1754944e-38, %v2056_v28  ;;  %v6919_v28 = vld [vmem:[#allocation60_spill] sm:$0xff] }
 0x43e   :  { %v4243_v55 = vpop.eup %4242  ;;  %4248 = vtanh.f32 %v2017_v17 }
 0x43f   :  { %v2031_v12 = vmul.f32 %v4243_v55, %v2027_v15  ;;  %vm2036_vm1 = vweird.f32 %v4243_v55  ;;  %v2049_v59 = vadd.f32 %v5669_v13, %v2048_v22  ;;  %v6914_v22 = vld [vmem:[#allocation127_spill] sm:$0xff] }
 0x440   :  { %vm5694_vm4 = vmor %vm2035_vm3, %vm2036_vm1 }
 0x441   :  { %v2032_v39 = vsub.f32 1.0, %v2031_v12  ;;  %v2053_v47 = vsel %vm2052_vm6, %v5669_v13, %v2049_v59  ;;  %v6918_v59 = vld [vmem:[#allocation58_spill] sm:$0xff] }
 0x442   :  { %v4245_v48 = vpop.eup %4244 }
 0x443   :  { %v1960_v56 = vmul.f32 %v4245_v48, %v1953_v3  ;;  %v2033_v5 = vmul.f32 %v4243_v55, %v2032_v39  ;;  %v4247_v14 = vpop.eup %4246  ;;  %v2071_v48 = vand.u32 2147483648, %v5682_v46  ;;  %v2069_v3 = vand.u32 2147483647, %v5682_v46 }
 0x444   :  { %v2061_v11 = vmul.f32 %v4247_v14, %v5682_v46  ;;  %v4249_v23 = vpop.eup %4248  ;;  %vm2066_vm9 = vweird.f32 %v4247_v14 }
 0x445   :  { %v2081_v31 = vpack.c.bf16 %v1960_v56, %v1960_v56  ;;  %v2034_v27 = vadd.f32 %v4243_v55, %v2033_v5  ;;  %vm2067_vm11 = vmor %vm2065_vm10, %vm2066_vm9  ;;  %v2072_v41 = vor.u32 1.1754944e-38, %v2071_v48  ;;  %vm2070_vm12 = vcmp.eq.f32.partialorder %v2069_v3, 8.507059e+37  ;;  %v6936_v48 = vld [vmem:[#allocation84_spill] sm:$0xff]  ;;  %v6937_v3 = vld [vmem:[#allocation85_spill] sm:$0xff] }
 0x446   :  { %v2062_v13 = vsub.f32 1.0, %v2061_v11  ;;  %v6927_v11 = vld [vmem:[#allocation70_spill] sm:$0xff] }
 0x447   :  { %2090 = vmatmul.bf16.vlgmr.msrb.gmra.mxu3 %v2081_v31  ;;  %2103 = vmatmul.bf16.vlgmr.msrb.gmra.mxu0 %v2081_v31  ;;  %v2038_v15 = vsel %vm5694_vm4, %v4243_v55, %v2034_v27  ;;  %v2058_v55 = vsel %vm2055_vm8, %v2057_v38, %v2053_v47  ;;  %v6915_v27 = vld [vmem:[#allocation55_spill] sm:$0xff]  ;;  %v6925_v47 = vld [vmem:[#allocation68_spill] sm:$0xff]  ;;  %v6926_v38 = vld [vmem:[#allocation69_spill] sm:$0xff] }
 0x448   :  { %2116 = vmatmul.bf16.vlgmr.msrb.gmra.mxu1 %v2081_v31  ;;  %2129 = vmatmul.bf16.vlgmr.msra.gmra.mxu2 %v2081_v31  ;;  %v2043_v4 = vsel %vm2040_vm7, %v2042_v1, %v2038_v15  ;;  %v2076_v2 = vmul.f32 %v2058_v55, %v5546_v7  ;;  %v2063_v39 = vmul.f32 %v4247_v14, %v2062_v13  ;;  %v6922_v15 = vld [vmem:[#allocation64_spill] sm:$0xff]  ;;  %v6924_v1 = vld [vmem:[#allocation67_spill] sm:$0xff]  ;;  %v6932_v13 = vld [vmem:[#allocation78_spill] sm:$0xff] }
 0x449   :  { %2258 = vmatpush.bf16.msrb.mxu3 %v5110_v20  ;;  %2271 = vmatpush.bf16.msrb.mxu0 %v5112_v57  ;;  %v2077_v12 = vmul.f32 %v4249_v23, %v2043_v4  ;;  %v6928_v4 = vld [vmem:[#allocation72_spill] sm:$0xff]  ;;  %v6929_v23 = vld [vmem:[#allocation73_spill] sm:$0xff] }
 0x44a   :  { %2284 = vmatpush.bf16.msrb.mxu1 %v6759_v51  ;;  %2297 = vmatpush.bf16.msra.mxu2 %v6760_v26  ;;  %v2064_v7 = vadd.f32 %v4247_v14, %v2063_v39  ;;  %v6930_v55 = vld [vmem:[#allocation76_spill] sm:$0xff] }
 0x44b   :  { %v5717_v37 = vadd.f32 %v2077_v12, %v2076_v2  ;;  %v6931_v12 = vld [vmem:[#allocation77_spill] sm:$0xff]  ;;  %v6933_v2 = vld [vmem:[#allocation79_spill] sm:$0xff]  ;;  %v6934_v39 = vld [vmem:[#allocation80_spill] sm:$0xff] }
 0x44c   :  { %v2068_v56 = vsel %vm2067_vm11, %v4247_v14, %v2064_v7  ;;  %v6921_v14 = vld [vmem:[#allocation63_spill] sm:$0xff]  ;;  %v6935_v7 = vld [vmem:[#allocation82_spill] sm:$0xff] }
 0x44d   :  { %2259 = vmatpush.bf16.msrb.mxu3 %v6761_v50  ;;  %2272 = vmatpush.bf16.msrb.mxu0 %v6762_v60  ;;  %4250 = vtanh.f32 %v5717_v37 }
 0x44e   :  { %2285 = vmatpush.bf16.msrb.mxu1 %v6763_v63  ;;  %2298 = vmatpush.bf16.msra.mxu2 %v6764_v58 }
 0x451   :  { %2260 = vmatpush.bf16.msrb.mxu3 %v6765_v35  ;;  %2273 = vmatpush.bf16.msrb.mxu0 %v6766_v0 }
 0x452   :  { %2286 = vmatpush.bf16.msrb.mxu1 %v5142_v24  ;;  %2299 = vmatpush.bf16.msra.mxu2 %v6767_v16 }
 0x453   :  { %v4251_v5 = vpop.eup %4250 }
 0x455   :  { %2261 = vmatpush.bf16.msrb.mxu3 %v6768_v53  ;;  %2274 = vmatpush.bf16.msrb.mxu0 %v6769_v34 }
 0x456   :  { %2287 = vmatpush.bf16.msrb.mxu1 %v6770_v9  ;;  %2300 = vmatpush.bf16.msra.mxu2 %v6771_v62 }
 0x457   :  { %2146 = vmatmul.bf16.vlgmr.msra.gmra.mxu3 %v2081_v31  ;;  %2159 = vmatmul.bf16.vlgmr.msra.gmra.mxu0 %v2081_v31 }
 0x458   :  { %2172 = vmatmul.bf16.vlgmr.msra.gmra.mxu1 %v2081_v31  ;;  %2185 = vmatmul.bf16.vlgmr.msrb.gmra.mxu2 %v2081_v31  ;;  %v2073_v31 = vsel %vm2070_vm12, %v2072_v41, %v2068_v56  ;;  %v6938_v56 = vld [vmem:[#allocation86_spill] sm:$0xff]  ;;  %v6940_v41 = vld [vmem:[#allocation89_spill] sm:$0xff] }
 0x459   :  { %2262 = vmatpush.bf16.msrb.mxu3 %v6772_v33  ;;  %2275 = vmatpush.bf16.msrb.mxu0 %v6773_v44  ;;  %v2080_v46 = vmul.f32 %v4251_v5, %v2073_v31  ;;  %v6939_v5 = vld [vmem:[#allocation88_spill] sm:$0xff]  ;;  %v6941_v31 = vld [vmem:[#allocation90_spill] sm:$0xff] }
 0x45a   :  { %2288 = vmatpush.bf16.msrb.mxu1 %v6774_v36  ;;  %2301 = vmatpush.bf16.msra.mxu2 %v6775_v42 }
 0x45b   :  { %v2257_v17 = vpack.c.bf16 %v2080_v46, %v2080_v46  ;;  %v6942_v46 = vld [vmem:[#allocation91_spill] sm:$0xff] }
 0x45d   :  { %2263 = vmatpush.bf16.msrb.mxu3 %v6776_v29  ;;  %2276 = vmatpush.bf16.msrb.mxu0 %v6777_v19 }
 0x45e   :  { %2289 = vmatpush.bf16.msrb.mxu1 %v5182_v52  ;;  %2302 = vmatpush.bf16.msra.mxu2 %v5184_v30 }
 0x461   :  { %2264 = vmatpush.bf16.msrb.mxu3 %v5188_v25  ;;  %2277 = vmatpush.bf16.msrb.mxu0 %v5190_v49 }
 0x462   :  { %2290 = vmatpush.bf16.msrb.mxu1 %v5194_v10  ;;  %2303 = vmatpush.bf16.msra.mxu2 %v5196_v54 }
 0x465   :  { %2265 = vmatpush.bf16.msrb.mxu3 %v5200_v8  ;;  %2278 = vmatpush.bf16.msrb.mxu0 %v5202_v61 }
 0x466   :  { %2291 = vmatpush.bf16.msrb.mxu1 %v5206_v21  ;;  %2304 = vmatpush.bf16.msra.mxu2 %v6914_v22 }
 0x468   :  { %2266 = vmatmul.bf16.vlgmr.msrb.gmra.mxu3 %v2257_v17  ;;  %2279 = vmatmul.bf16.vlgmr.msrb.gmra.mxu0 %v2257_v17 }
 0x469   :  { %2378 = vmatpush.bf16.msra.mxu3 %v6915_v27  ;;  %2391 = vmatpush.bf16.msra.mxu0 %v6916_v18 }
 0x46a   :  { %2292 = vmatmul.bf16.vlgmr.msrb.gmra.mxu1 %v2257_v17  ;;  %2305 = vmatmul.bf16.vlgmr.msra.gmra.mxu2 %v2257_v17  ;;  %v6943_v17 = vld [vmem:[#allocation92_spill] sm:$0xff] }
 0x46b   :  { %2404 = vmatpush.bf16.msra.mxu1 %v6917_v45  ;;  %2417 = vmatpush.bf16.msrb.mxu2 %v6918_v59 }
 0x46d   :  { %2379 = vmatpush.bf16.msra.mxu3 %v6919_v28  ;;  %2392 = vmatpush.bf16.msra.mxu0 %v6920_v32  ;;  %v6985_v28 = vld [vmem:[#allocation105_spill] sm:$0xff] }
 0x46f   :  { %2405 = vmatpush.bf16.msra.mxu1 %v6921_v14  ;;  %2418 = vmatpush.bf16.msrb.mxu2 %v6922_v15 }
 0x471   :  { %2380 = vmatpush.bf16.msra.mxu3 %v6923_v40  ;;  %2393 = vmatpush.bf16.msra.mxu0 %v6924_v1 }
 0x473   :  { %2406 = vmatpush.bf16.msra.mxu1 %v6925_v47  ;;  %2419 = vmatpush.bf16.msrb.mxu2 %v6926_v38 }
 0x475   :  { %2381 = vmatpush.bf16.msra.mxu3 %v6927_v11  ;;  %2394 = vmatpush.bf16.msra.mxu0 %v6928_v4 }
 0x477   :  { %2407 = vmatpush.bf16.msra.mxu1 %v6929_v23  ;;  %2420 = vmatpush.bf16.msrb.mxu2 %v6930_v55  ;;  %v6979_v23 = vld [vmem:[#allocation71_spill] sm:$0xff] }
 0x479   :  { %2382 = vmatpush.bf16.msra.mxu3 %v6931_v12  ;;  %2395 = vmatpush.bf16.msra.mxu0 %v6932_v13 }
 0x47b   :  { %2408 = vmatpush.bf16.msra.mxu1 %v6933_v2  ;;  %2421 = vmatpush.bf16.msrb.mxu2 %v6934_v39  ;;  %v6944_v2 = vld [vmem:[#allocation94_spill] sm:$0xff]  ;;  %v6945_v39 = vld [vmem:[#allocation20_spill] sm:$0xff] }
 0x47d   :  { %2383 = vmatpush.bf16.msra.mxu3 %v6935_v7  ;;  %2396 = vmatpush.bf16.msra.mxu0 %v6936_v48  ;;  %v6946_v7 = vld [vmem:[#allocation21_spill] sm:$0xff]  ;;  %v6947_v48 = vld [vmem:[#allocation95_spill] sm:$0xff] }
 0x47f   :  { %2409 = vmatpush.bf16.msra.mxu1 %v6937_v3  ;;  %2422 = vmatpush.bf16.msrb.mxu2 %v6938_v56  ;;  %v6948_v3 = vld [vmem:[#allocation98_spill] sm:$0xff]  ;;  %v6949_v56 = vld [vmem:[#allocation13_spill] sm:$0xff] }
 0x481   :  { %2384 = vmatpush.bf16.msra.mxu3 %v6939_v5  ;;  %2397 = vmatpush.bf16.msra.mxu0 %v6940_v41  ;;  %v6950_v5 = vld [vmem:[#allocation35_spill] sm:$0xff] }
 0x482   :  { %v6951_v41 = vld [vmem:[#allocation23_spill] sm:$0xff] }
 0x483   :  { %2410 = vmatpush.bf16.msra.mxu1 %v6941_v31  ;;  %2423 = vmatpush.bf16.msrb.mxu2 %v6942_v46  ;;  %v6952_v31 = vld [vmem:[#allocation24_spill] sm:$0xff]  ;;  %v6953_v46 = vld [vmem:[#allocation14_spill] sm:$0xff] }
 0x485   :  { %2385 = vmatpush.bf16.msra.mxu3 %v6943_v17  ;;  %2398 = vmatpush.bf16.msra.mxu0 %v6944_v2  ;;  %v6954_v17 = vld [vmem:[#allocation37_spill] sm:$0xff] }
 0x486   :  { %v6955_v2 = vld [vmem:[#allocation25_spill] sm:$0xff] }
 0x487   :  { %2411 = vmatpush.bf16.msra.mxu1 %v6947_v48  ;;  %2424 = vmatpush.bf16.msrb.mxu2 %v6948_v3  ;;  %v6958_v48 = vld [vmem:[#allocation39_spill] sm:$0xff] }
 0x488   :  { %v6959_v3 = vld [vmem:[#allocation27_spill] sm:$0xff] }
 0x489   :  { %2434 = vmatpush.bf16.msrb.mxu3 %v6945_v39  ;;  %2447 = vmatpush.bf16.msrb.mxu0 %v6946_v7  ;;  %v6956_v39 = vld [vmem:[#allocation26_spill] sm:$0xff]  ;;  %v6957_v7 = vld [vmem:[#allocation15_spill] sm:$0xff] }
 0x48b   :  { %2460 = vmatpush.bf16.msrb.mxu1 %v6949_v56  ;;  %2473 = vmatpush.bf16.msra.mxu2 %v6950_v5  ;;  %v6960_v56 = vld [vmem:[#allocation28_spill] sm:$0xff] }
 0x48c   :  { %v6961_v5 = vld [vmem:[#allocation16_spill] sm:$0xff] }
 0x48d   :  { %2435 = vmatpush.bf16.msrb.mxu3 %v6951_v41  ;;  %2448 = vmatpush.bf16.msrb.mxu0 %v6952_v31  ;;  %v6962_v41 = vld [vmem:[#allocation40_spill] sm:$0xff]  ;;  %v6963_v31 = vld [vmem:[#allocation29_spill] sm:$0xff] }
 0x48f   :  { %2461 = vmatpush.bf16.msrb.mxu1 %v6953_v46  ;;  %2474 = vmatpush.bf16.msra.mxu2 %v6954_v17  ;;  %v6964_v46 = vld [vmem:[#allocation30_spill] sm:$0xff]  ;;  %v6965_v17 = vld [vmem:[#allocation17_spill] sm:$0xff] }
 0x491   :  { %2436 = vmatpush.bf16.msrb.mxu3 %v6955_v2  ;;  %2449 = vmatpush.bf16.msrb.mxu0 %v6956_v39  ;;  %v6966_v2 = vld [vmem:[#allocation41_spill] sm:$0xff]  ;;  %v6967_v39 = vld [vmem:[#allocation31_spill] sm:$0xff] }
 0x493   :  { %2462 = vmatpush.bf16.msrb.mxu1 %v6957_v7  ;;  %2475 = vmatpush.bf16.msra.mxu2 %v6958_v48  ;;  %v6968_v7 = vld [vmem:[#allocation32_spill] sm:$0xff]  ;;  %v6969_v48 = vld [vmem:[#allocation18_spill] sm:$0xff] }
 0x495   :  { %2437 = vmatpush.bf16.msrb.mxu3 %v6959_v3  ;;  %2450 = vmatpush.bf16.msrb.mxu0 %v6960_v56  ;;  %v6970_v3 = vld [vmem:[#allocation42_spill] sm:$0xff]  ;;  %v6971_v56 = vld [vmem:[#allocation33_spill] sm:$0xff] }
 0x497   :  { %2463 = vmatpush.bf16.msrb.mxu1 %v6961_v5  ;;  %2476 = vmatpush.bf16.msra.mxu2 %v6962_v41  ;;  %v6972_v5 = vld [vmem:[#allocation36_spill] sm:$0xff]  ;;  %v6973_v41 = vld [vmem:[#allocation19_spill] sm:$0xff] }
 0x499   :  { %2438 = vmatpush.bf16.msrb.mxu3 %v6963_v31  ;;  %2451 = vmatpush.bf16.msrb.mxu0 %v6964_v46  ;;  %v6974_v31 = vld [vmem:[#allocation43_spill] sm:$0xff]  ;;  %v6975_v46 = vld [vmem:[#allocation34_spill] sm:$0xff] }
 0x49b   :  { %2464 = vmatpush.bf16.msrb.mxu1 %v6965_v17  ;;  %2477 = vmatpush.bf16.msra.mxu2 %v6966_v2  ;;  %v6976_v17 = vld [vmem:[#allocation38_spill] sm:$0xff] }
 0x49c   :  { %v6977_v2 = vld [vmem:[#allocation22_spill] sm:$0xff] }
 0x49d   :  { %2439 = vmatpush.bf16.msrb.mxu3 %v6967_v39  ;;  %2452 = vmatpush.bf16.msrb.mxu0 %v6968_v7  ;;  %v6978_v39 = vld [vmem:[#allocation44_spill] sm:$0xff] }
 0x49f   :  { %2465 = vmatpush.bf16.msrb.mxu1 %v6969_v48  ;;  %2478 = vmatpush.bf16.msra.mxu2 %v6970_v3 }
 0x4a1   :  { %2440 = vmatpush.bf16.msrb.mxu3 %v6971_v56  ;;  %2453 = vmatpush.bf16.msrb.mxu0 %v6972_v5 }
 0x4a3   :  { %2466 = vmatpush.bf16.msrb.mxu1 %v6973_v41  ;;  %2479 = vmatpush.bf16.msra.mxu2 %v6974_v31 }
 0x4a5   :  { %2441 = vmatpush.bf16.msrb.mxu3 %v6975_v46  ;;  %2454 = vmatpush.bf16.msrb.mxu0 %v6976_v17  ;;  %v6980_v46 = vld [vmem:[#allocation74_spill] sm:$0xff] }
 0x4a7   :  { %2467 = vmatpush.bf16.msrb.mxu1 %v6977_v2  ;;  %2480 = vmatpush.bf16.msra.mxu2 %v6978_v39  ;;  %v6981_v2 = vld [vmem:[#allocation65_spill] sm:$0xff] }
 0x4c4   :  { %v2104_v7 = vpop.f32.mrf.mxu0 }
 0x4c5   :  { %v2117_v48 = vpop.f32.mrf.mxu1 }
 0x4ca   :  { %v2091_v13 = vpop.f32.mrf.mxu3 }
 0x4cb   :  { %v5807_v3 = vpop.f32.mrf.mxu2 }
 0x4cc   :  { %v2106_v56 = vpop.f32.mrf.mxu0 }
 0x4cd   :  { %v2119_v12 = vpop.f32.mrf.mxu1 }
 0x4d2   :  { %v2093_v5 = vpop.f32.mrf.mxu3 }
 0x4d3   :  { %v2132_v55 = vpop.f32.mrf.mxu2 }
 0x4d4   :  { %v2160_v41 = vpop.f32.mrf.mxu0 }
 0x4d5   :  { %v2191_v31 = vadd.f32 %v2160_v41, %v6979_v23  ;;  %v2173_v4 = vpop.f32.mrf.mxu1 }
 0x4d6   :  { %v2192_v11 = vadd.f32 %v2173_v4, %v6980_v46 }
 0x4d7   :  { %v3988_v17 = vmul.f32 -1.442695, %v2191_v31  ;;  %v6982_v31 = vld [vmem:[#allocation47_spill] sm:$0xff] }
 0x4d8   :  { %v3989_v38 = vmul.f32 -1.442695, %v2192_v11  ;;  %v2105_v11 = vadd.f32 %v2104_v7, %v6982_v31 }
 0x4d9   :  { %4252 = vpow2.f32 %v3988_v17 }
 0x4da   :  { %4254 = vpow2.f32 %v3989_v38  ;;  %v2147_v39 = vpop.f32.mrf.mxu3 }
 0x4db   :  { %v2190_v47 = vadd.f32 %v2147_v39, %v6981_v2  ;;  %v2186_v1 = vpop.f32.mrf.mxu2  ;;  %v6983_v39 = vld [vmem:[#allocation49_spill] sm:$0xff] }
 0x4dc   :  { %v2162_v40 = vpop.f32.mrf.mxu0  ;;  %v2193_v59 = vadd.f32 %v2186_v1, %v6985_v28 }
 0x4dd   :  { %v3987_v15 = vmul.f32 -1.442695, %v2190_v47  ;;  %v2175_v56 = vpop.f32.mrf.mxu1 }
 0x4de   :  { %v2092_v56 = vadd.f32 %v2091_v13, %v6983_v39 }
 0x4df   :  { %v4253_v12 = vpop.eup %4252  ;;  %4256 = vpow2.f32 %v3987_v15 }
 0x4e0   :  { %v4255_v55 = vpop.eup %4254  ;;  %v2204_v5 = vadd.f32 1.0, %v4253_v12 }
 0x4e1   :  { %v5812_v41 = vadd.f32 1.0, %v4255_v55 }
 0x4e2   :  { %4258 = vrcp.f32 %v2204_v5  ;;  %v2149_v23 = vpop.f32.mrf.mxu3  ;;  %vm2226_vm14 = vweird.f32 %v2204_v5 }
 0x4e3   :  { %v2188_v4 = vpop.f32.mrf.mxu2  ;;  %4260 = vrcp.f32 %v5812_v41  ;;  %vm2241_vm6 = vweird.f32 %v5812_v41 }
 0x4e5   :  { %v4257_v46 = vpop.eup %4256  ;;  %v2280_v38 = vpop.f32.mrf.mxu0 }
 0x4e6   :  { %v2203_v17 = vadd.f32 1.0, %v4257_v46  ;;  %v2311_v14 = vadd.f32 %v2280_v38, %v2105_v11  ;;  %v6984_v38 = vld [vmem:[#allocation46_spill] sm:$0xff] }
 0x4e7   :  { %v2293_v2 = vpop.f32.mrf.mxu1  ;;  %v2118_v32 = vadd.f32 %v2117_v48, %v6984_v38 }
 0x4e8   :  { %v4259_v40 = vpop.eup %4258  ;;  %4262 = vrcp.f32 %v2203_v17  ;;  %v3991_v15 = vmul.f32 -1.442695, %v2311_v14  ;;  %v2217_v28 = vand.u32 2147483648, %v2203_v17  ;;  %v2215_v48 = vand.u32 2147483647, %v2203_v17 }
 0x4e9   :  { %v2222_v47 = vmul.f32 %v4259_v40, %v2204_v5  ;;  %v5819_v7 = vpop.eup %4260  ;;  %vm2227_vm13 = vweird.f32 %v4259_v40  ;;  %vm2211_vm1 = vweird.f32 %v2203_v17 }
 0x4ea   :  { %4264 = vpow2.f32 %v3991_v15  ;;  %v2237_v15 = vmul.f32 %v5819_v7, %v5812_v41  ;;  %vm5825_vm15 = vmor %vm2226_vm14, %vm2227_vm13  ;;  %vm2216_vm4 = vcmp.eq.f32.partialorder %v2215_v48, 8.507059e+37  ;;  %vm2242_vm5 = vweird.f32 %v5819_v7 }
 0x4eb   :  { %v2223_v12 = vsub.f32 1.0, %v2222_v47  ;;  %v2267_v55 = vpop.f32.mrf.mxu3  ;;  %v2232_v47 = vand.u32 2147483648, %v2204_v5  ;;  %vm2243_vm7 = vmor %vm2241_vm6, %vm2242_vm5 }
 0x4ec   :  { %v2310_v23 = vadd.f32 %v2267_v55, %v2092_v56  ;;  %v2312_v56 = vadd.f32 %v2293_v2, %v2118_v32  ;;  %v2238_v2 = vsub.f32 1.0, %v2237_v15 }
 0x4ed   :  { %v5817_v4 = vpop.f32.mrf.mxu2  ;;  %v2224_v31 = vmul.f32 %v4259_v40, %v2223_v12  ;;  %v2282_v46 = vpop.f32.mrf.mxu0 }
 0x4ee   :  { %v4263_v11 = vpop.eup %4262  ;;  %v3990_v45 = vmul.f32 -1.442695, %v2310_v23  ;;  %v2230_v46 = vand.u32 2147483647, %v2204_v5  ;;  %v3992_v23 = vmul.f32 -1.442695, %v2312_v56 }
 0x4ef   :  { %v2295_v18 = vpop.f32.mrf.mxu1  ;;  %v2207_v14 = vmul.f32 %v4263_v11, %v2203_v17  ;;  %v2225_v13 = vadd.f32 %v4259_v40, %v2224_v31  ;;  %vm2212_vm0 = vweird.f32 %v4263_v11 }
 0x4f0   :  { %4266 = vpow2.f32 %v3990_v45  ;;  %v4265_v55 = vpop.eup %4264  ;;  %v2233_v45 = vor.u32 1.1754944e-38, %v2232_v47  ;;  %vm2231_vm2 = vcmp.eq.f32.partialorder %v2230_v46, 8.507059e+37  ;;  %vm2213_vm3 = vmor %vm2211_vm1, %vm2212_vm0  ;;  %v2245_v46 = vand.u32 2147483647, %v5812_v41 }
 0x4f1   :  { %v2208_v12 = vsub.f32 1.0, %v2207_v14  ;;  %4268 = vtanh.f32 %v2193_v59  ;;  %v5829_v18 = vadd.f32 1.0, %v4265_v55  ;;  %v2229_v31 = vsel %vm5825_vm15, %v4259_v40, %v2225_v13 }
 0x4f2   :  { %v2218_v59 = vor.u32 1.1754944e-38, %v2217_v28  ;;  %v2234_v55 = vsel %vm2231_vm2, %v2233_v45, %v2229_v31  ;;  %v2239_v40 = vmul.f32 %v5819_v7, %v2238_v2  ;;  %vm2246_vm8 = vcmp.eq.f32.partialorder %v2245_v46, 8.507059e+37 }
 0x4f3   :  { %v2209_v1 = vmul.f32 %v4263_v11, %v2208_v12  ;;  %v2269_v32 = vpop.f32.mrf.mxu3  ;;  %4270 = vrcp.f32 %v5829_v18  ;;  %v2252_v13 = vmul.f32 %v2234_v55, %v5671_v43  ;;  %vm2346_vm13 = vweird.f32 %v5829_v18 }
 0x4f4   :  { %4272 = vpow2.f32 %v3992_v23  ;;  %v2240_v56 = vadd.f32 %v5819_v7, %v2239_v40 }
 0x4f5   :  { %v2308_v14 = vpop.f32.mrf.mxu2  ;;  %v2210_v5 = vadd.f32 %v4263_v11, %v2209_v1 }
 0x4f6   :  { %v4267_v38 = vpop.eup %4266  ;;  %v2244_v28 = vsel %vm2243_vm7, %v5819_v7, %v2240_v56  ;;  %v2350_v56 = vand.u32 2147483647, %v5829_v18 }
 0x4f7   :  { %v2214_v12 = vsel %vm2213_vm3, %v4263_v11, %v2210_v5  ;;  %v2323_v27 = vadd.f32 1.0, %v4267_v38  ;;  %v4269_v22 = vpop.eup %4268  ;;  %v2247_v11 = vand.u32 2147483648, %v5812_v41  ;;  %v2131_v41 = vadd.f32 %v5807_v3, %v5345_v6 }
 0x4f8   :  { %v2219_v39 = vsel %vm2216_vm4, %v2218_v59, %v2214_v12  ;;  %vm2351_vm0 = vcmp.eq.f32.partialorder %v2350_v56, 8.507059e+37  ;;  %v6999_v56 = vld [vmem:[#allocation66_spill] sm:$0xff] }
 0x4f9   :  { %v2253_v47 = vmul.f32 %v4269_v22, %v2219_v39  ;;  %4274 = vrcp.f32 %v2323_v27  ;;  %v5836_v17 = vpop.eup %4270  ;;  %v2248_v48 = vor.u32 1.1754944e-38, %v2247_v11  ;;  %v2313_v7 = vadd.f32 %v5817_v4, %v2131_v41  ;;  %v6996_v4 = vld [vmem:[#allocation62_spill] sm:$0xff] }
 0x4fa   :  { %v4273_v38 = vpop.eup %4272  ;;  %v2342_v43 = vmul.f32 %v5836_v17, %v5829_v18  ;;  %v2337_v40 = vand.u32 2147483648, %v2323_v27  ;;  %vm2347_vm10 = vweird.f32 %v5836_v17  ;;  %vm2331_vm11 = vweird.f32 %v2323_v27 }
 0x4fb   :  { %v5838_v15 = vadd.f32 %v2253_v47, %v2252_v13  ;;  %v5849_v32 = vadd.f32 1.0, %v4273_v38  ;;  %v2249_v23 = vsel %vm2246_vm8, %v2248_v48, %v2244_v28  ;;  %v2335_v39 = vand.u32 2147483647, %v2323_v27  ;;  %vm2348_vm14 = vmor %vm2346_vm13, %vm2347_vm10 }
 0x4fc   :  { %v2343_v31 = vsub.f32 1.0, %v2342_v43  ;;  %v2352_v13 = vand.u32 2147483648, %v5829_v18  ;;  %v2338_v11 = vor.u32 1.1754944e-38, %v2337_v40  ;;  %v6992_v40 = vld [vmem:[#allocation56_spill] sm:$0xff] }
 0x4fd   :  { %4276 = vtanh.f32 %v5838_v15  ;;  %vm2336_vm15 = vcmp.eq.f32.partialorder %v2335_v39, 8.507059e+37  ;;  %vm2361_vm2 = vweird.f32 %v5849_v32  ;;  %v6993_v39 = vld [vmem:[#allocation57_spill] sm:$0xff] }
 0x4fe   :  { %v2344_v55 = vmul.f32 %v5836_v17, %v2343_v31  ;;  %4278 = vrcp.f32 %v5849_v32  ;;  %v2353_v46 = vor.u32 1.1754944e-38, %v2352_v13  ;;  %v6995_v13 = vld [vmem:[#allocation60_spill] sm:$0xff] }
 0x4ff   :  { %v4275_v22 = vpop.eup %4274  ;;  %4280 = vtanh.f32 %v2313_v7 }
 0x500   :  { %v2327_v1 = vmul.f32 %v4275_v22, %v2323_v27  ;;  %vm2332_vm9 = vweird.f32 %v4275_v22  ;;  %v2345_v3 = vadd.f32 %v5836_v17, %v2344_v55  ;;  %v6990_v55 = vld [vmem:[#allocation127_spill] sm:$0xff] }
 0x501   :  { %vm5861_vm12 = vmor %vm2331_vm11, %vm2332_vm9 }
 0x502   :  { %v2328_v45 = vsub.f32 1.0, %v2327_v1  ;;  %v2349_v38 = vsel %vm2348_vm14, %v5836_v17, %v2345_v3  ;;  %v6994_v3 = vld [vmem:[#allocation58_spill] sm:$0xff] }
 0x503   :  { %v4277_v2 = vpop.eup %4276 }
 0x504   :  { %v2256_v14 = vmul.f32 %v4277_v2, %v2249_v23  ;;  %v2329_v5 = vmul.f32 %v4275_v22, %v2328_v45  ;;  %v4279_v47 = vpop.eup %4278  ;;  %v2367_v2 = vand.u32 2147483648, %v5849_v32  ;;  %v2365_v23 = vand.u32 2147483647, %v5849_v32 }
 0x505   :  { %v2357_v43 = vmul.f32 %v4279_v47, %v5849_v32  ;;  %v4281_v18 = vpop.eup %4280  ;;  %vm2362_vm1 = vweird.f32 %v4279_v47 }
 0x506   :  { %v2377_v59 = vpack.c.bf16 %v2256_v14, %v2256_v14  ;;  %v2330_v12 = vadd.f32 %v4275_v22, %v2329_v5  ;;  %vm2363_vm3 = vmor %vm2361_vm2, %vm2362_vm1  ;;  %v2368_v41 = vor.u32 1.1754944e-38, %v2367_v2  ;;  %vm2366_vm4 = vcmp.eq.f32.partialorder %v2365_v23, 8.507059e+37  ;;  %v7012_v2 = vld [vmem:[#allocation84_spill] sm:$0xff]  ;;  %v7013_v23 = vld [vmem:[#allocation85_spill] sm:$0xff] }
 0x507   :  { %v2358_v17 = vsub.f32 1.0, %v2357_v43  ;;  %v7003_v43 = vld [vmem:[#allocation70_spill] sm:$0xff] }
 0x508   :  { %2386 = vmatmul.bf16.vlgmr.msra.gmra.mxu3 %v2377_v59  ;;  %2399 = vmatmul.bf16.vlgmr.msra.gmra.mxu0 %v2377_v59  ;;  %v2334_v27 = vsel %vm5861_vm12, %v4275_v22, %v2330_v12  ;;  %v2354_v22 = vsel %vm2351_vm0, %v2353_v46, %v2349_v38  ;;  %v6991_v12 = vld [vmem:[#allocation55_spill] sm:$0xff]  ;;  %v7001_v38 = vld [vmem:[#allocation68_spill] sm:$0xff]  ;;  %v7002_v46 = vld [vmem:[#allocation69_spill] sm:$0xff] }
 0x509   :  { %2412 = vmatmul.bf16.vlgmr.msra.gmra.mxu1 %v2377_v59  ;;  %2425 = vmatmul.bf16.vlgmr.msrb.gmra.mxu2 %v2377_v59  ;;  %v2339_v28 = vsel %vm2336_vm15, %v2338_v11, %v2334_v27  ;;  %v2372_v48 = vmul.f32 %v2354_v22, %v5717_v37  ;;  %v2359_v45 = vmul.f32 %v4279_v47, %v2358_v17  ;;  %v6998_v27 = vld [vmem:[#allocation64_spill] sm:$0xff]  ;;  %v7000_v11 = vld [vmem:[#allocation67_spill] sm:$0xff]  ;;  %v7008_v17 = vld [vmem:[#allocation78_spill] sm:$0xff] }
 0x50a   :  { %2554 = vmatpush.bf16.msra.mxu3 %v5110_v20  ;;  %2567 = vmatpush.bf16.msra.mxu0 %v5112_v57  ;;  %v2373_v1 = vmul.f32 %v4281_v18, %v2339_v28  ;;  %v7004_v28 = vld [vmem:[#allocation72_spill] sm:$0xff]  ;;  %v7005_v18 = vld [vmem:[#allocation73_spill] sm:$0xff] }
 0x50b   :  { %2580 = vmatpush.bf16.msra.mxu1 %v6759_v51  ;;  %2593 = vmatpush.bf16.msrb.mxu2 %v6760_v26  ;;  %v2360_v37 = vadd.f32 %v4279_v47, %v2359_v45  ;;  %v7006_v22 = vld [vmem:[#allocation76_spill] sm:$0xff] }
 0x50c   :  { %v5884_v31 = vadd.f32 %v2373_v1, %v2372_v48  ;;  %v7007_v1 = vld [vmem:[#allocation77_spill] sm:$0xff]  ;;  %v7009_v48 = vld [vmem:[#allocation79_spill] sm:$0xff]  ;;  %v7010_v45 = vld [vmem:[#allocation80_spill] sm:$0xff] }
 0x50d   :  { %v2364_v14 = vsel %vm2363_vm3, %v4279_v47, %v2360_v37  ;;  %v6997_v47 = vld [vmem:[#allocation63_spill] sm:$0xff]  ;;  %v7011_v37 = vld [vmem:[#allocation82_spill] sm:$0xff] }
 0x50e   :  { %2555 = vmatpush.bf16.msra.mxu3 %v6761_v50  ;;  %2568 = vmatpush.bf16.msra.mxu0 %v6762_v60  ;;  %4282 = vtanh.f32 %v5884_v31 }
 0x50f   :  { %2581 = vmatpush.bf16.msra.mxu1 %v6763_v63  ;;  %2594 = vmatpush.bf16.msrb.mxu2 %v6764_v58 }
 0x512   :  { %2556 = vmatpush.bf16.msra.mxu3 %v6765_v35  ;;  %2569 = vmatpush.bf16.msra.mxu0 %v6766_v0 }
 0x513   :  { %2582 = vmatpush.bf16.msra.mxu1 %v5142_v24  ;;  %2595 = vmatpush.bf16.msrb.mxu2 %v6767_v16 }
 0x514   :  { %v4283_v5 = vpop.eup %4282 }
 0x516   :  { %2557 = vmatpush.bf16.msra.mxu3 %v6768_v53  ;;  %2570 = vmatpush.bf16.msra.mxu0 %v6769_v34 }
 0x517   :  { %2583 = vmatpush.bf16.msra.mxu1 %v6770_v9  ;;  %2596 = vmatpush.bf16.msrb.mxu2 %v6771_v62 }
 0x518   :  { %2442 = vmatmul.bf16.vlgmr.msrb.gmra.mxu3 %v2377_v59  ;;  %2455 = vmatmul.bf16.vlgmr.msrb.gmra.mxu0 %v2377_v59 }
 0x519   :  { %2468 = vmatmul.bf16.vlgmr.msrb.gmra.mxu1 %v2377_v59  ;;  %2481 = vmatmul.bf16.vlgmr.msra.gmra.mxu2 %v2377_v59  ;;  %v2369_v59 = vsel %vm2366_vm4, %v2368_v41, %v2364_v14  ;;  %v7014_v14 = vld [vmem:[#allocation86_spill] sm:$0xff]  ;;  %v7016_v41 = vld [vmem:[#allocation89_spill] sm:$0xff] }
 0x51a   :  { %2558 = vmatpush.bf16.msra.mxu3 %v6772_v33  ;;  %2571 = vmatpush.bf16.msra.mxu0 %v6773_v44  ;;  %v2376_v32 = vmul.f32 %v4283_v5, %v2369_v59  ;;  %v7015_v5 = vld [vmem:[#allocation88_spill] sm:$0xff]  ;;  %v7017_v59 = vld [vmem:[#allocation90_spill] sm:$0xff] }
 0x51b   :  { %2584 = vmatpush.bf16.msra.mxu1 %v6774_v36  ;;  %2597 = vmatpush.bf16.msrb.mxu2 %v6775_v42 }
 0x51c   :  { %v2553_v7 = vpack.c.bf16 %v2376_v32, %v2376_v32  ;;  %v7018_v32 = vld [vmem:[#allocation91_spill] sm:$0xff] }
 0x51e   :  { %2559 = vmatpush.bf16.msra.mxu3 %v6776_v29  ;;  %2572 = vmatpush.bf16.msra.mxu0 %v6777_v19 }
 0x51f   :  { %2585 = vmatpush.bf16.msra.mxu1 %v5182_v52  ;;  %2598 = vmatpush.bf16.msrb.mxu2 %v5184_v30 }
 0x522   :  { %2560 = vmatpush.bf16.msra.mxu3 %v5188_v25  ;;  %2573 = vmatpush.bf16.msra.mxu0 %v5190_v49 }
 0x523   :  { %2586 = vmatpush.bf16.msra.mxu1 %v5194_v10  ;;  %2599 = vmatpush.bf16.msrb.mxu2 %v5196_v54 }
 0x526   :  { %2561 = vmatpush.bf16.msra.mxu3 %v5200_v8  ;;  %2574 = vmatpush.bf16.msra.mxu0 %v5202_v61 }
 0x527   :  { %2587 = vmatpush.bf16.msra.mxu1 %v5206_v21  ;;  %2600 = vmatpush.bf16.msrb.mxu2 %v6990_v55 }
 0x529   :  { %2562 = vmatmul.bf16.vlgmr.msra.gmra.mxu3 %v2553_v7  ;;  %2575 = vmatmul.bf16.vlgmr.msra.gmra.mxu0 %v2553_v7 }
 0x52a   :  { %2674 = vmatpush.bf16.msrb.mxu3 %v6991_v12  ;;  %2687 = vmatpush.bf16.msrb.mxu0 %v6992_v40 }
 0x52b   :  { %2588 = vmatmul.bf16.vlgmr.msra.gmra.mxu1 %v2553_v7  ;;  %2601 = vmatmul.bf16.vlgmr.msrb.gmra.mxu2 %v2553_v7  ;;  %v7019_v7 = vld [vmem:[#allocation92_spill] sm:$0xff] }
 0x52c   :  { %2700 = vmatpush.bf16.msrb.mxu1 %v6993_v39  ;;  %2713 = vmatpush.bf16.msra.mxu2 %v6994_v3  ;;  %v7065_v3 = vld [vmem:[#allocation46_spill] sm:$0xff] }
 0x52e   :  { %2675 = vmatpush.bf16.msrb.mxu3 %v6995_v13  ;;  %2688 = vmatpush.bf16.msrb.mxu0 %v6996_v4 }
 0x530   :  { %2701 = vmatpush.bf16.msrb.mxu1 %v6997_v47  ;;  %2714 = vmatpush.bf16.msra.mxu2 %v6998_v27  ;;  %v7060_v27 = vld [vmem:[#allocation75_spill] sm:$0xff] }
 0x532   :  { %2676 = vmatpush.bf16.msrb.mxu3 %v6999_v56  ;;  %2689 = vmatpush.bf16.msrb.mxu0 %v7000_v11  ;;  %v7059_v56 = vld [vmem:[#allocation48_spill] sm:$0xff] }
 0x533   :  { %v359_v47 = vadd.f32 %v7060_v27, %v7059_v56 }
 0x534   :  { %2702 = vmatpush.bf16.msrb.mxu1 %v7001_v38  ;;  %2715 = vmatpush.bf16.msra.mxu2 %v7002_v46 }
 0x536   :  { %2677 = vmatpush.bf16.msrb.mxu3 %v7003_v43  ;;  %2690 = vmatpush.bf16.msrb.mxu0 %v7004_v28  ;;  %v7057_v28 = vld [vmem:[#allocation45_spill] sm:$0xff] }
 0x538   :  { %2703 = vmatpush.bf16.msrb.mxu1 %v7005_v18  ;;  %2716 = vmatpush.bf16.msra.mxu2 %v7006_v22  ;;  %v7055_v22 = vld [vmem:[#allocation51_spill] sm:$0xff] }
 0x53a   :  { %2678 = vmatpush.bf16.msrb.mxu3 %v7007_v1  ;;  %2691 = vmatpush.bf16.msrb.mxu0 %v7008_v17 }
 0x53c   :  { %2704 = vmatpush.bf16.msrb.mxu1 %v7009_v48  ;;  %2717 = vmatpush.bf16.msra.mxu2 %v7010_v45  ;;  %v7020_v48 = vld [vmem:[#allocation94_spill] sm:$0xff]  ;;  %v7021_v45 = vld [vmem:[#allocation20_spill] sm:$0xff] }
 0x53e   :  { %2679 = vmatpush.bf16.msrb.mxu3 %v7011_v37  ;;  %2692 = vmatpush.bf16.msrb.mxu0 %v7012_v2  ;;  %v7022_v37 = vld [vmem:[#allocation21_spill] sm:$0xff]  ;;  %v7023_v2 = vld [vmem:[#allocation95_spill] sm:$0xff] }
 0x540   :  { %2705 = vmatpush.bf16.msrb.mxu1 %v7013_v23  ;;  %2718 = vmatpush.bf16.msra.mxu2 %v7014_v14  ;;  %v7024_v23 = vld [vmem:[#allocation98_spill] sm:$0xff]  ;;  %v7025_v14 = vld [vmem:[#allocation13_spill] sm:$0xff] }
 0x542   :  { %2680 = vmatpush.bf16.msrb.mxu3 %v7015_v5  ;;  %2693 = vmatpush.bf16.msrb.mxu0 %v7016_v41  ;;  %v7026_v5 = vld [vmem:[#allocation35_spill] sm:$0xff] }
 0x543   :  { %v7027_v41 = vld [vmem:[#allocation23_spill] sm:$0xff] }
 0x544   :  { %2706 = vmatpush.bf16.msrb.mxu1 %v7017_v59  ;;  %2719 = vmatpush.bf16.msra.mxu2 %v7018_v32  ;;  %v7028_v59 = vld [vmem:[#allocation24_spill] sm:$0xff]  ;;  %v7029_v32 = vld [vmem:[#allocation14_spill] sm:$0xff] }
 0x546   :  { %2681 = vmatpush.bf16.msrb.mxu3 %v7019_v7  ;;  %2694 = vmatpush.bf16.msrb.mxu0 %v7020_v48  ;;  %v7030_v7 = vld [vmem:[#allocation37_spill] sm:$0xff] }
 0x547   :  { %v7031_v48 = vld [vmem:[#allocation25_spill] sm:$0xff] }
 0x548   :  { %2707 = vmatpush.bf16.msrb.mxu1 %v7023_v2  ;;  %2720 = vmatpush.bf16.msra.mxu2 %v7024_v23  ;;  %v7034_v2 = vld [vmem:[#allocation39_spill] sm:$0xff] }
 0x549   :  { %v7035_v23 = vld [vmem:[#allocation27_spill] sm:$0xff] }
 0x54a   :  { %2730 = vmatpush.bf16.msra.mxu3 %v7021_v45  ;;  %2743 = vmatpush.bf16.msra.mxu0 %v7022_v37  ;;  %v7032_v45 = vld [vmem:[#allocation26_spill] sm:$0xff]  ;;  %v7033_v37 = vld [vmem:[#allocation15_spill] sm:$0xff] }
 0x54c   :  { %2756 = vmatpush.bf16.msra.mxu1 %v7025_v14  ;;  %2769 = vmatpush.bf16.msrb.mxu2 %v7026_v5  ;;  %v7036_v14 = vld [vmem:[#allocation28_spill] sm:$0xff] }
 0x54d   :  { %v7037_v5 = vld [vmem:[#allocation16_spill] sm:$0xff] }
 0x54e   :  { %2731 = vmatpush.bf16.msra.mxu3 %v7027_v41  ;;  %2744 = vmatpush.bf16.msra.mxu0 %v7028_v59  ;;  %v7038_v41 = vld [vmem:[#allocation40_spill] sm:$0xff]  ;;  %v7039_v59 = vld [vmem:[#allocation29_spill] sm:$0xff] }
 0x550   :  { %2757 = vmatpush.bf16.msra.mxu1 %v7029_v32  ;;  %2770 = vmatpush.bf16.msrb.mxu2 %v7030_v7  ;;  %v7040_v32 = vld [vmem:[#allocation30_spill] sm:$0xff]  ;;  %v7041_v7 = vld [vmem:[#allocation17_spill] sm:$0xff] }
 0x552   :  { %2732 = vmatpush.bf16.msra.mxu3 %v7031_v48  ;;  %2745 = vmatpush.bf16.msra.mxu0 %v7032_v45  ;;  %v7042_v48 = vld [vmem:[#allocation41_spill] sm:$0xff]  ;;  %v7043_v45 = vld [vmem:[#allocation31_spill] sm:$0xff] }
 0x554   :  { %2758 = vmatpush.bf16.msra.mxu1 %v7033_v37  ;;  %2771 = vmatpush.bf16.msrb.mxu2 %v7034_v2  ;;  %v7044_v37 = vld [vmem:[#allocation32_spill] sm:$0xff]  ;;  %v7045_v2 = vld [vmem:[#allocation18_spill] sm:$0xff] }
 0x556   :  { %2733 = vmatpush.bf16.msra.mxu3 %v7035_v23  ;;  %2746 = vmatpush.bf16.msra.mxu0 %v7036_v14  ;;  %v7046_v23 = vld [vmem:[#allocation42_spill] sm:$0xff]  ;;  %v7047_v14 = vld [vmem:[#allocation33_spill] sm:$0xff] }
 0x558   :  { %2759 = vmatpush.bf16.msra.mxu1 %v7037_v5  ;;  %2772 = vmatpush.bf16.msrb.mxu2 %v7038_v41  ;;  %v7048_v5 = vld [vmem:[#allocation36_spill] sm:$0xff]  ;;  %v7049_v41 = vld [vmem:[#allocation19_spill] sm:$0xff] }
 0x55a   :  { %2734 = vmatpush.bf16.msra.mxu3 %v7039_v59  ;;  %2747 = vmatpush.bf16.msra.mxu0 %v7040_v32  ;;  %v7050_v59 = vld [vmem:[#allocation43_spill] sm:$0xff]  ;;  %v7051_v32 = vld [vmem:[#allocation34_spill] sm:$0xff] }
 0x55c   :  { %2760 = vmatpush.bf16.msra.mxu1 %v7041_v7  ;;  %2773 = vmatpush.bf16.msrb.mxu2 %v7042_v48  ;;  %v7052_v7 = vld [vmem:[#allocation38_spill] sm:$0xff] }
 0x55d   :  { %v7053_v48 = vld [vmem:[#allocation22_spill] sm:$0xff] }
 0x55e   :  { %2735 = vmatpush.bf16.msra.mxu3 %v7043_v45  ;;  %2748 = vmatpush.bf16.msra.mxu0 %v7044_v37  ;;  %v7054_v45 = vld [vmem:[#allocation44_spill] sm:$0xff] }
 0x560   :  { %2761 = vmatpush.bf16.msra.mxu1 %v7045_v2  ;;  %2774 = vmatpush.bf16.msrb.mxu2 %v7046_v23 }
 0x562   :  { %2736 = vmatpush.bf16.msra.mxu3 %v7047_v14  ;;  %2749 = vmatpush.bf16.msra.mxu0 %v7048_v5 }
 0x564   :  { %2762 = vmatpush.bf16.msra.mxu1 %v7049_v41  ;;  %2775 = vmatpush.bf16.msrb.mxu2 %v7050_v59  ;;  %v7056_v41 = vld [vmem:[#allocation81_spill] sm:$0xff] }
 0x565   :  { %v388_v18 = vadd.f32 %v7056_v41, %v7055_v22 }
 0x566   :  { %2737 = vmatpush.bf16.msra.mxu3 %v7051_v32  ;;  %2750 = vmatpush.bf16.msra.mxu0 %v7052_v7  ;;  %v7058_v32 = vld [vmem:[#allocation83_spill] sm:$0xff] }
 0x567   :  { %v417_v43 = vadd.f32 %v7058_v32, %v7057_v28 }
 0x568   :  { %2763 = vmatpush.bf16.msra.mxu1 %v7053_v48  ;;  %2776 = vmatpush.bf16.msrb.mxu2 %v7054_v45 }
 0x585   :  { %v2400_v37 = vpop.f32.mrf.mxu0 }
 0x586   :  { %v2413_v2 = vpop.f32.mrf.mxu1 }
 0x587   :  { %v2414_v39 = vadd.f32 %v2413_v2, %v7065_v3 }
 0x58b   :  { %v2387_v17 = vpop.f32.mrf.mxu3 }
 0x58c   :  { %v5974_v23 = vpop.f32.mrf.mxu2 }
 0x58d   :  { %v2402_v14 = vpop.f32.mrf.mxu0 }
 0x58e   :  { %v2415_v1 = vpop.f32.mrf.mxu1 }
 0x593   :  { %v2389_v5 = vpop.f32.mrf.mxu3 }
 0x594   :  { %v2428_v59 = vpop.f32.mrf.mxu2 }
 0x595   :  { %v2456_v7 = vpop.f32.mrf.mxu0 }
 0x596   :  { %v2487_v46 = vadd.f32 %v2456_v7, %v388_v18  ;;  %v2469_v48 = vpop.f32.mrf.mxu1 }
 0x597   :  { %v2488_v38 = vadd.f32 %v2469_v48, %v417_v43 }
 0x598   :  { %v3994_v45 = vmul.f32 -1.442695, %v2487_v46  ;;  %v7061_v46 = vld [vmem:[#allocation47_spill] sm:$0xff] }
 0x599   :  { %v3995_v11 = vmul.f32 -1.442695, %v2488_v38  ;;  %v2401_v48 = vadd.f32 %v2400_v37, %v7061_v46 }
 0x59a   :  { %4284 = vpow2.f32 %v3994_v45 }
 0x59b   :  { %4286 = vpow2.f32 %v3995_v11  ;;  %v2443_v1 = vpop.f32.mrf.mxu3 }
 0x59c   :  { %v2486_v14 = vadd.f32 %v2443_v1, %v359_v47  ;;  %v2482_v5 = vpop.f32.mrf.mxu2 }
 0x59d   :  { %v2458_v4 = vpop.f32.mrf.mxu0 }
 0x59e   :  { %v3993_v41 = vmul.f32 -1.442695, %v2486_v14  ;;  %v2471_v59 = vpop.f32.mrf.mxu1 }
 0x5a0   :  { %v4285_v22 = vpop.eup %4284  ;;  %4288 = vpow2.f32 %v3993_v41  ;;  %v7062_v41 = vld [vmem:[#allocation49_spill] sm:$0xff] }
 0x5a1   :  { %v4287_v32 = vpop.eup %4286  ;;  %v2500_v28 = vadd.f32 1.0, %v4285_v22  ;;  %v2388_v22 = vadd.f32 %v2387_v17, %v7062_v41 }
 0x5a2   :  { %v5982_v43 = vadd.f32 1.0, %v4287_v32 }
 0x5a3   :  { %4290 = vrcp.f32 %v2500_v28  ;;  %v2445_v18 = vpop.f32.mrf.mxu3  ;;  %vm2522_vm6 = vweird.f32 %v2500_v28 }
 0x5a4   :  { %v2484_v38 = vpop.f32.mrf.mxu2  ;;  %4292 = vrcp.f32 %v5982_v43  ;;  %v7063_v18 = vld [vmem:[#allocation102_spill] sm:$0xff]  ;;  %vm2537_vm14 = vweird.f32 %v5982_v43 }
 0x5a5   :  { %v7064_v38 = vld [vmem:[#allocation106_spill] sm:$0xff] }
 0x5a6   :  { %v4289_v27 = vpop.eup %4288  ;;  %v2576_v45 = vpop.f32.mrf.mxu0  ;;  %v446_v56 = vadd.f32 %v7064_v38, %v7063_v18 }
 0x5a7   :  { %v2499_v11 = vadd.f32 1.0, %v4289_v27  ;;  %v2607_v7 = vadd.f32 %v2576_v45, %v2401_v48 }
 0x5a8   :  { %v2589_v47 = vpop.f32.mrf.mxu1  ;;  %v2489_v40 = vadd.f32 %v2482_v5, %v446_v56 }
 0x5a9   :  { %v4291_v4 = vpop.eup %4290  ;;  %4294 = vrcp.f32 %v2499_v11  ;;  %v3997_v14 = vmul.f32 -1.442695, %v2607_v7  ;;  %v2513_v56 = vand.u32 2147483648, %v2499_v11  ;;  %v2511_v5 = vand.u32 2147483647, %v2499_v11 }
 0x5aa   :  { %v2518_v1 = vmul.f32 %v4291_v4, %v2500_v28  ;;  %v5991_v27 = vpop.eup %4292  ;;  %vm2523_vm5 = vweird.f32 %v4291_v4  ;;  %vm2507_vm9 = vweird.f32 %v2499_v11 }
 0x5ab   :  { %4296 = vpow2.f32 %v3997_v14  ;;  %v2528_v14 = vand.u32 2147483648, %v2500_v28  ;;  %v2533_v38 = vmul.f32 %v5991_v27, %v5982_v43  ;;  %vm5996_vm7 = vmor %vm2522_vm6, %vm2523_vm5  ;;  %vm2512_vm12 = vcmp.eq.f32.partialorder %v2511_v5, 8.507059e+37 }
 0x5ac   :  { %v2519_v59 = vsub.f32 1.0, %v2518_v1  ;;  %v2563_v32 = vpop.f32.mrf.mxu3  ;;  %vm2538_vm13 = vweird.f32 %v5991_v27 }
 0x5ad   :  { %v2606_v37 = vadd.f32 %v2563_v32, %v2388_v22  ;;  %v2608_v22 = vadd.f32 %v2589_v47, %v2414_v39  ;;  %v2529_v47 = vor.u32 1.1754944e-38, %v2528_v14  ;;  %vm2539_vm15 = vmor %vm2537_vm14, %vm2538_vm13 }
 0x5ae   :  { %v5989_v46 = vpop.f32.mrf.mxu2  ;;  %v2520_v48 = vmul.f32 %v4291_v4, %v2519_v59  ;;  %v2578_v45 = vpop.f32.mrf.mxu0  ;;  %v2526_v59 = vand.u32 2147483647, %v2500_v28 }
 0x5af   :  { %v4295_v13 = vpop.eup %4294  ;;  %v3996_v7 = vmul.f32 -1.442695, %v2606_v37  ;;  %v2541_v45 = vand.u32 2147483647, %v5982_v43 }
 0x5b0   :  { %v2591_v12 = vpop.f32.mrf.mxu1  ;;  %v2503_v17 = vmul.f32 %v4295_v13, %v2499_v11  ;;  %v2521_v1 = vadd.f32 %v4291_v4, %v2520_v48  ;;  %vm2508_vm8 = vweird.f32 %v4295_v13  ;;  %v2534_v48 = vsub.f32 1.0, %v2533_v38 }
 0x5b1   :  { %4298 = vpow2.f32 %v3996_v7  ;;  %v4297_v32 = vpop.eup %4296  ;;  %v3998_v7 = vmul.f32 -1.442695, %v2608_v22  ;;  %vm2527_vm10 = vcmp.eq.f32.partialorder %v2526_v59, 8.507059e+37  ;;  %vm2509_vm11 = vmor %vm2507_vm9, %vm2508_vm8  ;;  %vm2542_vm0 = vcmp.eq.f32.partialorder %v2541_v45, 8.507059e+37 }
 0x5b2   :  { %v2504_v18 = vsub.f32 1.0, %v2503_v17  ;;  %4300 = vtanh.f32 %v2489_v40  ;;  %v6000_v12 = vadd.f32 1.0, %v4297_v32  ;;  %v2525_v37 = vsel %vm5996_vm7, %v4291_v4, %v2521_v1 }
 0x5b3   :  { %v2514_v40 = vor.u32 1.1754944e-38, %v2513_v56  ;;  %v2530_v32 = vsel %vm2527_vm10, %v2529_v47, %v2525_v37  ;;  %v2535_v4 = vmul.f32 %v5991_v27, %v2534_v48 }
 0x5b4   :  { %v2505_v2 = vmul.f32 %v4295_v13, %v2504_v18  ;;  %v2565_v39 = vpop.f32.mrf.mxu3  ;;  %4302 = vrcp.f32 %v6000_v12  ;;  %v2548_v14 = vmul.f32 %v2530_v32, %v5838_v15  ;;  %vm2642_vm5 = vweird.f32 %v6000_v12 }
 0x5b5   :  { %4304 = vpow2.f32 %v3998_v7  ;;  %v2536_v59 = vadd.f32 %v5991_v27, %v2535_v4 }
 0x5b6   :  { %v2604_v17 = vpop.f32.mrf.mxu2  ;;  %v2506_v28 = vadd.f32 %v4295_v13, %v2505_v2 }
 0x5b7   :  { %v4299_v3 = vpop.eup %4298  ;;  %v2540_v56 = vsel %vm2539_vm15, %v5991_v27, %v2536_v59  ;;  %v2646_v59 = vand.u32 2147483647, %v6000_v12 }
 0x5b8   :  { %v2510_v18 = vsel %vm2509_vm11, %v4295_v13, %v2506_v28  ;;  %v2619_v41 = vadd.f32 1.0, %v4299_v3  ;;  %v4301_v55 = vpop.eup %4300  ;;  %v2543_v13 = vand.u32 2147483648, %v5982_v43  ;;  %v2427_v43 = vadd.f32 %v5974_v23, %v5345_v6 }
 0x5b9   :  { %v2515_v1 = vsel %vm2512_vm12, %v2514_v40, %v2510_v18  ;;  %vm2647_vm8 = vcmp.eq.f32.partialorder %v2646_v59, 8.507059e+37  ;;  %v7079_v59 = vld [vmem:[#allocation66_spill] sm:$0xff] }
 0x5ba   :  { %v2549_v38 = vmul.f32 %v4301_v55, %v2515_v1  ;;  %4306 = vrcp.f32 %v2619_v41  ;;  %v6007_v11 = vpop.eup %4302  ;;  %v2544_v5 = vor.u32 1.1754944e-38, %v2543_v13  ;;  %v2609_v27 = vadd.f32 %v5989_v46, %v2427_v43  ;;  %v7076_v46 = vld [vmem:[#allocation62_spill] sm:$0xff] }
 0x5bb   :  { %v4305_v3 = vpop.eup %4304  ;;  %v2638_v15 = vmul.f32 %v6007_v11, %v6000_v12  ;;  %v2633_v4 = vand.u32 2147483648, %v2619_v41  ;;  %vm2643_vm2 = vweird.f32 %v6007_v11  ;;  %vm2627_vm3 = vweird.f32 %v2619_v41 }
 0x5bc   :  { %v6009_v22 = vadd.f32 %v2549_v38, %v2548_v14  ;;  %v6020_v39 = vadd.f32 1.0, %v4305_v3  ;;  %v2545_v7 = vsel %vm2542_vm0, %v2544_v5, %v2540_v56  ;;  %v2631_v1 = vand.u32 2147483647, %v2619_v41  ;;  %vm2644_vm6 = vmor %vm2642_vm5, %vm2643_vm2 }
 0x5bd   :  { %v2639_v37 = vsub.f32 1.0, %v2638_v15  ;;  %v2648_v14 = vand.u32 2147483648, %v6000_v12  ;;  %v2634_v13 = vor.u32 1.1754944e-38, %v2633_v4  ;;  %v7072_v4 = vld [vmem:[#allocation56_spill] sm:$0xff] }
 0x5be   :  { %4308 = vtanh.f32 %v6009_v22  ;;  %vm2632_vm7 = vcmp.eq.f32.partialorder %v2631_v1, 8.507059e+37  ;;  %vm2657_vm10 = vweird.f32 %v6020_v39  ;;  %v7073_v1 = vld [vmem:[#allocation57_spill] sm:$0xff] }
 0x5bf   :  { %v2640_v32 = vmul.f32 %v6007_v11, %v2639_v37  ;;  %4310 = vrcp.f32 %v6020_v39  ;;  %v2649_v45 = vor.u32 1.1754944e-38, %v2648_v14  ;;  %v7075_v14 = vld [vmem:[#allocation60_spill] sm:$0xff] }
 0x5c0   :  { %v4307_v55 = vpop.eup %4306  ;;  %4312 = vtanh.f32 %v2609_v27 }
 0x5c1   :  { %v2623_v2 = vmul.f32 %v4307_v55, %v2619_v41  ;;  %vm2628_vm1 = vweird.f32 %v4307_v55  ;;  %v2641_v23 = vadd.f32 %v6007_v11, %v2640_v32  ;;  %v7070_v32 = vld [vmem:[#allocation127_spill] sm:$0xff] }
 0x5c2   :  { %vm6032_vm4 = vmor %vm2627_vm3, %vm2628_vm1 }
 0x5c3   :  { %v2624_v47 = vsub.f32 1.0, %v2623_v2  ;;  %v2645_v3 = vsel %vm2644_vm6, %v6007_v11, %v2641_v23  ;;  %v7074_v23 = vld [vmem:[#allocation58_spill] sm:$0xff] }
 0x5c4   :  { %v4309_v48 = vpop.eup %4308 }
 0x5c5   :  { %v2552_v17 = vmul.f32 %v4309_v48, %v2545_v7  ;;  %v2625_v28 = vmul.f32 %v4307_v55, %v2624_v47  ;;  %v4311_v38 = vpop.eup %4310  ;;  %v2663_v48 = vand.u32 2147483648, %v6020_v39  ;;  %v2661_v7 = vand.u32 2147483647, %v6020_v39 }
 0x5c6   :  { %v2653_v15 = vmul.f32 %v4311_v38, %v6020_v39  ;;  %v4313_v12 = vpop.eup %4312  ;;  %vm2658_vm9 = vweird.f32 %v4311_v38 }
 0x5c7   :  { %v2673_v40 = vpack.c.bf16 %v2552_v17, %v2552_v17  ;;  %v2626_v18 = vadd.f32 %v4307_v55, %v2625_v28  ;;  %vm2659_vm11 = vmor %vm2657_vm10, %vm2658_vm9  ;;  %v2664_v43 = vor.u32 1.1754944e-38, %v2663_v48  ;;  %vm2662_vm12 = vcmp.eq.f32.partialorder %v2661_v7, 8.507059e+37  ;;  %v7092_v48 = vld [vmem:[#allocation84_spill] sm:$0xff]  ;;  %v7093_v7 = vld [vmem:[#allocation85_spill] sm:$0xff] }
 0x5c8   :  { %v2654_v11 = vsub.f32 1.0, %v2653_v15  ;;  %v7083_v15 = vld [vmem:[#allocation70_spill] sm:$0xff] }
 0x5c9   :  { %2682 = vmatmul.bf16.vlgmr.msrb.gmra.mxu3 %v2673_v40  ;;  %2695 = vmatmul.bf16.vlgmr.msrb.gmra.mxu0 %v2673_v40  ;;  %v2630_v41 = vsel %vm6032_vm4, %v4307_v55, %v2626_v18  ;;  %v2650_v55 = vsel %vm2647_vm8, %v2649_v45, %v2645_v3  ;;  %v7071_v18 = vld [vmem:[#allocation55_spill] sm:$0xff]  ;;  %v7081_v3 = vld [vmem:[#allocation68_spill] sm:$0xff]  ;;  %v7082_v45 = vld [vmem:[#allocation69_spill] sm:$0xff] }
 0x5ca   :  { %2708 = vmatmul.bf16.vlgmr.msrb.gmra.mxu1 %v2673_v40  ;;  %2721 = vmatmul.bf16.vlgmr.msra.gmra.mxu2 %v2673_v40  ;;  %v2635_v56 = vsel %vm2632_vm7, %v2634_v13, %v2630_v41  ;;  %v2668_v5 = vmul.f32 %v2650_v55, %v5884_v31  ;;  %v2655_v47 = vmul.f32 %v4311_v38, %v2654_v11  ;;  %v7078_v41 = vld [vmem:[#allocation64_spill] sm:$0xff]  ;;  %v7080_v13 = vld [vmem:[#allocation67_spill] sm:$0xff]  ;;  %v7088_v11 = vld [vmem:[#allocation78_spill] sm:$0xff] }
 0x5cb   :  { %2850 = vmatpush.bf16.msrb.mxu3 %v5110_v20  ;;  %2863 = vmatpush.bf16.msrb.mxu0 %v5112_v57  ;;  %v2669_v2 = vmul.f32 %v4313_v12, %v2635_v56  ;;  %v7084_v56 = vld [vmem:[#allocation72_spill] sm:$0xff]  ;;  %v7085_v12 = vld [vmem:[#allocation73_spill] sm:$0xff] }
 0x5cc   :  { %2876 = vmatpush.bf16.msrb.mxu1 %v6759_v51  ;;  %2889 = vmatpush.bf16.msra.mxu2 %v6760_v26  ;;  %v2656_v31 = vadd.f32 %v4311_v38, %v2655_v47  ;;  %v7086_v55 = vld [vmem:[#allocation76_spill] sm:$0xff] }
 0x5cd   :  { %v6055_v37 = vadd.f32 %v2669_v2, %v2668_v5  ;;  %v7087_v2 = vld [vmem:[#allocation77_spill] sm:$0xff]  ;;  %v7089_v5 = vld [vmem:[#allocation79_spill] sm:$0xff]  ;;  %v7090_v47 = vld [vmem:[#allocation80_spill] sm:$0xff] }
 0x5ce   :  { %v2660_v17 = vsel %vm2659_vm11, %v4311_v38, %v2656_v31  ;;  %v7077_v38 = vld [vmem:[#allocation63_spill] sm:$0xff]  ;;  %v7091_v31 = vld [vmem:[#allocation82_spill] sm:$0xff] }
 0x5cf   :  { %2851 = vmatpush.bf16.msrb.mxu3 %v6761_v50  ;;  %2864 = vmatpush.bf16.msrb.mxu0 %v6762_v60  ;;  %4314 = vtanh.f32 %v6055_v37 }
 0x5d0   :  { %2877 = vmatpush.bf16.msrb.mxu1 %v6763_v63  ;;  %2890 = vmatpush.bf16.msra.mxu2 %v6764_v58 }
 0x5d3   :  { %2852 = vmatpush.bf16.msrb.mxu3 %v6765_v35  ;;  %2865 = vmatpush.bf16.msrb.mxu0 %v6766_v0 }
 0x5d4   :  { %2878 = vmatpush.bf16.msrb.mxu1 %v5142_v24  ;;  %2891 = vmatpush.bf16.msra.mxu2 %v6767_v16 }
 0x5d5   :  { %v4315_v28 = vpop.eup %4314 }
 0x5d7   :  { %2853 = vmatpush.bf16.msrb.mxu3 %v6768_v53  ;;  %2866 = vmatpush.bf16.msrb.mxu0 %v6769_v34 }
 0x5d8   :  { %2879 = vmatpush.bf16.msrb.mxu1 %v6770_v9  ;;  %2892 = vmatpush.bf16.msra.mxu2 %v6771_v62 }
 0x5d9   :  { %2738 = vmatmul.bf16.vlgmr.msra.gmra.mxu3 %v2673_v40  ;;  %2751 = vmatmul.bf16.vlgmr.msra.gmra.mxu0 %v2673_v40 }
 0x5da   :  { %2764 = vmatmul.bf16.vlgmr.msra.gmra.mxu1 %v2673_v40  ;;  %2777 = vmatmul.bf16.vlgmr.msrb.gmra.mxu2 %v2673_v40  ;;  %v2665_v40 = vsel %vm2662_vm12, %v2664_v43, %v2660_v17  ;;  %v7094_v17 = vld [vmem:[#allocation86_spill] sm:$0xff]  ;;  %v7096_v43 = vld [vmem:[#allocation89_spill] sm:$0xff] }
 0x5db   :  { %2854 = vmatpush.bf16.msrb.mxu3 %v6772_v33  ;;  %2867 = vmatpush.bf16.msrb.mxu0 %v6773_v44  ;;  %v2672_v39 = vmul.f32 %v4315_v28, %v2665_v40  ;;  %v7095_v28 = vld [vmem:[#allocation88_spill] sm:$0xff]  ;;  %v7097_v40 = vld [vmem:[#allocation90_spill] sm:$0xff] }
 0x5dc   :  { %2880 = vmatpush.bf16.msrb.mxu1 %v6774_v36  ;;  %2893 = vmatpush.bf16.msra.mxu2 %v6775_v42 }
 0x5dd   :  { %v2849_v27 = vpack.c.bf16 %v2672_v39, %v2672_v39  ;;  %v7098_v39 = vld [vmem:[#allocation91_spill] sm:$0xff] }
 0x5df   :  { %2855 = vmatpush.bf16.msrb.mxu3 %v6776_v29  ;;  %2868 = vmatpush.bf16.msrb.mxu0 %v6777_v19 }
 0x5e0   :  { %2881 = vmatpush.bf16.msrb.mxu1 %v5182_v52  ;;  %2894 = vmatpush.bf16.msra.mxu2 %v5184_v30 }
 0x5e3   :  { %2856 = vmatpush.bf16.msrb.mxu3 %v5188_v25  ;;  %2869 = vmatpush.bf16.msrb.mxu0 %v5190_v49 }
 0x5e4   :  { %2882 = vmatpush.bf16.msrb.mxu1 %v5194_v10  ;;  %2895 = vmatpush.bf16.msra.mxu2 %v5196_v54 }
 0x5e7   :  { %2857 = vmatpush.bf16.msrb.mxu3 %v5200_v8  ;;  %2870 = vmatpush.bf16.msrb.mxu0 %v5202_v61 }
 0x5e8   :  { %2883 = vmatpush.bf16.msrb.mxu1 %v5206_v21  ;;  %2896 = vmatpush.bf16.msra.mxu2 %v7070_v32 }
 0x5ea   :  { %2858 = vmatmul.bf16.vlgmr.msrb.gmra.mxu3 %v2849_v27  ;;  %2871 = vmatmul.bf16.vlgmr.msrb.gmra.mxu0 %v2849_v27 }
 0x5eb   :  { %2970 = vmatpush.bf16.msra.mxu3 %v7071_v18  ;;  %2983 = vmatpush.bf16.msra.mxu0 %v7072_v4 }
 0x5ec   :  { %2884 = vmatmul.bf16.vlgmr.msrb.gmra.mxu1 %v2849_v27  ;;  %2897 = vmatmul.bf16.vlgmr.msra.gmra.mxu2 %v2849_v27  ;;  %v7099_v27 = vld [vmem:[#allocation92_spill] sm:$0xff] }
 0x5ed   :  { %2996 = vmatpush.bf16.msra.mxu1 %v7073_v1  ;;  %3009 = vmatpush.bf16.msrb.mxu2 %v7074_v23 }
 0x5ef   :  { %2971 = vmatpush.bf16.msra.mxu3 %v7075_v14  ;;  %2984 = vmatpush.bf16.msra.mxu0 %v7076_v46  ;;  %v7141_v14 = vld [vmem:[#allocation107_spill] sm:$0xff] }
 0x5f1   :  { %2997 = vmatpush.bf16.msra.mxu1 %v7077_v38  ;;  %3010 = vmatpush.bf16.msrb.mxu2 %v7078_v41 }
 0x5f3   :  { %2972 = vmatpush.bf16.msra.mxu3 %v7079_v59  ;;  %2985 = vmatpush.bf16.msra.mxu0 %v7080_v13 }
 0x5f5   :  { %2998 = vmatpush.bf16.msra.mxu1 %v7081_v3  ;;  %3011 = vmatpush.bf16.msrb.mxu2 %v7082_v45 }
 0x5f7   :  { %2973 = vmatpush.bf16.msra.mxu3 %v7083_v15  ;;  %2986 = vmatpush.bf16.msra.mxu0 %v7084_v56 }
 0x5f9   :  { %2999 = vmatpush.bf16.msra.mxu1 %v7085_v12  ;;  %3012 = vmatpush.bf16.msrb.mxu2 %v7086_v55  ;;  %v7135_v12 = vld [vmem:[#allocation93_spill] sm:$0xff] }
 0x5fb   :  { %2974 = vmatpush.bf16.msra.mxu3 %v7087_v2  ;;  %2987 = vmatpush.bf16.msra.mxu0 %v7088_v11 }
 0x5fd   :  { %3000 = vmatpush.bf16.msra.mxu1 %v7089_v5  ;;  %3013 = vmatpush.bf16.msrb.mxu2 %v7090_v47  ;;  %v7100_v5 = vld [vmem:[#allocation94_spill] sm:$0xff]  ;;  %v7101_v47 = vld [vmem:[#allocation20_spill] sm:$0xff] }
 0x5ff   :  { %2975 = vmatpush.bf16.msra.mxu3 %v7091_v31  ;;  %2988 = vmatpush.bf16.msra.mxu0 %v7092_v48  ;;  %v7102_v31 = vld [vmem:[#allocation21_spill] sm:$0xff]  ;;  %v7103_v48 = vld [vmem:[#allocation95_spill] sm:$0xff] }
 0x601   :  { %3001 = vmatpush.bf16.msra.mxu1 %v7093_v7  ;;  %3014 = vmatpush.bf16.msrb.mxu2 %v7094_v17  ;;  %v7104_v7 = vld [vmem:[#allocation98_spill] sm:$0xff]  ;;  %v7105_v17 = vld [vmem:[#allocation13_spill] sm:$0xff] }
 0x603   :  { %2976 = vmatpush.bf16.msra.mxu3 %v7095_v28  ;;  %2989 = vmatpush.bf16.msra.mxu0 %v7096_v43  ;;  %v7106_v28 = vld [vmem:[#allocation35_spill] sm:$0xff] }
 0x604   :  { %v7107_v43 = vld [vmem:[#allocation23_spill] sm:$0xff] }
 0x605   :  { %3002 = vmatpush.bf16.msra.mxu1 %v7097_v40  ;;  %3015 = vmatpush.bf16.msrb.mxu2 %v7098_v39  ;;  %v7108_v40 = vld [vmem:[#allocation24_spill] sm:$0xff]  ;;  %v7109_v39 = vld [vmem:[#allocation14_spill] sm:$0xff] }
 0x607   :  { %2977 = vmatpush.bf16.msra.mxu3 %v7099_v27  ;;  %2990 = vmatpush.bf16.msra.mxu0 %v7100_v5  ;;  %v7110_v27 = vld [vmem:[#allocation37_spill] sm:$0xff] }
 0x608   :  { %v7111_v5 = vld [vmem:[#allocation25_spill] sm:$0xff] }
 0x609   :  { %3003 = vmatpush.bf16.msra.mxu1 %v7103_v48  ;;  %3016 = vmatpush.bf16.msrb.mxu2 %v7104_v7  ;;  %v7114_v48 = vld [vmem:[#allocation39_spill] sm:$0xff] }
 0x60a   :  { %v7115_v7 = vld [vmem:[#allocation27_spill] sm:$0xff] }
 0x60b   :  { %3026 = vmatpush.bf16.msrb.mxu3 %v7101_v47  ;;  %3039 = vmatpush.bf16.msrb.mxu0 %v7102_v31  ;;  %v7112_v47 = vld [vmem:[#allocation26_spill] sm:$0xff]  ;;  %v7113_v31 = vld [vmem:[#allocation15_spill] sm:$0xff] }
 0x60d   :  { %3052 = vmatpush.bf16.msrb.mxu1 %v7105_v17  ;;  %3065 = vmatpush.bf16.msra.mxu2 %v7106_v28  ;;  %v7116_v17 = vld [vmem:[#allocation28_spill] sm:$0xff] }
 0x60e   :  { %v7117_v28 = vld [vmem:[#allocation16_spill] sm:$0xff] }
 0x60f   :  { %3027 = vmatpush.bf16.msrb.mxu3 %v7107_v43  ;;  %3040 = vmatpush.bf16.msrb.mxu0 %v7108_v40  ;;  %v7118_v43 = vld [vmem:[#allocation40_spill] sm:$0xff]  ;;  %v7119_v40 = vld [vmem:[#allocation29_spill] sm:$0xff] }
 0x611   :  { %3053 = vmatpush.bf16.msrb.mxu1 %v7109_v39  ;;  %3066 = vmatpush.bf16.msra.mxu2 %v7110_v27  ;;  %v7120_v39 = vld [vmem:[#allocation30_spill] sm:$0xff]  ;;  %v7121_v27 = vld [vmem:[#allocation17_spill] sm:$0xff] }
 0x613   :  { %3028 = vmatpush.bf16.msrb.mxu3 %v7111_v5  ;;  %3041 = vmatpush.bf16.msrb.mxu0 %v7112_v47  ;;  %v7122_v5 = vld [vmem:[#allocation41_spill] sm:$0xff]  ;;  %v7123_v47 = vld [vmem:[#allocation31_spill] sm:$0xff] }
 0x615   :  { %3054 = vmatpush.bf16.msrb.mxu1 %v7113_v31  ;;  %3067 = vmatpush.bf16.msra.mxu2 %v7114_v48  ;;  %v7124_v31 = vld [vmem:[#allocation32_spill] sm:$0xff]  ;;  %v7125_v48 = vld [vmem:[#allocation18_spill] sm:$0xff] }
 0x617   :  { %3029 = vmatpush.bf16.msrb.mxu3 %v7115_v7  ;;  %3042 = vmatpush.bf16.msrb.mxu0 %v7116_v17  ;;  %v7126_v7 = vld [vmem:[#allocation42_spill] sm:$0xff]  ;;  %v7127_v17 = vld [vmem:[#allocation33_spill] sm:$0xff] }
 0x619   :  { %3055 = vmatpush.bf16.msrb.mxu1 %v7117_v28  ;;  %3068 = vmatpush.bf16.msra.mxu2 %v7118_v43  ;;  %v7128_v28 = vld [vmem:[#allocation36_spill] sm:$0xff]  ;;  %v7129_v43 = vld [vmem:[#allocation19_spill] sm:$0xff] }
 0x61b   :  { %3030 = vmatpush.bf16.msrb.mxu3 %v7119_v40  ;;  %3043 = vmatpush.bf16.msrb.mxu0 %v7120_v39  ;;  %v7130_v40 = vld [vmem:[#allocation43_spill] sm:$0xff]  ;;  %v7131_v39 = vld [vmem:[#allocation34_spill] sm:$0xff] }
 0x61d   :  { %3056 = vmatpush.bf16.msrb.mxu1 %v7121_v27  ;;  %3069 = vmatpush.bf16.msra.mxu2 %v7122_v5  ;;  %v7132_v27 = vld [vmem:[#allocation38_spill] sm:$0xff] }
 0x61e   :  { %v7133_v5 = vld [vmem:[#allocation22_spill] sm:$0xff] }
 0x61f   :  { %3031 = vmatpush.bf16.msrb.mxu3 %v7123_v47  ;;  %3044 = vmatpush.bf16.msrb.mxu0 %v7124_v31  ;;  %v7134_v47 = vld [vmem:[#allocation44_spill] sm:$0xff] }
 0x621   :  { %3057 = vmatpush.bf16.msrb.mxu1 %v7125_v48  ;;  %3070 = vmatpush.bf16.msra.mxu2 %v7126_v7 }
 0x623   :  { %3032 = vmatpush.bf16.msrb.mxu3 %v7127_v17  ;;  %3045 = vmatpush.bf16.msrb.mxu0 %v7128_v28 }
 0x625   :  { %3058 = vmatpush.bf16.msrb.mxu1 %v7129_v43  ;;  %3071 = vmatpush.bf16.msra.mxu2 %v7130_v40 }
 0x627   :  { %3033 = vmatpush.bf16.msrb.mxu3 %v7131_v39  ;;  %3046 = vmatpush.bf16.msrb.mxu0 %v7132_v27  ;;  %v7136_v39 = vld [vmem:[#allocation96_spill] sm:$0xff] }
 0x629   :  { %3059 = vmatpush.bf16.msrb.mxu1 %v7133_v5  ;;  %3072 = vmatpush.bf16.msra.mxu2 %v7134_v47  ;;  %v7137_v47 = vld [vmem:[#allocation87_spill] sm:$0xff] }
 0x646   :  { %v2696_v31 = vpop.f32.mrf.mxu0 }
 0x647   :  { %v2709_v48 = vpop.f32.mrf.mxu1 }
 0x64c   :  { %v2683_v11 = vpop.f32.mrf.mxu3 }
 0x64d   :  { %v6145_v7 = vpop.f32.mrf.mxu2 }
 0x64e   :  { %v2698_v17 = vpop.f32.mrf.mxu0 }
 0x64f   :  { %v2711_v2 = vpop.f32.mrf.mxu1 }
 0x654   :  { %v2685_v28 = vpop.f32.mrf.mxu3 }
 0x655   :  { %v2724_v55 = vpop.f32.mrf.mxu2 }
 0x656   :  { %v2752_v43 = vpop.f32.mrf.mxu0 }
 0x657   :  { %v2783_v40 = vadd.f32 %v2752_v43, %v7135_v12  ;;  %v2765_v56 = vpop.f32.mrf.mxu1 }
 0x658   :  { %v2784_v15 = vadd.f32 %v2765_v56, %v7136_v39 }
 0x659   :  { %v4000_v27 = vmul.f32 -1.442695, %v2783_v40  ;;  %v7138_v40 = vld [vmem:[#allocation47_spill] sm:$0xff] }
 0x65a   :  { %v4001_v45 = vmul.f32 -1.442695, %v2784_v15  ;;  %v2697_v15 = vadd.f32 %v2696_v31, %v7138_v40 }
 0x65b   :  { %4316 = vpow2.f32 %v4000_v27 }
 0x65c   :  { %4318 = vpow2.f32 %v4001_v45  ;;  %v2739_v5 = vpop.f32.mrf.mxu3 }
 0x65d   :  { %v2782_v3 = vadd.f32 %v2739_v5, %v7137_v47  ;;  %v2778_v13 = vpop.f32.mrf.mxu2  ;;  %v7139_v47 = vld [vmem:[#allocation49_spill] sm:$0xff] }
 0x65e   :  { %v2754_v59 = vpop.f32.mrf.mxu0  ;;  %v2785_v23 = vadd.f32 %v2778_v13, %v7141_v14 }
 0x65f   :  { %v3999_v41 = vmul.f32 -1.442695, %v2782_v3  ;;  %v2767_v17 = vpop.f32.mrf.mxu1 }
 0x660   :  { %v2684_v17 = vadd.f32 %v2683_v11, %v7139_v47 }
 0x661   :  { %v4317_v2 = vpop.eup %4316  ;;  %4320 = vpow2.f32 %v3999_v41 }
 0x662   :  { %v4319_v55 = vpop.eup %4318  ;;  %v2796_v28 = vadd.f32 1.0, %v4317_v2 }
 0x663   :  { %v6150_v43 = vadd.f32 1.0, %v4319_v55 }
 0x664   :  { %4322 = vrcp.f32 %v2796_v28  ;;  %v2741_v12 = vpop.f32.mrf.mxu3  ;;  %vm2818_vm14 = vweird.f32 %v2796_v28 }
 0x665   :  { %v2780_v56 = vpop.f32.mrf.mxu2  ;;  %4324 = vrcp.f32 %v6150_v43  ;;  %vm2833_vm6 = vweird.f32 %v6150_v43 }
 0x667   :  { %v4321_v39 = vpop.eup %4320  ;;  %v2872_v45 = vpop.f32.mrf.mxu0 }
 0x668   :  { %v2795_v27 = vadd.f32 1.0, %v4321_v39  ;;  %v2903_v38 = vadd.f32 %v2872_v45, %v2697_v15  ;;  %v7140_v45 = vld [vmem:[#allocation46_spill] sm:$0xff] }
 0x669   :  { %v2885_v5 = vpop.f32.mrf.mxu1  ;;  %v2710_v46 = vadd.f32 %v2709_v48, %v7140_v45 }
 0x66a   :  { %v4323_v59 = vpop.eup %4322  ;;  %4326 = vrcp.f32 %v2795_v27  ;;  %v4003_v41 = vmul.f32 -1.442695, %v2903_v38  ;;  %v2809_v14 = vand.u32 2147483648, %v2795_v27  ;;  %v2807_v48 = vand.u32 2147483647, %v2795_v27 }
 0x66b   :  { %v2814_v3 = vmul.f32 %v4323_v59, %v2796_v28  ;;  %v6157_v31 = vpop.eup %4324  ;;  %vm2819_vm13 = vweird.f32 %v4323_v59  ;;  %vm2803_vm1 = vweird.f32 %v2795_v27 }
 0x66c   :  { %4328 = vpow2.f32 %v4003_v41  ;;  %v2829_v41 = vmul.f32 %v6157_v31, %v6150_v43  ;;  %vm6163_vm15 = vmor %vm2818_vm14, %vm2819_vm13  ;;  %vm2808_vm4 = vcmp.eq.f32.partialorder %v2807_v48, 8.507059e+37  ;;  %vm2834_vm5 = vweird.f32 %v6157_v31 }
 0x66d   :  { %v2815_v2 = vsub.f32 1.0, %v2814_v3  ;;  %v2859_v55 = vpop.f32.mrf.mxu3  ;;  %v2824_v3 = vand.u32 2147483648, %v2796_v28  ;;  %vm2835_vm7 = vmor %vm2833_vm6, %vm2834_vm5 }
 0x66e   :  { %v2902_v12 = vadd.f32 %v2859_v55, %v2684_v17  ;;  %v2904_v17 = vadd.f32 %v2885_v5, %v2710_v46  ;;  %v2830_v5 = vsub.f32 1.0, %v2829_v41 }
 0x66f   :  { %v6155_v56 = vpop.f32.mrf.mxu2  ;;  %v2816_v40 = vmul.f32 %v4323_v59, %v2815_v2  ;;  %v2874_v39 = vpop.f32.mrf.mxu0 }
 0x670   :  { %v4327_v15 = vpop.eup %4326  ;;  %v4002_v1 = vmul.f32 -1.442695, %v2902_v12  ;;  %v2822_v39 = vand.u32 2147483647, %v2796_v28  ;;  %v4004_v12 = vmul.f32 -1.442695, %v2904_v17 }
 0x671   :  { %v2887_v4 = vpop.f32.mrf.mxu1  ;;  %v2799_v38 = vmul.f32 %v4327_v15, %v2795_v27  ;;  %v2817_v11 = vadd.f32 %v4323_v59, %v2816_v40  ;;  %vm2804_vm0 = vweird.f32 %v4327_v15 }
 0x672   :  { %4330 = vpow2.f32 %v4002_v1  ;;  %v4329_v55 = vpop.eup %4328  ;;  %v2825_v1 = vor.u32 1.1754944e-38, %v2824_v3  ;;  %vm2823_vm2 = vcmp.eq.f32.partialorder %v2822_v39, 8.507059e+37  ;;  %vm2805_vm3 = vmor %vm2803_vm1, %vm2804_vm0  ;;  %v2837_v39 = vand.u32 2147483647, %v6150_v43 }
 0x673   :  { %v2800_v2 = vsub.f32 1.0, %v2799_v38  ;;  %4332 = vtanh.f32 %v2785_v23  ;;  %v6167_v4 = vadd.f32 1.0, %v4329_v55  ;;  %v2821_v40 = vsel %vm6163_vm15, %v4323_v59, %v2817_v11 }
 0x674   :  { %v2810_v23 = vor.u32 1.1754944e-38, %v2809_v14  ;;  %v2826_v55 = vsel %vm2823_vm2, %v2825_v1, %v2821_v40  ;;  %v2831_v59 = vmul.f32 %v6157_v31, %v2830_v5  ;;  %vm2838_vm8 = vcmp.eq.f32.partialorder %v2837_v39, 8.507059e+37 }
 0x675   :  { %v2801_v13 = vmul.f32 %v4327_v15, %v2800_v2  ;;  %v2861_v46 = vpop.f32.mrf.mxu3  ;;  %4334 = vrcp.f32 %v6167_v4  ;;  %v2844_v11 = vmul.f32 %v2826_v55, %v6009_v22  ;;  %vm2938_vm13 = vweird.f32 %v6167_v4 }
 0x676   :  { %4336 = vpow2.f32 %v4004_v12  ;;  %v2832_v17 = vadd.f32 %v6157_v31, %v2831_v59 }
 0x677   :  { %v2900_v38 = vpop.f32.mrf.mxu2  ;;  %v2802_v28 = vadd.f32 %v4327_v15, %v2801_v13 }
 0x678   :  { %v4331_v45 = vpop.eup %4330  ;;  %v2836_v14 = vsel %vm2835_vm7, %v6157_v31, %v2832_v17  ;;  %v2942_v17 = vand.u32 2147483647, %v6167_v4 }
 0x679   :  { %v2806_v2 = vsel %vm2805_vm3, %v4327_v15, %v2802_v28  ;;  %v2915_v18 = vadd.f32 1.0, %v4331_v45  ;;  %v4333_v32 = vpop.eup %4332  ;;  %v2839_v15 = vand.u32 2147483648, %v6150_v43  ;;  %v2723_v43 = vadd.f32 %v6145_v7, %v5345_v6 }
 0x67a   :  { %v2811_v47 = vsel %vm2808_vm4, %v2810_v23, %v2806_v2  ;;  %vm2943_vm0 = vcmp.eq.f32.partialorder %v2942_v17, 8.507059e+37  ;;  %v7155_v17 = vld [vmem:[#allocation66_spill] sm:$0xff] }
 0x67b   :  { %v2845_v3 = vmul.f32 %v4333_v32, %v2811_v47  ;;  %4338 = vrcp.f32 %v2915_v18  ;;  %v6174_v27 = vpop.eup %4334  ;;  %v2840_v48 = vor.u32 1.1754944e-38, %v2839_v15  ;;  %v2905_v31 = vadd.f32 %v6155_v56, %v2723_v43  ;;  %v7152_v56 = vld [vmem:[#allocation62_spill] sm:$0xff] }
 0x67c   :  { %v4337_v45 = vpop.eup %4336  ;;  %v2934_v22 = vmul.f32 %v6174_v27, %v6167_v4  ;;  %v2929_v59 = vand.u32 2147483648, %v2915_v18  ;;  %vm2939_vm10 = vweird.f32 %v6174_v27  ;;  %vm2923_vm11 = vweird.f32 %v2915_v18 }
 0x67d   :  { %v6176_v41 = vadd.f32 %v2845_v3, %v2844_v11  ;;  %v6187_v46 = vadd.f32 1.0, %v4337_v45  ;;  %v2841_v12 = vsel %vm2838_vm8, %v2840_v48, %v2836_v14  ;;  %v2927_v47 = vand.u32 2147483647, %v2915_v18  ;;  %vm2940_vm14 = vmor %vm2938_vm13, %vm2939_vm10 }
 0x67e   :  { %v2935_v40 = vsub.f32 1.0, %v2934_v22  ;;  %v2944_v11 = vand.u32 2147483648, %v6167_v4  ;;  %v2930_v15 = vor.u32 1.1754944e-38, %v2929_v59  ;;  %v7148_v59 = vld [vmem:[#allocation56_spill] sm:$0xff] }
 0x67f   :  { %4340 = vtanh.f32 %v6176_v41  ;;  %vm2928_vm15 = vcmp.eq.f32.partialorder %v2927_v47, 8.507059e+37  ;;  %vm2953_vm2 = vweird.f32 %v6187_v46  ;;  %v7149_v47 = vld [vmem:[#allocation57_spill] sm:$0xff] }
 0x680   :  { %v2936_v55 = vmul.f32 %v6174_v27, %v2935_v40  ;;  %4342 = vrcp.f32 %v6187_v46  ;;  %v2945_v39 = vor.u32 1.1754944e-38, %v2944_v11  ;;  %v7151_v11 = vld [vmem:[#allocation60_spill] sm:$0xff] }
 0x681   :  { %v4339_v32 = vpop.eup %4338  ;;  %4344 = vtanh.f32 %v2905_v31 }
 0x682   :  { %v2919_v13 = vmul.f32 %v4339_v32, %v2915_v18  ;;  %vm2924_vm9 = vweird.f32 %v4339_v32  ;;  %v2937_v7 = vadd.f32 %v6174_v27, %v2936_v55  ;;  %v7146_v55 = vld [vmem:[#allocation127_spill] sm:$0xff] }
 0x683   :  { %vm6199_vm12 = vmor %vm2923_vm11, %vm2924_vm9 }
 0x684   :  { %v2920_v1 = vsub.f32 1.0, %v2919_v13  ;;  %v2941_v45 = vsel %vm2940_vm14, %v6174_v27, %v2937_v7  ;;  %v7150_v7 = vld [vmem:[#allocation58_spill] sm:$0xff] }
 0x685   :  { %v4341_v5 = vpop.eup %4340 }
 0x686   :  { %v2848_v38 = vmul.f32 %v4341_v5, %v2841_v12  ;;  %v2921_v28 = vmul.f32 %v4339_v32, %v2920_v1  ;;  %v4343_v3 = vpop.eup %4342  ;;  %v2959_v5 = vand.u32 2147483648, %v6187_v46  ;;  %v2957_v12 = vand.u32 2147483647, %v6187_v46 }
 0x687   :  { %v2949_v22 = vmul.f32 %v4343_v3, %v6187_v46  ;;  %v4345_v4 = vpop.eup %4344  ;;  %vm2954_vm1 = vweird.f32 %v4343_v3 }
 0x688   :  { %v2969_v23 = vpack.c.bf16 %v2848_v38, %v2848_v38  ;;  %v2922_v2 = vadd.f32 %v4339_v32, %v2921_v28  ;;  %vm2955_vm3 = vmor %vm2953_vm2, %vm2954_vm1  ;;  %v2960_v43 = vor.u32 1.1754944e-38, %v2959_v5  ;;  %vm2958_vm4 = vcmp.eq.f32.partialorder %v2957_v12, 8.507059e+37  ;;  %v7168_v5 = vld [vmem:[#allocation84_spill] sm:$0xff]  ;;  %v7169_v12 = vld [vmem:[#allocation85_spill] sm:$0xff] }
 0x689   :  { %v2950_v27 = vsub.f32 1.0, %v2949_v22  ;;  %v7159_v22 = vld [vmem:[#allocation70_spill] sm:$0xff] }
 0x68a   :  { %2978 = vmatmul.bf16.vlgmr.msra.gmra.mxu3 %v2969_v23  ;;  %2991 = vmatmul.bf16.vlgmr.msra.gmra.mxu0 %v2969_v23  ;;  %v2926_v18 = vsel %vm6199_vm12, %v4339_v32, %v2922_v2  ;;  %v2946_v32 = vsel %vm2943_vm0, %v2945_v39, %v2941_v45  ;;  %v7147_v2 = vld [vmem:[#allocation55_spill] sm:$0xff]  ;;  %v7157_v45 = vld [vmem:[#allocation68_spill] sm:$0xff]  ;;  %v7158_v39 = vld [vmem:[#allocation69_spill] sm:$0xff] }
 0x68b   :  { %3004 = vmatmul.bf16.vlgmr.msra.gmra.mxu1 %v2969_v23  ;;  %3017 = vmatmul.bf16.vlgmr.msrb.gmra.mxu2 %v2969_v23  ;;  %v2931_v14 = vsel %vm2928_vm15, %v2930_v15, %v2926_v18  ;;  %v2964_v48 = vmul.f32 %v2946_v32, %v6055_v37  ;;  %v2951_v1 = vmul.f32 %v4343_v3, %v2950_v27  ;;  %v7154_v18 = vld [vmem:[#allocation64_spill] sm:$0xff]  ;;  %v7156_v15 = vld [vmem:[#allocation67_spill] sm:$0xff]  ;;  %v7164_v27 = vld [vmem:[#allocation78_spill] sm:$0xff] }
 0x68c   :  { %3146 = vmatpush.bf16.msra.mxu3 %v5110_v20  ;;  %3159 = vmatpush.bf16.msra.mxu0 %v5112_v57  ;;  %v2965_v13 = vmul.f32 %v4345_v4, %v2931_v14  ;;  %v7160_v14 = vld [vmem:[#allocation72_spill] sm:$0xff]  ;;  %v7161_v4 = vld [vmem:[#allocation73_spill] sm:$0xff] }
 0x68d   :  { %3172 = vmatpush.bf16.msra.mxu1 %v6759_v51  ;;  %3185 = vmatpush.bf16.msrb.mxu2 %v6760_v26  ;;  %v2952_v37 = vadd.f32 %v4343_v3, %v2951_v1  ;;  %v7162_v32 = vld [vmem:[#allocation76_spill] sm:$0xff] }
 0x68e   :  { %v6222_v40 = vadd.f32 %v2965_v13, %v2964_v48  ;;  %v7163_v13 = vld [vmem:[#allocation77_spill] sm:$0xff]  ;;  %v7165_v48 = vld [vmem:[#allocation79_spill] sm:$0xff]  ;;  %v7166_v1 = vld [vmem:[#allocation80_spill] sm:$0xff] }
 0x68f   :  { %v2956_v38 = vsel %vm2955_vm3, %v4343_v3, %v2952_v37  ;;  %v7153_v3 = vld [vmem:[#allocation63_spill] sm:$0xff]  ;;  %v7167_v37 = vld [vmem:[#allocation82_spill] sm:$0xff] }
 0x690   :  { %3147 = vmatpush.bf16.msra.mxu3 %v6761_v50  ;;  %3160 = vmatpush.bf16.msra.mxu0 %v6762_v60  ;;  %4346 = vtanh.f32 %v6222_v40 }
 0x691   :  { %3173 = vmatpush.bf16.msra.mxu1 %v6763_v63  ;;  %3186 = vmatpush.bf16.msrb.mxu2 %v6764_v58 }
 0x694   :  { %3148 = vmatpush.bf16.msra.mxu3 %v6765_v35  ;;  %3161 = vmatpush.bf16.msra.mxu0 %v6766_v0 }
 0x695   :  { %3174 = vmatpush.bf16.msra.mxu1 %v5142_v24  ;;  %3187 = vmatpush.bf16.msrb.mxu2 %v6767_v16 }
 0x696   :  { %v4347_v28 = vpop.eup %4346 }
 0x698   :  { %3149 = vmatpush.bf16.msra.mxu3 %v6768_v53  ;;  %3162 = vmatpush.bf16.msra.mxu0 %v6769_v34 }
 0x699   :  { %3175 = vmatpush.bf16.msra.mxu1 %v6770_v9  ;;  %3188 = vmatpush.bf16.msrb.mxu2 %v6771_v62 }
 0x69a   :  { %3034 = vmatmul.bf16.vlgmr.msrb.gmra.mxu3 %v2969_v23  ;;  %3047 = vmatmul.bf16.vlgmr.msrb.gmra.mxu0 %v2969_v23 }
 0x69b   :  { %3060 = vmatmul.bf16.vlgmr.msrb.gmra.mxu1 %v2969_v23  ;;  %3073 = vmatmul.bf16.vlgmr.msra.gmra.mxu2 %v2969_v23  ;;  %v2961_v23 = vsel %vm2958_vm4, %v2960_v43, %v2956_v38  ;;  %v7170_v38 = vld [vmem:[#allocation86_spill] sm:$0xff]  ;;  %v7172_v43 = vld [vmem:[#allocation89_spill] sm:$0xff] }
 0x69c   :  { %3150 = vmatpush.bf16.msra.mxu3 %v6772_v33  ;;  %3163 = vmatpush.bf16.msra.mxu0 %v6773_v44  ;;  %v2968_v46 = vmul.f32 %v4347_v28, %v2961_v23  ;;  %v7171_v28 = vld [vmem:[#allocation88_spill] sm:$0xff]  ;;  %v7173_v23 = vld [vmem:[#allocation90_spill] sm:$0xff] }
 0x69d   :  { %3176 = vmatpush.bf16.msra.mxu1 %v6774_v36  ;;  %3189 = vmatpush.bf16.msrb.mxu2 %v6775_v42 }
 0x69e   :  { %v3145_v31 = vpack.c.bf16 %v2968_v46, %v2968_v46  ;;  %v7174_v46 = vld [vmem:[#allocation91_spill] sm:$0xff] }
 0x6a0   :  { %3151 = vmatpush.bf16.msra.mxu3 %v6776_v29  ;;  %3164 = vmatpush.bf16.msra.mxu0 %v6777_v19 }
 0x6a1   :  { %3177 = vmatpush.bf16.msra.mxu1 %v5182_v52  ;;  %3190 = vmatpush.bf16.msrb.mxu2 %v5184_v30 }
 0x6a4   :  { %3152 = vmatpush.bf16.msra.mxu3 %v5188_v25  ;;  %3165 = vmatpush.bf16.msra.mxu0 %v5190_v49 }
 0x6a5   :  { %3178 = vmatpush.bf16.msra.mxu1 %v5194_v10  ;;  %3191 = vmatpush.bf16.msrb.mxu2 %v5196_v54 }
 0x6a8   :  { %3153 = vmatpush.bf16.msra.mxu3 %v5200_v8  ;;  %3166 = vmatpush.bf16.msra.mxu0 %v5202_v61 }
 0x6a9   :  { %3179 = vmatpush.bf16.msra.mxu1 %v5206_v21  ;;  %3192 = vmatpush.bf16.msrb.mxu2 %v7146_v55 }
 0x6ab   :  { %3154 = vmatmul.bf16.vlgmr.msra.gmra.mxu3 %v3145_v31  ;;  %3167 = vmatmul.bf16.vlgmr.msra.gmra.mxu0 %v3145_v31 }
 0x6ac   :  { %3266 = vmatpush.bf16.msrb.mxu3 %v7147_v2  ;;  %3279 = vmatpush.bf16.msrb.mxu0 %v7148_v59  ;;  %v7176_v2 = vld [vmem:[#allocation94_spill] sm:$0xff]  ;;  %v7177_v59 = vld [vmem:[#allocation95_spill] sm:$0xff] }
 0x6ad   :  { %3180 = vmatmul.bf16.vlgmr.msra.gmra.mxu1 %v3145_v31  ;;  %3193 = vmatmul.bf16.vlgmr.msrb.gmra.mxu2 %v3145_v31  ;;  %v7175_v31 = vld [vmem:[#allocation92_spill] sm:$0xff] }
 0x6ae   :  { %3292 = vmatpush.bf16.msrb.mxu1 %v7149_v47  ;;  %3305 = vmatpush.bf16.msra.mxu2 %v7150_v7  ;;  %v7178_v47 = vld [vmem:[#allocation98_spill] sm:$0xff] }
 0x6b0   :  { %3267 = vmatpush.bf16.msrb.mxu3 %v7151_v11  ;;  %3280 = vmatpush.bf16.msrb.mxu0 %v7152_v56 }
 0x6b2   :  { %3293 = vmatpush.bf16.msrb.mxu1 %v7153_v3  ;;  %3306 = vmatpush.bf16.msra.mxu2 %v7154_v18  ;;  %v7185_v3 = vld [vmem:[#allocation47_spill] sm:$0xff] }
 0x6b4   :  { %3268 = vmatpush.bf16.msrb.mxu3 %v7155_v17  ;;  %3281 = vmatpush.bf16.msrb.mxu0 %v7156_v15  ;;  %v7186_v15 = vld [vmem:[#allocation46_spill] sm:$0xff] }
 0x6b6   :  { %3294 = vmatpush.bf16.msrb.mxu1 %v7157_v45  ;;  %3307 = vmatpush.bf16.msra.mxu2 %v7158_v39 }
 0x6b8   :  { %3269 = vmatpush.bf16.msrb.mxu3 %v7159_v22  ;;  %3282 = vmatpush.bf16.msrb.mxu0 %v7160_v14 }
 0x6ba   :  { %3295 = vmatpush.bf16.msrb.mxu1 %v7161_v4  ;;  %3308 = vmatpush.bf16.msra.mxu2 %v7162_v32 }
 0x6bc   :  { %3270 = vmatpush.bf16.msrb.mxu3 %v7163_v13  ;;  %3283 = vmatpush.bf16.msrb.mxu0 %v7164_v27 }
 0x6be   :  { %3296 = vmatpush.bf16.msrb.mxu1 %v7165_v48  ;;  %3309 = vmatpush.bf16.msra.mxu2 %v7166_v1 }
 0x6c0   :  { %3271 = vmatpush.bf16.msrb.mxu3 %v7167_v37  ;;  %3284 = vmatpush.bf16.msrb.mxu0 %v7168_v5  ;;  %v7187_v37 = vld [vmem:[#allocation49_spill] sm:$0xff] }
 0x6c2   :  { %3297 = vmatpush.bf16.msrb.mxu1 %v7169_v12  ;;  %3310 = vmatpush.bf16.msra.mxu2 %v7170_v38 }
 0x6c4   :  { %3272 = vmatpush.bf16.msrb.mxu3 %v7171_v28  ;;  %3285 = vmatpush.bf16.msrb.mxu0 %v7172_v43  ;;  %v7188_v28 = vld [vmem:[#allocation102_spill] sm:$0xff]  ;;  %v7189_v43 = vld [vmem:[#allocation128_spill] sm:$0xff] }
 0x6c6   :  { %3298 = vmatpush.bf16.msrb.mxu1 %v7173_v23  ;;  %3311 = vmatpush.bf16.msra.mxu2 %v7174_v46  ;;  %v451_v23 = vadd.f32 %v7189_v43, %v7188_v28 }
 0x6c8   :  { %3273 = vmatpush.bf16.msrb.mxu3 %v7175_v31  ;;  %3286 = vmatpush.bf16.msrb.mxu0 %v7176_v2 }
 0x6ca   :  { %3299 = vmatpush.bf16.msrb.mxu1 %v7177_v59  ;;  %3312 = vmatpush.bf16.msra.mxu2 %v7178_v47 }
 0x6cc   :  { %3319 = vmatpush.bf16.msra.mxu3 %v5110_v20  ;;  %3332 = vmatpush.bf16.msra.mxu0 %v5112_v57 }
 0x6ce   :  { %3345 = vmatpush.bf16.msra.mxu1 %v6759_v51  ;;  %3358 = vmatpush.bf16.msrb.mxu2 %v6760_v26  ;;  %v7179_v51 = vld [vmem:[#allocation51_spill] sm:$0xff] }
 0x6d0   :  { %3320 = vmatpush.bf16.msra.mxu3 %v6761_v50  ;;  %3333 = vmatpush.bf16.msra.mxu0 %v6762_v60  ;;  %v7181_v50 = vld [vmem:[#allocation45_spill] sm:$0xff] }
 0x6d2   :  { %3346 = vmatpush.bf16.msra.mxu1 %v6763_v63  ;;  %3359 = vmatpush.bf16.msrb.mxu2 %v6764_v58 }
 0x6d4   :  { %3321 = vmatpush.bf16.msra.mxu3 %v6765_v35  ;;  %3334 = vmatpush.bf16.msra.mxu0 %v6766_v0 }
 0x6d6   :  { %3347 = vmatpush.bf16.msra.mxu1 %v5142_v24  ;;  %3360 = vmatpush.bf16.msrb.mxu2 %v6767_v16  ;;  %v7183_v16 = vld [vmem:[#allocation48_spill] sm:$0xff] }
 0x6d8   :  { %3322 = vmatpush.bf16.msra.mxu3 %v6768_v53  ;;  %3335 = vmatpush.bf16.msra.mxu0 %v6769_v34  ;;  %v7184_v53 = vld [vmem:[#allocation97_spill] sm:$0xff] }
 0x6d9   :  { %v364_v34 = vadd.f32 %v7184_v53, %v7183_v16 }
 0x6da   :  { %3348 = vmatpush.bf16.msra.mxu1 %v6770_v9  ;;  %3361 = vmatpush.bf16.msrb.mxu2 %v6771_v62 }
 0x6dc   :  { %3323 = vmatpush.bf16.msra.mxu3 %v6772_v33  ;;  %3336 = vmatpush.bf16.msra.mxu0 %v6773_v44 }
 0x6de   :  { %3349 = vmatpush.bf16.msra.mxu1 %v6774_v36  ;;  %3362 = vmatpush.bf16.msrb.mxu2 %v6775_v42 }
 0x6e0   :  { %3324 = vmatpush.bf16.msra.mxu3 %v6776_v29  ;;  %3337 = vmatpush.bf16.msra.mxu0 %v6777_v19 }
 0x6e2   :  { %3350 = vmatpush.bf16.msra.mxu1 %v5182_v52  ;;  %3363 = vmatpush.bf16.msrb.mxu2 %v5184_v30 }
 0x6e4   :  { %3325 = vmatpush.bf16.msra.mxu3 %v5188_v25  ;;  %3338 = vmatpush.bf16.msra.mxu0 %v5190_v49 }
 0x6e6   :  { %3351 = vmatpush.bf16.msra.mxu1 %v5194_v10  ;;  %3364 = vmatpush.bf16.msrb.mxu2 %v5196_v54  ;;  %v7180_v10 = vld [vmem:[#allocation99_spill] sm:$0xff] }
 0x6e7   :  { %v393_v26 = vadd.f32 %v7180_v10, %v7179_v51 }
 0x6e8   :  { %3326 = vmatpush.bf16.msra.mxu3 %v5200_v8  ;;  %3339 = vmatpush.bf16.msra.mxu0 %v5202_v61  ;;  %v7182_v8 = vld [vmem:[#allocation100_spill] sm:$0xff] }
 0x6e9   :  { %v422_v60 = vadd.f32 %v7182_v8, %v7181_v50 }
 0x6ea   :  { %3352 = vmatpush.bf16.msra.mxu1 %v5206_v21  ;;  %3365 = vmatpush.bf16.msrb.mxu2 %v7146_v55 }
 0x707   :  { %v2992_v20 = vpop.f32.mrf.mxu0 }
 0x708   :  { %v3005_v57 = vpop.f32.mrf.mxu1  ;;  %v2993_v18 = vadd.f32 %v2992_v20, %v7185_v3 }
 0x709   :  { %v3006_v45 = vadd.f32 %v3005_v57, %v7186_v15 }
 0x70d   :  { %v2979_v24 = vpop.f32.mrf.mxu3 }
 0x70e   :  { %v6312_v30 = vpop.f32.mrf.mxu2  ;;  %v2980_v5 = vadd.f32 %v2979_v24, %v7187_v37 }
 0x70f   :  { %v2994_v52 = vpop.f32.mrf.mxu0 }
 0x710   :  { %v3007_v25 = vpop.f32.mrf.mxu1 }
 0x715   :  { %v2981_v49 = vpop.f32.mrf.mxu3 }
 0x716   :  { %v3020_v54 = vpop.f32.mrf.mxu2 }
 0x717   :  { %v3048_v61 = vpop.f32.mrf.mxu0 }
 0x718   :  { %v3079_v63 = vadd.f32 %v3048_v61, %v393_v26  ;;  %v3061_v21 = vpop.f32.mrf.mxu1 }
 0x719   :  { %v3080_v58 = vadd.f32 %v3061_v21, %v422_v60 }
 0x71a   :  { %v4006_v35 = vmul.f32 -1.442695, %v3079_v63 }
 0x71b   :  { %v4007_v0 = vmul.f32 -1.442695, %v3080_v58 }
 0x71c   :  { %4348 = vpow2.f32 %v4006_v35 }
 0x71d   :  { %4350 = vpow2.f32 %v4007_v0  ;;  %v3035_v9 = vpop.f32.mrf.mxu3 }
 0x71e   :  { %v3078_v62 = vadd.f32 %v3035_v9, %v364_v34  ;;  %v3074_v33 = vpop.f32.mrf.mxu2 }
 0x71f   :  { %v3050_v44 = vpop.f32.mrf.mxu0  ;;  %v3081_v57 = vadd.f32 %v3074_v33, %v451_v23 }
 0x720   :  { %v4005_v36 = vmul.f32 -1.442695, %v3078_v62  ;;  %v3063_v42 = vpop.f32.mrf.mxu1 }
 0x722   :  { %v4349_v29 = vpop.eup %4348  ;;  %4352 = vpow2.f32 %v4005_v36 }
 0x723   :  { %v4351_v19 = vpop.eup %4350  ;;  %v3092_v55 = vadd.f32 1.0, %v4349_v29 }
 0x724   :  { %v6320_v11 = vadd.f32 1.0, %v4351_v19 }
 0x725   :  { %4354 = vrcp.f32 %v3092_v55  ;;  %v3037_v7 = vpop.f32.mrf.mxu3  ;;  %v3120_v51 = vand.u32 2147483648, %v3092_v55  ;;  %vm3114_vm6 = vweird.f32 %v3092_v55  ;;  %v3118_v50 = vand.u32 2147483647, %v3092_v55 }
 0x726   :  { %v3076_v56 = vpop.f32.mrf.mxu2  ;;  %4356 = vrcp.f32 %v6320_v11  ;;  %vm3129_vm14 = vweird.f32 %v6320_v11 }
 0x727   :  { %v3121_v16 = vor.u32 1.1754944e-38, %v3120_v51  ;;  %vm3119_vm10 = vcmp.eq.f32.partialorder %v3118_v50, 8.507059e+37 }
 0x728   :  { %v4353_v17 = vpop.eup %4352  ;;  %v3168_v39 = vpop.f32.mrf.mxu0 }
 0x729   :  { %v3091_v22 = vadd.f32 1.0, %v4353_v17  ;;  %v3199_v14 = vadd.f32 %v3168_v39, %v2993_v18 }
 0x72a   :  { %v3181_v4 = vpop.f32.mrf.mxu1 }
 0x72b   :  { %v3200_v32 = vadd.f32 %v3181_v4, %v3006_v45  ;;  %v4355_v13 = vpop.eup %4354  ;;  %4358 = vrcp.f32 %v3091_v22  ;;  %v4009_v48 = vmul.f32 -1.442695, %v3199_v14  ;;  %v3105_v61 = vand.u32 2147483648, %v3091_v22 }
 0x72c   :  { %v3110_v27 = vmul.f32 %v4355_v13, %v3092_v55  ;;  %v6330_v2 = vpop.eup %4356  ;;  %vm3115_vm5 = vweird.f32 %v4355_v13  ;;  %v3103_v58 = vand.u32 2147483647, %v3091_v22  ;;  %vm3099_vm9 = vweird.f32 %v3091_v22 }
 0x72d   :  { %v4010_v1 = vmul.f32 -1.442695, %v3200_v32  ;;  %4360 = vpow2.f32 %v4009_v48  ;;  %v3125_v10 = vmul.f32 %v6330_v2, %v6320_v11  ;;  %vm6334_vm7 = vmor %vm3114_vm6, %vm3115_vm5  ;;  %v3106_v44 = vor.u32 1.1754944e-38, %v3105_v61  ;;  %v3447_v48 = vld [vmem:[#allocation8 + $0x48] sm:$0xff] }
 0x72e   :  { %v3111_v12 = vsub.f32 1.0, %v3110_v27  ;;  %v3155_v38 = vpop.f32.mrf.mxu3  ;;  %vm3104_vm12 = vcmp.eq.f32.partialorder %v3103_v58, 8.507059e+37  ;;  %vm3130_vm13 = vweird.f32 %v6330_v2  ;;  %v3019_v14 = vadd.f32 %v6312_v30, %v5345_v6 }
 0x72f   :  { %4362 = vpow2.f32 %v4010_v1  ;;  %v3198_v46 = vadd.f32 %v3155_v38, %v2980_v5  ;;  %v3126_v53 = vsub.f32 1.0, %v3125_v10  ;;  %v3135_v4 = vand.u32 2147483648, %v6320_v11  ;;  %vm6356_vm15 = vmor %vm3129_vm14, %vm3130_vm13 }
 0x730   :  { %v6328_v31 = vpop.f32.mrf.mxu2  ;;  %v3112_v59 = vmul.f32 %v4355_v13, %v3111_v12  ;;  %v3170_v47 = vpop.f32.mrf.mxu0 }
 0x731   :  { %v4359_v20 = vpop.eup %4358  ;;  %v4008_v52 = vmul.f32 -1.442695, %v3198_v46  ;;  %v3127_v55 = vmul.f32 %v6330_v2, %v3126_v53  ;;  %v3201_v5 = vadd.f32 %v6328_v31, %v3019_v14  ;;  %v3136_v38 = vor.u32 1.1754944e-38, %v3135_v4  ;;  %v3448_v4 = vld [vmem:[#allocation8 + $0x50] sm:$0xff]  ;;  %v3443_v31 = vld [vmem:[#allocation8 + $0x28] sm:$0xff] }
 0x732   :  { %v3183_v25 = vpop.f32.mrf.mxu1  ;;  %v3095_v24 = vmul.f32 %v4359_v20, %v3091_v22  ;;  %v3113_v49 = vadd.f32 %v4355_v13, %v3112_v59  ;;  %vm3100_vm8 = vweird.f32 %v4359_v20 }
 0x733   :  { %4364 = vpow2.f32 %v4008_v52  ;;  %v4361_v26 = vpop.eup %4360  ;;  %vm3101_vm11 = vmor %vm3099_vm9, %vm3100_vm8  ;;  %v3128_v22 = vadd.f32 %v6330_v2, %v3127_v55 }
 0x734   :  { %v3096_v54 = vsub.f32 1.0, %v3095_v24  ;;  %4366 = vtanh.f32 %v3081_v57  ;;  %v6338_v63 = vadd.f32 1.0, %v4361_v26  ;;  %v3117_v35 = vsel %vm6334_vm7, %v4355_v13, %v3113_v49 }
 0x735   :  { %v4363_v8 = vpop.eup %4362  ;;  %v3122_v36 = vsel %vm3119_vm10, %v3121_v16, %v3117_v35  ;;  %v3132_v30 = vsel %vm6356_vm15, %v6330_v2, %v3128_v22 }
 0x736   :  { %v3097_v21 = vmul.f32 %v4359_v20, %v3096_v54  ;;  %v3157_v0 = vpop.f32.mrf.mxu3  ;;  %4368 = vrcp.f32 %v6338_v63  ;;  %v6343_v34 = vadd.f32 1.0, %v4363_v8  ;;  %v3140_v56 = vmul.f32 %v3122_v36, %v6176_v41 }
 0x737   :  { %v3133_v41 = vand.u32 2147483647, %v6320_v11  ;;  %v3240_v28 = vand.u32 2147483648, %v6338_v63  ;;  %vm3234_vm1 = vweird.f32 %v6338_v63  ;;  %v3238_v46 = vand.u32 2147483647, %v6338_v63 }
 0x738   :  { %v3196_v9 = vpop.f32.mrf.mxu2  ;;  %v3098_v62 = vadd.f32 %v4359_v20, %v3097_v21  ;;  %4370 = vrcp.f32 %v6343_v34  ;;  %v3255_v0 = vand.u32 2147483648, %v6343_v34  ;;  %vm3249_vm10 = vweird.f32 %v6343_v34 }
 0x739   :  { %v4365_v33 = vpop.eup %4364  ;;  %vm3134_vm2 = vcmp.eq.f32.partialorder %v3133_v41, 8.507059e+37  ;;  %v3241_v24 = vor.u32 1.1754944e-38, %v3240_v28  ;;  %vm3239_vm6 = vcmp.eq.f32.partialorder %v3238_v46, 8.507059e+37  ;;  %v3253_v16 = vand.u32 2147483647, %v6343_v34  ;;  %v3445_v28 = vld [vmem:[#allocation8 + $0x38] sm:$0xff] }
 0x73a   :  { %v3102_v42 = vsel %vm3101_vm11, %v4359_v20, %v3098_v62  ;;  %v3211_v29 = vadd.f32 1.0, %v4365_v33  ;;  %v4367_v19 = vpop.eup %4366  ;;  %v3137_v2 = vsel %vm3134_vm2, %v3136_v38, %v3132_v30  ;;  %v3256_v9 = vor.u32 1.1754944e-38, %v3255_v0 }
 0x73b   :  { %v3107_v7 = vsel %vm3104_vm12, %v3106_v44, %v3102_v42  ;;  %vm3254_vm12 = vcmp.eq.f32.partialorder %v3253_v16, 8.507059e+37 }
 0x73c   :  { %v3141_v18 = vmul.f32 %v4367_v19, %v3107_v7  ;;  %4372 = vrcp.f32 %v3211_v29  ;;  %v4369_v17 = vpop.eup %4368  ;;  %v3223_v47 = vand.u32 2147483647, %v3211_v29  ;;  %v3225_v20 = vand.u32 2147483648, %v3211_v29  ;;  %v3453_v19 = vld [vmem:[#allocation8 + $0x78] sm:$0xff]  ;;  %v3452_v7 = vld [vmem:[#allocation8 + $0x70] sm:$0xff] }
 0x73d   :  { %v3230_v39 = vmul.f32 %v4369_v17, %v6338_v63  ;;  %vm3235_vm0 = vweird.f32 %v4369_v17  ;;  %vm3219_vm5 = vweird.f32 %v3211_v29 }
 0x73e   :  { %v3142_v45 = vadd.f32 %v3141_v18, %v3140_v56  ;;  %v4371_v13 = vpop.eup %4370  ;;  %vm6368_vm3 = vmor %vm3234_vm1, %vm3235_vm0  ;;  %v3226_v26 = vor.u32 1.1754944e-38, %v3225_v20  ;;  %vm3224_vm8 = vcmp.eq.f32.partialorder %v3223_v47, 8.507059e+37  ;;  %v3451_v18 = vld [vmem:[#allocation8 + $0x68] sm:$0xff]  ;;  %v3442_v47 = vld [vmem:[#allocation8 + $0x20] sm:$0xff] }
 0x73f   :  { %v3231_v32 = vsub.f32 1.0, %v3230_v39  ;;  %v3245_v43 = vmul.f32 %v4371_v13, %v6343_v34  ;;  %vm3250_vm9 = vweird.f32 %v4371_v13  ;;  %v3449_v39 = vld [vmem:[#allocation8 + $0x58] sm:$0xff] }
 0x740   :  { %4374 = vtanh.f32 %v3142_v45  ;;  %vm3251_vm11 = vmor %vm3249_vm10, %vm3250_vm9 }
 0x741   :  { %v3232_v1 = vmul.f32 %v4369_v17, %v3231_v32  ;;  %4376 = vtanh.f32 %v3201_v5  ;;  %v3246_v49 = vsub.f32 1.0, %v3245_v43 }
 0x742   :  { %v4373_v27 = vpop.eup %4372 }
 0x743   :  { %v3215_v12 = vmul.f32 %v4373_v27, %v3211_v29  ;;  %v3233_v11 = vadd.f32 %v4369_v17, %v3232_v1  ;;  %vm3220_vm4 = vweird.f32 %v4373_v27  ;;  %v3247_v60 = vmul.f32 %v4371_v13, %v3246_v49 }
 0x744   :  { %vm3221_vm7 = vmor %vm3219_vm5, %vm3220_vm4 }
 0x745   :  { %v3216_v23 = vsub.f32 1.0, %v3215_v12  ;;  %v3237_v52 = vsel %vm6368_vm3, %v4369_v17, %v3233_v11  ;;  %v3248_v35 = vadd.f32 %v4371_v13, %v3247_v60  ;;  %v3450_v17 = vld [vmem:[#allocation8 + $0x60] sm:$0xff]  ;;  %v3444_v11 = vld [vmem:[#allocation8 + $0x30] sm:$0xff] }
 0x746   :  { %v4375_v59 = vpop.eup %4374  ;;  %v3242_v54 = vsel %vm3239_vm6, %v3241_v24, %v3237_v52  ;;  %v3446_v12 = vld [vmem:[#allocation8 + $0x40] sm:$0xff]  ;;  %v3440_v52 = vld [vmem:[#allocation8 + $0x10] sm:$0xff] }
 0x747   :  { %v3217_v57 = vmul.f32 %v4373_v27, %v3216_v23  ;;  %v3144_v25 = vmul.f32 %v4375_v59, %v3137_v2  ;;  %v4377_v8 = vpop.eup %4376  ;;  %v3260_v63 = vmul.f32 %v3242_v54, %v6222_v40  ;;  %v3252_v53 = vsel %vm3251_vm11, %v4371_v13, %v3248_v35  ;;  %v3441_v2 = vld [vmem:[#allocation8 + $0x18] sm:$0xff] }
 0x748   :  { %v3257_v33 = vsel %vm3254_vm12, %v3256_v9, %v3252_v53 }
 0x749   :  { %v3218_v51 = vadd.f32 %v4373_v27, %v3217_v57  ;;  %v3265_v10 = vpack.c.bf16 %v3144_v25, %v3144_v25 }
 0x74b   :  { %v3222_v50 = vsel %vm3221_vm7, %v4373_v27, %v3218_v51  ;;  %3274 = vmatmul.bf16.vlgmr.msrb.gmra.mxu3 %v3265_v10  ;;  %3287 = vmatmul.bf16.vlgmr.msrb.gmra.mxu0 %v3265_v10  ;;  %v3439_v51 = vld [vmem:[#allocation8 + $0x8] sm:$0xff] }
 0x74c   :  { %v3227_v61 = vsel %vm3224_vm8, %v3226_v26, %v3222_v50  ;;  %3300 = vmatmul.bf16.vlgmr.msrb.gmra.mxu1 %v3265_v10  ;;  %3313 = vmatmul.bf16.vlgmr.msra.gmra.mxu2 %v3265_v10  ;;  %v3438_v26 = vld [vmem:[#allocation8] sm:$0xff] }
 0x74d   :  { %v3261_v21 = vmul.f32 %v4377_v8, %v3227_v61  ;;  %3458 = vmatpush.msrb.mxu3 %v3453_v19 }
 0x74f   :  { %v6375_v58 = vadd.f32 %v3261_v21, %v3260_v63  ;;  %3459 = vmatpush.msrb.mxu3 %v3452_v7 }
 0x751   :  { %4378 = vtanh.f32 %v6375_v58  ;;  %3460 = vmatpush.msrb.mxu3 %v3451_v18 }
 0x753   :  { %3461 = vmatpush.msrb.mxu3 %v3450_v17 }
 0x755   :  { %3462 = vmatpush.msrb.mxu3 %v3449_v39 }
 0x757   :  { %v4379_v62 = vpop.eup %4378  ;;  %3463 = vmatpush.msrb.mxu3 %v3448_v4 }
 0x758   :  { %v3264_v40 = vmul.f32 %v4379_v62, %v3257_v33 }
 0x759   :  { %3464 = vmatpush.msrb.mxu3 %v3447_v48 }
 0x75a   :  { %v3318_v44 = vpack.c.bf16 %v3264_v40, %v3264_v40 }
 0x75b   :  { %3465 = vmatpush.msrb.mxu3 %v3446_v12 }
 0x75c   :  { %3327 = vmatmul.bf16.vlgmr.msra.gmra.mxu3 %v3318_v44  ;;  %3340 = vmatmul.bf16.vlgmr.msra.gmra.mxu0 %v3318_v44 }
 0x75d   :  { %3353 = vmatmul.bf16.vlgmr.msra.gmra.mxu1 %v3318_v44  ;;  %3366 = vmatmul.bf16.vlgmr.msrb.gmra.mxu2 %v3318_v44 }
 0x75e   :  { %3466 = vmatpush.msrb.mxu3 %v3445_v28 }
 0x760   :  { %3467 = vmatpush.msrb.mxu3 %v3444_v11 }
 0x762   :  { %3468 = vmatpush.msrb.mxu3 %v3443_v31 }
 0x764   :  { %3469 = vmatpush.msrb.mxu3 %v3442_v47 }
 0x766   :  { %3470 = vmatpush.msrb.mxu3 %v3441_v2 }
 0x768   :  { %3471 = vmatpush.msrb.mxu3 %v3440_v52 }
 0x76a   :  { %3472 = vmatpush.msrb.mxu3 %v3439_v51 }
 0x76c   :  { %3473 = vmatpush.msrb.mxu3 %v3438_v26 }
 0x7c8   :  { %v3288_v36 = vpop.f32.mrf.mxu0 }
 0x7c9   :  { %v3301_v42 = vpop.f32.mrf.mxu1  ;;  %v3289_v14 = vadd.f32 %v3288_v36, %v7185_v3 }
 0x7ca   :  { %v3302_v32 = vadd.f32 %v3301_v42, %v7186_v15 }
 0x7ce   :  { %v3275_v29 = vpop.f32.mrf.mxu3 }
 0x7cf   :  { %v6381_v55 = vpop.f32.mrf.mxu2  ;;  %v3276_v38 = vadd.f32 %v3275_v29, %v7187_v37 }
 0x7d0   :  { %v3290_v34 = vpop.f32.mrf.mxu0  ;;  %v3315_v61 = vadd.f32 %v6381_v55, %v5345_v6 }
 0x7d1   :  { %v3303_v56 = vpop.f32.mrf.mxu1 }
 0x7d6   :  { %v3277_v45 = vpop.f32.mrf.mxu3 }
 0x7d7   :  { %v3316_v22 = vpop.f32.mrf.mxu2 }
 0x7d9   :  { %v3341_v13 = vpop.f32.mrf.mxu0 }
 0x7da   :  { %v3372_v41 = vadd.f32 %v3341_v13, %v3289_v14  ;;  %v3354_v27 = vpop.f32.mrf.mxu1 }
 0x7db   :  { %v3373_v1 = vadd.f32 %v3354_v27, %v3302_v32 }
 0x7dc   :  { %v4012_v5 = vmul.f32 -1.442695, %v3372_v41 }
 0x7dd   :  { %v4013_v30 = vmul.f32 -1.442695, %v3373_v1 }
 0x7de   :  { %4380 = vpow2.f32 %v4012_v5 }
 0x7df   :  { %4382 = vpow2.f32 %v4013_v30  ;;  %v3328_v3 = vpop.f32.mrf.mxu3 }
 0x7e0   :  { %v3371_v43 = vadd.f32 %v3328_v3, %v3276_v38  ;;  %v3367_v15 = vpop.f32.mrf.mxu2 }
 0x7e1   :  { %v3343_v23 = vpop.f32.mrf.mxu0  ;;  %v3374_v0 = vadd.f32 %v3367_v15, %v3315_v61 }
 0x7e2   :  { %v4011_v46 = vmul.f32 -1.442695, %v3371_v43  ;;  %v3356_v59 = vpop.f32.mrf.mxu1 }
 0x7e4   :  { %v4381_v20 = vpop.eup %4380  ;;  %4384 = vpow2.f32 %v4011_v46 }
 0x7e5   :  { %v4383_v57 = vpop.eup %4382  ;;  %v3385_v37 = vadd.f32 1.0, %v4381_v20 }
 0x7e6   :  { %v3386_v24 = vadd.f32 1.0, %v4383_v57 }
 0x7e7   :  { %4386 = vrcp.f32 %v3385_v37  ;;  %v3330_v25 = vpop.f32.mrf.mxu3  ;;  %v3413_v9 = vand.u32 2147483648, %v3385_v37  ;;  %vm3407_vm14 = vweird.f32 %v3385_v37  ;;  %v3411_v40 = vand.u32 2147483647, %v3385_v37 }
 0x7e8   :  { %v3369_v49 = vpop.f32.mrf.mxu2  ;;  %4388 = vrcp.f32 %v3386_v24  ;;  %v3428_v32 = vand.u32 2147483648, %v3386_v24  ;;  %vm3422_vm6 = vweird.f32 %v3386_v24  ;;  %v3426_v13 = vand.u32 2147483647, %v3386_v24 }
 0x7e9   :  { %v3414_v6 = vor.u32 1.1754944e-38, %v3413_v9  ;;  %vm3412_vm2 = vcmp.eq.f32.partialorder %v3411_v40, 8.507059e+37 }
 0x7ea   :  { %v4385_v10 = vpop.eup %4384  ;;  %v3429_v27 = vor.u32 1.1754944e-38, %v3428_v32  ;;  %vm3427_vm8 = vcmp.eq.f32.partialorder %v3426_v13, 8.507059e+37 }
 0x7eb   :  { %v3384_v54 = vadd.f32 1.0, %v4385_v10 }
 0x7ed   :  { %v4387_v50 = vpop.eup %4386  ;;  %4390 = vrcp.f32 %v3384_v54  ;;  %v3398_v44 = vand.u32 2147483648, %v3384_v54  ;;  %v3396_v42 = vand.u32 2147483647, %v3384_v54  ;;  %vm3392_vm1 = vweird.f32 %v3384_v54 }
 0x7ee   :  { %v3403_v8 = vmul.f32 %v4387_v50, %v3385_v37  ;;  %v4389_v63 = vpop.eup %4388  ;;  %vm3408_vm13 = vweird.f32 %v4387_v50  ;;  %4392 = vtanh.f32 %v3374_v0 }
 0x7ef   :  { %v3418_v62 = vmul.f32 %v4389_v63, %v3386_v24  ;;  %vm3409_vm15 = vmor %vm3407_vm14, %vm3408_vm13  ;;  %v3399_v34 = vor.u32 1.1754944e-38, %v3398_v44  ;;  %vm3397_vm4 = vcmp.eq.f32.partialorder %v3396_v42, 8.507059e+37  ;;  %vm3423_vm5 = vweird.f32 %v4389_v63 }
 0x7f0   :  { %v3404_v60 = vsub.f32 1.0, %v3403_v8  ;;  %vm3424_vm7 = vmor %vm3422_vm6, %vm3423_vm5 }
 0x7f1   :  { %v3419_v19 = vsub.f32 1.0, %v3418_v62 }
 0x7f2   :  { %v3405_v21 = vmul.f32 %v4387_v50, %v3404_v60 }
 0x7f3   :  { %v4391_v35 = vpop.eup %4390  ;;  %v3420_v17 = vmul.f32 %v4389_v63, %v3419_v19 }
 0x7f4   :  { %v3388_v16 = vmul.f32 %v4391_v35, %v3384_v54  ;;  %v3406_v53 = vadd.f32 %v4387_v50, %v3405_v21  ;;  %vm3393_vm0 = vweird.f32 %v4391_v35  ;;  %v4393_v18 = vpop.eup %4392 }
 0x7f5   :  { %vm3394_vm3 = vmor %vm3392_vm1, %vm3393_vm0  ;;  %v3421_v4 = vadd.f32 %v4389_v63, %v3420_v17 }
 0x7f6   :  { %v3389_v33 = vsub.f32 1.0, %v3388_v16  ;;  %v3410_v29 = vsel %vm3409_vm15, %v4387_v50, %v3406_v53 }
 0x7f7   :  { %v3415_v7 = vsel %vm3412_vm2, %v3414_v6, %v3410_v29  ;;  %v3425_v41 = vsel %vm3424_vm7, %v4389_v63, %v3421_v4 }
 0x7f8   :  { %v3390_v36 = vmul.f32 %v4391_v35, %v3389_v33  ;;  %v3433_v39 = vmul.f32 %v3415_v7, %v6375_v58  ;;  %v3430_v1 = vsel %vm3427_vm8, %v3429_v27, %v3425_v41  ;;  %v4139_v58 = vld [vmem:[%s6404_s9] ss:$0 sm:$0xff] }
 0x7fa   :  { %v3391_v55 = vadd.f32 %v4391_v35, %v3390_v36 }
 0x7fc   :  { %v3395_v56 = vsel %vm3394_vm3, %v4391_v35, %v3391_v55 }
 0x7fd   :  { %v3400_v45 = vsel %vm3397_vm4, %v3399_v34, %v3395_v56 }
 0x7fe   :  { %v3434_v22 = vmul.f32 %v4393_v18, %v3400_v45 }
 0x800   :  { %v3435_v14 = vadd.f32 %v3434_v22, %v3433_v39 }
 0x802   :  { %4394 = vtanh.f32 %v3435_v14 }
 0x808   :  { %v4395_v48 = vpop.eup %4394 }
 0x809   :  { %v3437_v5 = vmul.f32 %v4395_v48, %v3430_v1 }
 0x80b   :  { %3474 = vmatmul.f32.vlgmr.msrb.gmra.mxu3 %v3437_v5 }
 0x88e   :  { %v3475_v12 = vpop.f32.mrf.mxu3 }
 0x88f   :  { %v3476_v30 = vadd.f32 %v4139_v58, %v3475_v12 }
 0x891   :  { %3478 = vst [vmem:[%s6405_s10] sm:$0xff] %v3476_v30 }
 0x892   :  { %3483 = vsyncpa [#allocation4], 1 }
 0x893   :  { %3484 = vsyncpa [#allocation6], 1 }
 0x894   :  { %3485 = vsyncpa [#allocation9], 1 }

</bundles_post_ra>
